<compile_context>
chip_gen: v6e
topology: v6e:2x2x1
jax: 0.10.0
libtpu: 0.0.40
codegen_flags: <defaults>
</compile_context>

<pallas_src>
import numpy as np
import jax
import jax.numpy as jnp
from jax.experimental import pallas as pl
from jax.experimental.pallas import tpu as pltpu


# ----------------------- Pallas kernels -----------------------

def _make_conv_kernel(tap_offsets, nq):
    """Stride-2 Conv + folded-BN + ReLU over parity-stacked flattened input.

    x_ref:   (Kp, Npad) bf16   parity-split channel planes, lane-padded by max shift
    w_ref:   (T, Cout, Kp) bf16 per-quad-tap weights (BN scale folded in)
    bias_ref:(Cout, 1) f32      folded BN shift
    o_ref:   (Cout, Nq) bf16    conv output on the parity grid (garbage at invalid cols)
    """
    def kernel(x_ref, w_ref, bias_ref, o_ref):
        x = x_ref[...]                                        # (Kp, Npad) bf16
        acc = None
        for t, s in enumerate(tap_offsets):                   # static unrolled taps
            xt = x[:, s:s + nq]                               # plain static lane slice
            d = jnp.dot(w_ref[t], xt, preferred_element_type=jnp.float32)
            acc = d if acc is None else acc + d
        o_ref[...] = jnp.maximum(acc + bias_ref[...], 0.0).astype(o_ref.dtype)
    return kernel


def _make_conv_head_kernel(tap_offsets, nq):
    """Last conv layer with fused AdaptiveAvgPool2d(1)+Flatten and Linear head."""
    def kernel(x_ref, w_ref, bias_ref, pool_ref, fcw_ref, fcb_ref,
               latent_ref, levels_ref):
        x = x_ref[...]
        acc = None
        for t, s in enumerate(tap_offsets):
            d = jnp.dot(w_ref[t], x[:, s:s + nq],
                        preferred_element_type=jnp.float32)
            acc = d if acc is None else acc + d
        y = jnp.maximum(acc + bias_ref[...], 0.0)             # (Cout, Nq) f32
        # GAP over valid positions via matmul with the pooling matrix (zeros on
        # garbage columns), then the FC head.  Dropout is identity at inference.
        latent = jnp.dot(y, pool_ref[...], preferred_element_type=jnp.float32)
        latent_ref[...] = latent                              # (Cout, B)
        levels_ref[...] = (
            jnp.dot(fcw_ref[...], latent, preferred_element_type=jnp.float32)
            + fcb_ref[...])                                   # (L, B)
    return kernel


# ----------------------- Pallas wrappers -----------------------

def conv_bn_relu(planes, w_taps, bias, tap_offsets, nq, cout):
    Kp, Npad = planes.shape
    T = w_taps.shape[0]
    return pl.pallas_call(
        _make_conv_kernel(tap_offsets, nq),
        out_shape=jax.ShapeDtypeStruct((cout, nq), jnp.bfloat16),
        grid_spec=pltpu.PrefetchScalarGridSpec(
            num_scalar_prefetch=0,
            grid=(1,),                                        # single step per layer
            in_specs=[
                pl.BlockSpec((Kp, Npad), lambda i: (0, 0)),
                pl.BlockSpec((T, cout, Kp), lambda i: (0, 0, 0)),
                pl.BlockSpec((cout, 1), lambda i: (0, 0)),
            ],
            out_specs=pl.BlockSpec((cout, nq), lambda i: (0, 0)),
        ),
        compiler_params=pltpu.CompilerParams(dimension_semantics=("arbitrary",)),
    )(planes, w_taps, bias)


def conv_bn_relu_head(planes, w_taps, bias, pool, fc_w, fc_b,
                      tap_offsets, nq, cout, levels):
    Kp, Npad = planes.shape
    T = w_taps.shape[0]
    B = pool.shape[1]
    return pl.pallas_call(
        _make_conv_head_kernel(tap_offsets, nq),
        out_shape=(jax.ShapeDtypeStruct((cout, B), jnp.float32),
                   jax.ShapeDtypeStruct((levels, B), jnp.float32)),
        grid_spec=pltpu.PrefetchScalarGridSpec(
            num_scalar_prefetch=0,
            grid=(1,),
            in_specs=[
                pl.BlockSpec((Kp, Npad), lambda i: (0, 0)),
                pl.BlockSpec((T, cout, Kp), lambda i: (0, 0, 0)),
                pl.BlockSpec((cout, 1), lambda i: (0, 0)),
                pl.BlockSpec((nq, B), lambda i: (0, 0)),
                pl.BlockSpec((levels, cout), lambda i: (0, 0)),
                pl.BlockSpec((levels, 1), lambda i: (0, 0)),
            ],
            out_specs=[
                pl.BlockSpec((cout, B), lambda i: (0, 0)),
                pl.BlockSpec((levels, B), lambda i: (0, 0)),
            ],
        ),
        compiler_params=pltpu.CompilerParams(dimension_semantics=("arbitrary",)),
    )(planes, w_taps, bias, pool, fc_w, fc_b)


# ----------------------- XLA glue (cheap, no patch inflation) -----------------------

def prep_planes(x_cbhw, k, stride, pad, k_pad):
    """(C, B, H, W) activation -> parity-split flattened planes (Kp, Npad) bf16.

    Also returns the static per-quad-tap lane offsets and the parity-grid geometry.
    Data size == padded activation (no im2col inflation)."""
    assert stride == 2 and k % 2 == 1
    x = jnp.pad(x_cbhw, ((0, 0), (0, 0), (pad, pad), (pad, pad)))
    C, B, Hp, Wp = x.shape
    assert Hp % 2 == 0 and Wp % 2 == 0
    Hq, Wq = Hp // 2, Wp // 2
    Ho = (Hp - k) // 2 + 1
    Wo = (Wp - k) // 2 + 1
    tq = (k + 1) // 2
    # valid outputs never spill across row / batch boundaries (odd k, even Hp/Wp)
    assert Ho + (tq - 1) <= Hq and Wo + (tq - 1) <= Wq
    planes = jnp.stack([x[:, :, ir::2, jr::2] for ir in (0, 1) for jr in (0, 1)],
                       axis=0)                                # (4, C, B, Hq, Wq)
    nq = B * Hq * Wq
    planes = planes.reshape(4 * C, nq)                        # rows = q*C + c
    tap_offsets = tuple(iq * Wq + jq for iq in range(tq) for jq in range(tq))
    s_max = tap_offsets[-1]
    if k_pad > 4 * C:                                         # pad K to mult of 16
        planes = jnp.pad(planes, ((0, k_pad - 4 * C), (0, 0)))
    planes = jnp.pad(planes, ((0, 0), (0, s_max)))            # lane headroom for slices
    return planes.astype(jnp.bfloat16), tap_offsets, nq, (B, Hq, Wq, Ho, Wo)


def extract_valid(out_flat, cout, B, Hq, Wq, Ho, Wo):
    """(Cout, Nq) parity-grid output -> (Cout, B, Ho, Wo) valid activation."""
    return out_flat.reshape(cout, B, Hq, Wq)[:, :, :Ho, :Wo]


def _pool_matrix(B, Hq, Wq, Ho, Wo):
    """(Nq, B) matrix: 1/(Ho*Wo) at valid parity-grid positions, 0 at garbage."""
    m = np.zeros((B * Hq * Wq, B), np.float32)
    inv = 1.0 / float(Ho * Wo)
    for b in range(B):
        for ho in range(Ho):
            for wo in range(Wo):
                m[b * Hq * Wq + ho * Wq + wo, b] = inv
    return jnp.asarray(m)


# ----------------------- Params & forward -----------------------

def init_params(key, *, full_size=64, input_channels=3, init_channels=8,
                max_channels=32, levels=4):
    """Deterministic synthetic parameter init mirroring ComparatorBasic.__init__."""
    eps = 1e-5
    specs = [(input_channels, init_channels, 7, 2, 3)]        # first ConvNormAct
    num_blocks = int(np.log2(full_size / 2 / 8))
    out_dims = init_channels
    for i in range(num_blocks):
        mult = 2 ** i
        in_dims = min(init_channels * mult, max_channels)
        out_dims = min(init_channels * mult * 2, max_channels)
        specs.append((in_dims, out_dims, 3, 2, 1))

    convs = []
    for (cin, cout, k, s, p) in specs:
        key, kw_, kg, kb, km, kv = jax.random.split(key, 6)
        w_hwio = jax.random.normal(kw_, (k, k, cin, cout), jnp.float32) * 0.1
        gamma = 1.0 + 0.1 * jax.random.normal(kg, (cout,), jnp.float32)
        beta = 0.1 * jax.random.normal(kb, (cout,), jnp.float32)
        r_mean = 0.1 * jax.random.normal(km, (cout,), jnp.float32)
        r_var = 1.0 + 0.1 * jax.random.uniform(kv, (cout,), jnp.float32)
        scale = gamma / jnp.sqrt(r_var + eps)                 # eval-mode BN
        shift = beta - r_mean * scale
        # Fold BN scale into the conv weights (kernel epilogue only adds shift).
        w_scaled = np.asarray(w_hwio * scale[None, None, None, :])
        # Quad-tap weight packing over parity-stacked channels (q = 2*ir + jr).
        tq = (k + 1) // 2
        kdim = 4 * cin
        k_pad = ((kdim + 15) // 16) * 16                      # bf16 sublane packing
        w_np = np.zeros((tq * tq, cout, k_pad), np.float32)
        for iq in range(tq):
            for jq in range(tq):
                t = iq * tq + jq
                for ir in range(2):
                    for jr in range(2):
                        i_, j_ = 2 * iq + ir, 2 * jq + jr
                        if i_ < k and j_ < k:
                            q = 2 * ir + jr
                            w_np[t, :, q * cin:(q + 1) * cin] = w_scaled[i_, j_].T
        convs.append(dict(
            w_taps=jnp.asarray(w_np, jnp.bfloat16),
            shift=shift.reshape(cout, 1),                     # f32
            k=k, s=s, p=p, cin=cin, cout=cout, k_pad=k_pad,
        ))

    key, kfw, kfb = jax.random.split(key, 3)
    fc_w = jax.random.normal(kfw, (levels, out_dims), jnp.float32) * 0.1
    fc_b = jax.random.normal(kfb, (levels,), jnp.float32) * 0.1
    return dict(convs=convs, fc_w=fc_w, fc_b=fc_b.reshape(levels, 1),
                levels=levels)


def comparator_basic_forward(x_nchw, params):
    """Returns (levels, latent) exactly like ComparatorBasic.forward (eval mode)."""
    B = x_nchw.shape[0]
    x = jnp.transpose(x_nchw, (1, 0, 2, 3)).astype(jnp.bfloat16)   # (C, B, H, W)
    convs = params["convs"]
    latent_t = levels_t = None
    for li, layer in enumerate(convs):
        planes, tap_offsets, nq, (B_, Hq, Wq, Ho, Wo) = prep_planes(
            x, layer["k"], layer["s"], layer["p"], layer["k_pad"])
        if li < len(convs) - 1:
            out_flat = conv_bn_relu(planes, layer["w_taps"], layer["shift"],
                                    tap_offsets, nq, layer["cout"])
            x = extract_valid(out_flat, layer["cout"], B, Hq, Wq, Ho, Wo)
        else:
            pool = _pool_matrix(B, Hq, Wq, Ho, Wo)
            latent_t, levels_t = conv_bn_relu_head(
                planes, layer["w_taps"], layer["shift"], pool,
                params["fc_w"], params["fc_b"], tap_offsets, nq,
                layer["cout"], params["levels"])
    return levels_t.T, latent_t.T


if __name__ == "__main__":
    # Small, consistent config: full_size=64 -> 3 ConvNormAct layers (7x7 + 2x 3x3).
    key = jax.random.PRNGKey(0)
    key, kx = jax.random.split(key)
    x = jax.random.normal(kx, (2, 3, 64, 64), jnp.float32)    # NCHW, like PyTorch

    params = init_params(key, full_size=64, input_channels=3,
                         init_channels=8, max_channels=32, levels=4)

    fwd = jax.jit(lambda inp: comparator_basic_forward(inp, params))
    levels_out, latent_out = fwd(x)
    jax.block_until_ready((levels_out, latent_out))

    assert levels_out.shape == (2, 4), levels_out.shape
    assert latent_out.shape == (2, 32), latent_out.shape
    assert bool(jnp.all(jnp.isfinite(levels_out)))
    assert bool(jnp.all(jnp.isfinite(latent_out)))
    print("KERNEL_OK")
</pallas_src>

<mosaic_0001>
module attributes {stable_mosaic.version = 11 : i64} {
  func.func @kernel(%arg0: i32, %arg1: memref<16x2558xbf16, #tpu.memory_space<vmem>>, %arg2: memref<16x8x16xbf16, #tpu.memory_space<vmem>>, %arg3: memref<8x1xf32, #tpu.memory_space<vmem>>, %arg4: memref<8x2450xbf16, #tpu.memory_space<vmem>>) attributes {dimension_semantics = [#tpu.dimension_semantics<arbitrary>], iteration_bounds = array<i64: 1>, scalar_prefetch = 0 : i64, scratch_operands = 0 : i64, tpu.core_type = #tpu.core_type<tc>, window_params = [{pipeline_mode = #tpu.pipeline_mode<synchronous>, transform_indices = @transform_0, window_bounds = array<i64: 16, 2558>}, {pipeline_mode = #tpu.pipeline_mode<synchronous>, transform_indices = @transform_1, window_bounds = array<i64: 16, 8, 16>}, {pipeline_mode = #tpu.pipeline_mode<synchronous>, transform_indices = @transform_2, window_bounds = array<i64: 8, 1>}, {pipeline_mode = #tpu.pipeline_mode<synchronous>, transform_indices = @transform_3, window_bounds = array<i64: 8, 2450>}]} {
    %c0 = arith.constant 0 : index
    %c0_0 = arith.constant 0 : index
    %0 = vector.load %arg1[%c0, %c0_0] : memref<16x2558xbf16, #tpu.memory_space<vmem>>, vector<16x2558xbf16>
    %1 = vector.extract_strided_slice %0 {offsets = [0, 0], sizes = [16, 2450], strides = [1, 1]} : vector<16x2558xbf16> to vector<16x2450xbf16>
    %c0_1 = arith.constant 0 : index
    %c0_2 = arith.constant 0 : index
    %c0_3 = arith.constant 0 : index
    %2 = vector.load %arg2[%c0_1, %c0_2, %c0_3] : memref<16x8x16xbf16, #tpu.memory_space<vmem>>, vector<1x8x16xbf16>
    %3 = vector.shape_cast %2 : vector<1x8x16xbf16> to vector<8x16xbf16>
    %cst = arith.constant dense<0.000000e+00> : vector<8x2450xf32>
    %4 = tpu.matmul %3, %1, %cst {dimension_numbers = #tpu.dot_dimension_numbers<[1], [0], [0], [1], [0, 0, 1, 1], [], []>} : vector<8x16xbf16>, vector<16x2450xbf16>, vector<8x2450xf32> -> vector<8x2450xf32>
    %5 = vector.extract_strided_slice %0 {offsets = [0, 1], sizes = [16, 2450], strides = [1, 1]} : vector<16x2558xbf16> to vector<16x2450xbf16>
    %c1 = arith.constant 1 : index
    %c0_4 = arith.constant 0 : index
    %c0_5 = arith.constant 0 : index
    %6 = vector.load %arg2[%c1, %c0_4, %c0_5] : memref<16x8x16xbf16, #tpu.memory_space<vmem>>, vector<1x8x16xbf16>
    %7 = vector.shape_cast %6 : vector<1x8x16xbf16> to vector<8x16xbf16>
    %cst_6 = arith.constant dense<0.000000e+00> : vector<8x2450xf32>
    %8 = tpu.matmul %7, %5, %cst_6 {dimension_numbers = #tpu.dot_dimension_numbers<[1], [0], [0], [1], [0, 0, 1, 1], [], []>} : vector<8x16xbf16>, vector<16x2450xbf16>, vector<8x2450xf32> -> vector<8x2450xf32>
    %9 = arith.addf %4, %8 : vector<8x2450xf32>
    %10 = vector.extract_strided_slice %0 {offsets = [0, 2], sizes = [16, 2450], strides = [1, 1]} : vector<16x2558xbf16> to vector<16x2450xbf16>
    %c2 = arith.constant 2 : index
    %c0_7 = arith.constant 0 : index
    %c0_8 = arith.constant 0 : index
    %11 = vector.load %arg2[%c2, %c0_7, %c0_8] : memref<16x8x16xbf16, #tpu.memory_space<vmem>>, vector<1x8x16xbf16>
    %12 = vector.shape_cast %11 : vector<1x8x16xbf16> to vector<8x16xbf16>
    %cst_9 = arith.constant dense<0.000000e+00> : vector<8x2450xf32>
    %13 = tpu.matmul %12, %10, %cst_9 {dimension_numbers = #tpu.dot_dimension_numbers<[1], [0], [0], [1], [0, 0, 1, 1], [], []>} : vector<8x16xbf16>, vector<16x2450xbf16>, vector<8x2450xf32> -> vector<8x2450xf32>
    %14 = arith.addf %9, %13 : vector<8x2450xf32>
    %15 = vector.extract_strided_slice %0 {offsets = [0, 3], sizes = [16, 2450], strides = [1, 1]} : vector<16x2558xbf16> to vector<16x2450xbf16>
    %c3 = arith.constant 3 : index
    %c0_10 = arith.constant 0 : index
    %c0_11 = arith.constant 0 : index
    %16 = vector.load %arg2[%c3, %c0_10, %c0_11] : memref<16x8x16xbf16, #tpu.memory_space<vmem>>, vector<1x8x16xbf16>
    %17 = vector.shape_cast %16 : vector<1x8x16xbf16> to vector<8x16xbf16>
    %cst_12 = arith.constant dense<0.000000e+00> : vector<8x2450xf32>
    %18 = tpu.matmul %17, %15, %cst_12 {dimension_numbers = #tpu.dot_dimension_numbers<[1], [0], [0], [1], [0, 0, 1, 1], [], []>} : vector<8x16xbf16>, vector<16x2450xbf16>, vector<8x2450xf32> -> vector<8x2450xf32>
    %19 = arith.addf %14, %18 : vector<8x2450xf32>
    %20 = vector.extract_strided_slice %0 {offsets = [0, 35], sizes = [16, 2450], strides = [1, 1]} : vector<16x2558xbf16> to vector<16x2450xbf16>
    %c4 = arith.constant 4 : index
    %c0_13 = arith.constant 0 : index
    %c0_14 = arith.constant 0 : index
    %21 = vector.load %arg2[%c4, %c0_13, %c0_14] : memref<16x8x16xbf16, #tpu.memory_space<vmem>>, vector<1x8x16xbf16>
    %22 = vector.shape_cast %21 : vector<1x8x16xbf16> to vector<8x16xbf16>
    %cst_15 = arith.constant dense<0.000000e+00> : vector<8x2450xf32>
    %23 = tpu.matmul %22, %20, %cst_15 {dimension_numbers = #tpu.dot_dimension_numbers<[1], [0], [0], [1], [0, 0, 1, 1], [], []>} : vector<8x16xbf16>, vector<16x2450xbf16>, vector<8x2450xf32> -> vector<8x2450xf32>
    %24 = arith.addf %19, %23 : vector<8x2450xf32>
    %25 = vector.extract_strided_slice %0 {offsets = [0, 36], sizes = [16, 2450], strides = [1, 1]} : vector<16x2558xbf16> to vector<16x2450xbf16>
    %c5 = arith.constant 5 : index
    %c0_16 = arith.constant 0 : index
    %c0_17 = arith.constant 0 : index
    %26 = vector.load %arg2[%c5, %c0_16, %c0_17] : memref<16x8x16xbf16, #tpu.memory_space<vmem>>, vector<1x8x16xbf16>
    %27 = vector.shape_cast %26 : vector<1x8x16xbf16> to vector<8x16xbf16>
    %cst_18 = arith.constant dense<0.000000e+00> : vector<8x2450xf32>
    %28 = tpu.matmul %27, %25, %cst_18 {dimension_numbers = #tpu.dot_dimension_numbers<[1], [0], [0], [1], [0, 0, 1, 1], [], []>} : vector<8x16xbf16>, vector<16x2450xbf16>, vector<8x2450xf32> -> vector<8x2450xf32>
    %29 = arith.addf %24, %28 : vector<8x2450xf32>
    %30 = vector.extract_strided_slice %0 {offsets = [0, 37], sizes = [16, 2450], strides = [1, 1]} : vector<16x2558xbf16> to vector<16x2450xbf16>
    %c6 = arith.constant 6 : index
    %c0_19 = arith.constant 0 : index
    %c0_20 = arith.constant 0 : index
    %31 = vector.load %arg2[%c6, %c0_19, %c0_20] : memref<16x8x16xbf16, #tpu.memory_space<vmem>>, vector<1x8x16xbf16>
    %32 = vector.shape_cast %31 : vector<1x8x16xbf16> to vector<8x16xbf16>
    %cst_21 = arith.constant dense<0.000000e+00> : vector<8x2450xf32>
    %33 = tpu.matmul %32, %30, %cst_21 {dimension_numbers = #tpu.dot_dimension_numbers<[1], [0], [0], [1], [0, 0, 1, 1], [], []>} : vector<8x16xbf16>, vector<16x2450xbf16>, vector<8x2450xf32> -> vector<8x2450xf32>
    %34 = arith.addf %29, %33 : vector<8x2450xf32>
    %35 = vector.extract_strided_slice %0 {offsets = [0, 38], sizes = [16, 2450], strides = [1, 1]} : vector<16x2558xbf16> to vector<16x2450xbf16>
    %c7 = arith.constant 7 : index
    %c0_22 = arith.constant 0 : index
    %c0_23 = arith.constant 0 : index
    %36 = vector.load %arg2[%c7, %c0_22, %c0_23] : memref<16x8x16xbf16, #tpu.memory_space<vmem>>, vector<1x8x16xbf16>
    %37 = vector.shape_cast %36 : vector<1x8x16xbf16> to vector<8x16xbf16>
    %cst_24 = arith.constant dense<0.000000e+00> : vector<8x2450xf32>
    %38 = tpu.matmul %37, %35, %cst_24 {dimension_numbers = #tpu.dot_dimension_numbers<[1], [0], [0], [1], [0, 0, 1, 1], [], []>} : vector<8x16xbf16>, vector<16x2450xbf16>, vector<8x2450xf32> -> vector<8x2450xf32>
    %39 = arith.addf %34, %38 : vector<8x2450xf32>
    %40 = vector.extract_strided_slice %0 {offsets = [0, 70], sizes = [16, 2450], strides = [1, 1]} : vector<16x2558xbf16> to vector<16x2450xbf16>
    %c8 = arith.constant 8 : index
    %c0_25 = arith.constant 0 : index
    %c0_26 = arith.constant 0 : index
    %41 = vector.load %arg2[%c8, %c0_25, %c0_26] : memref<16x8x16xbf16, #tpu.memory_space<vmem>>, vector<1x8x16xbf16>
    %42 = vector.shape_cast %41 : vector<1x8x16xbf16> to vector<8x16xbf16>
    %cst_27 = arith.constant dense<0.000000e+00> : vector<8x2450xf32>
    %43 = tpu.matmul %42, %40, %cst_27 {dimension_numbers = #tpu.dot_dimension_numbers<[1], [0], [0], [1], [0, 0, 1, 1], [], []>} : vector<8x16xbf16>, vector<16x2450xbf16>, vector<8x2450xf32> -> vector<8x2450xf32>
    %44 = arith.addf %39, %43 : vector<8x2450xf32>
    %45 = vector.extract_strided_slice %0 {offsets = [0, 71], sizes = [16, 2450], strides = [1, 1]} : vector<16x2558xbf16> to vector<16x2450xbf16>
    %c9 = arith.constant 9 : index
    %c0_28 = arith.constant 0 : index
    %c0_29 = arith.constant 0 : index
    %46 = vector.load %arg2[%c9, %c0_28, %c0_29] : memref<16x8x16xbf16, #tpu.memory_space<vmem>>, vector<1x8x16xbf16>
    %47 = vector.shape_cast %46 : vector<1x8x16xbf16> to vector<8x16xbf16>
    %cst_30 = arith.constant dense<0.000000e+00> : vector<8x2450xf32>
    %48 = tpu.matmul %47, %45, %cst_30 {dimension_numbers = #tpu.dot_dimension_numbers<[1], [0], [0], [1], [0, 0, 1, 1], [], []>} : vector<8x16xbf16>, vector<16x2450xbf16>, vector<8x2450xf32> -> vector<8x2450xf32>
    %49 = arith.addf %44, %48 : vector<8x2450xf32>
    %50 = vector.extract_strided_slice %0 {offsets = [0, 72], sizes = [16, 2450], strides = [1, 1]} : vector<16x2558xbf16> to vector<16x2450xbf16>
    %c10 = arith.constant 10 : index
    %c0_31 = arith.constant 0 : index
    %c0_32 = arith.constant 0 : index
    %51 = vector.load %arg2[%c10, %c0_31, %c0_32] : memref<16x8x16xbf16, #tpu.memory_space<vmem>>, vector<1x8x16xbf16>
    %52 = vector.shape_cast %51 : vector<1x8x16xbf16> to vector<8x16xbf16>
    %cst_33 = arith.constant dense<0.000000e+00> : vector<8x2450xf32>
    %53 = tpu.matmul %52, %50, %cst_33 {dimension_numbers = #tpu.dot_dimension_numbers<[1], [0], [0], [1], [0, 0, 1, 1], [], []>} : vector<8x16xbf16>, vector<16x2450xbf16>, vector<8x2450xf32> -> vector<8x2450xf32>
    %54 = arith.addf %49, %53 : vector<8x2450xf32>
    %55 = vector.extract_strided_slice %0 {offsets = [0, 73], sizes = [16, 2450], strides = [1, 1]} : vector<16x2558xbf16> to vector<16x2450xbf16>
    %c11 = arith.constant 11 : index
    %c0_34 = arith.constant 0 : index
    %c0_35 = arith.constant 0 : index
    %56 = vector.load %arg2[%c11, %c0_34, %c0_35] : memref<16x8x16xbf16, #tpu.memory_space<vmem>>, vector<1x8x16xbf16>
    %57 = vector.shape_cast %56 : vector<1x8x16xbf16> to vector<8x16xbf16>
    %cst_36 = arith.constant dense<0.000000e+00> : vector<8x2450xf32>
    %58 = tpu.matmul %57, %55, %cst_36 {dimension_numbers = #tpu.dot_dimension_numbers<[1], [0], [0], [1], [0, 0, 1, 1], [], []>} : vector<8x16xbf16>, vector<16x2450xbf16>, vector<8x2450xf32> -> vector<8x2450xf32>
    %59 = arith.addf %54, %58 : vector<8x2450xf32>
    %60 = vector.extract_strided_slice %0 {offsets = [0, 105], sizes = [16, 2450], strides = [1, 1]} : vector<16x2558xbf16> to vector<16x2450xbf16>
    %c12 = arith.constant 12 : index
    %c0_37 = arith.constant 0 : index
    %c0_38 = arith.constant 0 : index
    %61 = vector.load %arg2[%c12, %c0_37, %c0_38] : memref<16x8x16xbf16, #tpu.memory_space<vmem>>, vector<1x8x16xbf16>
    %62 = vector.shape_cast %61 : vector<1x8x16xbf16> to vector<8x16xbf16>
    %cst_39 = arith.constant dense<0.000000e+00> : vector<8x2450xf32>
    %63 = tpu.matmul %62, %60, %cst_39 {dimension_numbers = #tpu.dot_dimension_numbers<[1], [0], [0], [1], [0, 0, 1, 1], [], []>} : vector<8x16xbf16>, vector<16x2450xbf16>, vector<8x2450xf32> -> vector<8x2450xf32>
    %64 = arith.addf %59, %63 : vector<8x2450xf32>
    %65 = vector.extract_strided_slice %0 {offsets = [0, 106], sizes = [16, 2450], strides = [1, 1]} : vector<16x2558xbf16> to vector<16x2450xbf16>
    %c13 = arith.constant 13 : index
    %c0_40 = arith.constant 0 : index
    %c0_41 = arith.constant 0 : index
    %66 = vector.load %arg2[%c13, %c0_40, %c0_41] : memref<16x8x16xbf16, #tpu.memory_space<vmem>>, vector<1x8x16xbf16>
    %67 = vector.shape_cast %66 : vector<1x8x16xbf16> to vector<8x16xbf16>
    %cst_42 = arith.constant dense<0.000000e+00> : vector<8x2450xf32>
    %68 = tpu.matmul %67, %65, %cst_42 {dimension_numbers = #tpu.dot_dimension_numbers<[1], [0], [0], [1], [0, 0, 1, 1], [], []>} : vector<8x16xbf16>, vector<16x2450xbf16>, vector<8x2450xf32> -> vector<8x2450xf32>
    %69 = arith.addf %64, %68 : vector<8x2450xf32>
    %70 = vector.extract_strided_slice %0 {offsets = [0, 107], sizes = [16, 2450], strides = [1, 1]} : vector<16x2558xbf16> to vector<16x2450xbf16>
    %c14 = arith.constant 14 : index
    %c0_43 = arith.constant 0 : index
    %c0_44 = arith.constant 0 : index
    %71 = vector.load %arg2[%c14, %c0_43, %c0_44] : memref<16x8x16xbf16, #tpu.memory_space<vmem>>, vector<1x8x16xbf16>
    %72 = vector.shape_cast %71 : vector<1x8x16xbf16> to vector<8x16xbf16>
    %cst_45 = arith.constant dense<0.000000e+00> : vector<8x2450xf32>
    %73 = tpu.matmul %72, %70, %cst_45 {dimension_numbers = #tpu.dot_dimension_numbers<[1], [0], [0], [1], [0, 0, 1, 1], [], []>} : vector<8x16xbf16>, vector<16x2450xbf16>, vector<8x2450xf32> -> vector<8x2450xf32>
    %74 = arith.addf %69, %73 : vector<8x2450xf32>
    %75 = vector.extract_strided_slice %0 {offsets = [0, 108], sizes = [16, 2450], strides = [1, 1]} : vector<16x2558xbf16> to vector<16x2450xbf16>
    %c15 = arith.constant 15 : index
    %c0_46 = arith.constant 0 : index
    %c0_47 = arith.constant 0 : index
    %76 = vector.load %arg2[%c15, %c0_46, %c0_47] : memref<16x8x16xbf16, #tpu.memory_space<vmem>>, vector<1x8x16xbf16>
    %77 = vector.shape_cast %76 : vector<1x8x16xbf16> to vector<8x16xbf16>
    %cst_48 = arith.constant dense<0.000000e+00> : vector<8x2450xf32>
    %78 = tpu.matmul %77, %75, %cst_48 {dimension_numbers = #tpu.dot_dimension_numbers<[1], [0], [0], [1], [0, 0, 1, 1], [], []>} : vector<8x16xbf16>, vector<16x2450xbf16>, vector<8x2450xf32> -> vector<8x2450xf32>
    %79 = arith.addf %74, %78 : vector<8x2450xf32>
    %c0_49 = arith.constant 0 : index
    %c0_50 = arith.constant 0 : index
    %80 = vector.load %arg3[%c0_49, %c0_50] : memref<8x1xf32, #tpu.memory_space<vmem>>, vector<8x1xf32>
    %81 = vector.broadcast %80 : vector<8x1xf32> to vector<8x2450xf32>
    %82 = arith.addf %79, %81 : vector<8x2450xf32>
    %cst_51 = arith.constant 0.000000e+00 : f32
    %83 = vector.broadcast %cst_51 : f32 to vector<8x2450xf32>
    %84 = arith.maximumf %82, %83 : vector<8x2450xf32>
    %85 = arith.truncf %84 : vector<8x2450xf32> to vector<8x2450xbf16>
    %c0_52 = arith.constant 0 : index
    %c0_53 = arith.constant 0 : index
    %86 = vector.load %arg4[%c0_52, %c0_53] : memref<8x2450xbf16, #tpu.memory_space<vmem>>, vector<8x2450xbf16>
    tpu.vector_store %arg4[%c0_52, %c0_53], %85 {strides = array<i32>} : memref<8x2450xbf16, #tpu.memory_space<vmem>>, vector<8x2450xbf16>,
    return
  }
  func.func @transform_0(%arg0: i32) -> (i32, i32) {
    %c0_i32 = arith.constant 0 : i32
    %c0_i32_0 = arith.constant 0 : i32
    %c0_i32_1 = arith.constant 0 : i32
    return %c0_i32, %c0_i32_0 : i32, i32
  }
  func.func @transform_1(%arg0: i32) -> (i32, i32, i32) {
    %c0_i32 = arith.constant 0 : i32
    %c0_i32_0 = arith.constant 0 : i32
    %c0_i32_1 = arith.constant 0 : i32
    %c0_i32_2 = arith.constant 0 : i32
    return %c0_i32, %c0_i32_0, %c0_i32_1 : i32, i32, i32
  }
  func.func @transform_2(%arg0: i32) -> (i32, i32) {
    %c0_i32 = arith.constant 0 : i32
    %c0_i32_0 = arith.constant 0 : i32
    %c0_i32_1 = arith.constant 0 : i32
    return %c0_i32, %c0_i32_0 : i32, i32
  }
  func.func @transform_3(%arg0: i32) -> (i32, i32) {
    %c0_i32 = arith.constant 0 : i32
    %c0_i32_0 = arith.constant 0 : i32
    %c0_i32_1 = arith.constant 0 : i32
    return %c0_i32, %c0_i32_0 : i32, i32
  }
}

module attributes {stable_mosaic.version = 11 : i64} {
  func.func @kernel(%arg0: i32, %arg1: memref<32x596xbf16, #tpu.memory_space<vmem>>, %arg2: memref<4x16x32xbf16, #tpu.memory_space<vmem>>, %arg3: memref<16x1xf32, #tpu.memory_space<vmem>>, %arg4: memref<16x578xbf16, #tpu.memory_space<vmem>>) attributes {dimension_semantics = [#tpu.dimension_semantics<arbitrary>], iteration_bounds = array<i64: 1>, scalar_prefetch = 0 : i64, scratch_operands = 0 : i64, tpu.core_type = #tpu.core_type<tc>, window_params = [{pipeline_mode = #tpu.pipeline_mode<synchronous>, transform_indices = @transform_0, window_bounds = array<i64: 32, 596>}, {pipeline_mode = #tpu.pipeline_mode<synchronous>, transform_indices = @transform_1, window_bounds = array<i64: 4, 16, 32>}, {pipeline_mode = #tpu.pipeline_mode<synchronous>, transform_indices = @transform_2, window_bounds = array<i64: 16, 1>}, {pipeline_mode = #tpu.pipeline_mode<synchronous>, transform_indices = @transform_3, window_bounds = array<i64: 16, 578>}]} {
    %c0 = arith.constant 0 : index
    %c0_0 = arith.constant 0 : index
    %0 = vector.load %arg1[%c0, %c0_0] : memref<32x596xbf16, #tpu.memory_space<vmem>>, vector<32x596xbf16>
    %1 = vector.extract_strided_slice %0 {offsets = [0, 0], sizes = [32, 578], strides = [1, 1]} : vector<32x596xbf16> to vector<32x578xbf16>
    %c0_1 = arith.constant 0 : index
    %c0_2 = arith.constant 0 : index
    %c0_3 = arith.constant 0 : index
    %2 = vector.load %arg2[%c0_1, %c0_2, %c0_3] : memref<4x16x32xbf16, #tpu.memory_space<vmem>>, vector<1x16x32xbf16>
    %3 = vector.shape_cast %2 : vector<1x16x32xbf16> to vector<16x32xbf16>
    %cst = arith.constant dense<0.000000e+00> : vector<16x578xf32>
    %4 = tpu.matmul %3, %1, %cst {dimension_numbers = #tpu.dot_dimension_numbers<[1], [0], [0], [1], [0, 0, 1, 1], [], []>} : vector<16x32xbf16>, vector<32x578xbf16>, vector<16x578xf32> -> vector<16x578xf32>
    %5 = vector.extract_strided_slice %0 {offsets = [0, 1], sizes = [32, 578], strides = [1, 1]} : vector<32x596xbf16> to vector<32x578xbf16>
    %c1 = arith.constant 1 : index
    %c0_4 = arith.constant 0 : index
    %c0_5 = arith.constant 0 : index
    %6 = vector.load %arg2[%c1, %c0_4, %c0_5] : memref<4x16x32xbf16, #tpu.memory_space<vmem>>, vector<1x16x32xbf16>
    %7 = vector.shape_cast %6 : vector<1x16x32xbf16> to vector<16x32xbf16>
    %cst_6 = arith.constant dense<0.000000e+00> : vector<16x578xf32>
    %8 = tpu.matmul %7, %5, %cst_6 {dimension_numbers = #tpu.dot_dimension_numbers<[1], [0], [0], [1], [0, 0, 1, 1], [], []>} : vector<16x32xbf16>, vector<32x578xbf16>, vector<16x578xf32> -> vector<16x578xf32>
    %9 = arith.addf %4, %8 : vector<16x578xf32>
    %10 = vector.extract_strided_slice %0 {offsets = [0, 17], sizes = [32, 578], strides = [1, 1]} : vector<32x596xbf16> to vector<32x578xbf16>
    %c2 = arith.constant 2 : index
    %c0_7 = arith.constant 0 : index
    %c0_8 = arith.constant 0 : index
    %11 = vector.load %arg2[%c2, %c0_7, %c0_8] : memref<4x16x32xbf16, #tpu.memory_space<vmem>>, vector<1x16x32xbf16>
    %12 = vector.shape_cast %11 : vector<1x16x32xbf16> to vector<16x32xbf16>
    %cst_9 = arith.constant dense<0.000000e+00> : vector<16x578xf32>
    %13 = tpu.matmul %12, %10, %cst_9 {dimension_numbers = #tpu.dot_dimension_numbers<[1], [0], [0], [1], [0, 0, 1, 1], [], []>} : vector<16x32xbf16>, vector<32x578xbf16>, vector<16x578xf32> -> vector<16x578xf32>
    %14 = arith.addf %9, %13 : vector<16x578xf32>
    %15 = vector.extract_strided_slice %0 {offsets = [0, 18], sizes = [32, 578], strides = [1, 1]} : vector<32x596xbf16> to vector<32x578xbf16>
    %c3 = arith.constant 3 : index
    %c0_10 = arith.constant 0 : index
    %c0_11 = arith.constant 0 : index
    %16 = vector.load %arg2[%c3, %c0_10, %c0_11] : memref<4x16x32xbf16, #tpu.memory_space<vmem>>, vector<1x16x32xbf16>
    %17 = vector.shape_cast %16 : vector<1x16x32xbf16> to vector<16x32xbf16>
    %cst_12 = arith.constant dense<0.000000e+00> : vector<16x578xf32>
    %18 = tpu.matmul %17, %15, %cst_12 {dimension_numbers = #tpu.dot_dimension_numbers<[1], [0], [0], [1], [0, 0, 1, 1], [], []>} : vector<16x32xbf16>, vector<32x578xbf16>, vector<16x578xf32> -> vector<16x578xf32>
    %19 = arith.addf %14, %18 : vector<16x578xf32>
    %c0_13 = arith.constant 0 : index
    %c0_14 = arith.constant 0 : index
    %20 = vector.load %arg3[%c0_13, %c0_14] : memref<16x1xf32, #tpu.memory_space<vmem>>, vector<16x1xf32>
    %21 = vector.broadcast %20 : vector<16x1xf32> to vector<16x578xf32>
    %22 = arith.addf %19, %21 : vector<16x578xf32>
    %cst_15 = arith.constant 0.000000e+00 : f32
    %23 = vector.broadcast %cst_15 : f32 to vector<16x578xf32>
    %24 = arith.maximumf %22, %23 : vector<16x578xf32>
    %25 = arith.truncf %24 : vector<16x578xf32> to vector<16x578xbf16>
    %c0_16 = arith.constant 0 : index
    %c0_17 = arith.constant 0 : index
    %26 = vector.load %arg4[%c0_16, %c0_17] : memref<16x578xbf16, #tpu.memory_space<vmem>>, vector<16x578xbf16>
    tpu.vector_store %arg4[%c0_16, %c0_17], %25 {strides = array<i32>} : memref<16x578xbf16, #tpu.memory_space<vmem>>, vector<16x578xbf16>,
    return
  }
  func.func @transform_0(%arg0: i32) -> (i32, i32) {
    %c0_i32 = arith.constant 0 : i32
    %c0_i32_0 = arith.constant 0 : i32
    %c0_i32_1 = arith.constant 0 : i32
    return %c0_i32, %c0_i32_0 : i32, i32
  }
  func.func @transform_1(%arg0: i32) -> (i32, i32, i32) {
    %c0_i32 = arith.constant 0 : i32
    %c0_i32_0 = arith.constant 0 : i32
    %c0_i32_1 = arith.constant 0 : i32
    %c0_i32_2 = arith.constant 0 : i32
    return %c0_i32, %c0_i32_0, %c0_i32_1 : i32, i32, i32
  }
  func.func @transform_2(%arg0: i32) -> (i32, i32) {
    %c0_i32 = arith.constant 0 : i32
    %c0_i32_0 = arith.constant 0 : i32
    %c0_i32_1 = arith.constant 0 : i32
    return %c0_i32, %c0_i32_0 : i32, i32
  }
  func.func @transform_3(%arg0: i32) -> (i32, i32) {
    %c0_i32 = arith.constant 0 : i32
    %c0_i32_0 = arith.constant 0 : i32
    %c0_i32_1 = arith.constant 0 : i32
    return %c0_i32, %c0_i32_0 : i32, i32
  }
}

module attributes {stable_mosaic.version = 11 : i64} {
  func.func @kernel(%arg0: i32, %arg1: memref<64x172xbf16, #tpu.memory_space<vmem>>, %arg2: memref<4x32x64xbf16, #tpu.memory_space<vmem>>, %arg3: memref<32x1xf32, #tpu.memory_space<vmem>>, %arg4: memref<162x2xf32, #tpu.memory_space<vmem>>, %arg5: memref<4x32xf32, #tpu.memory_space<vmem>>, %arg6: memref<4x1xf32, #tpu.memory_space<vmem>>, %arg7: memref<32x2xf32, #tpu.memory_space<vmem>>, %arg8: memref<4x2xf32, #tpu.memory_space<vmem>>) attributes {dimension_semantics = [#tpu.dimension_semantics<arbitrary>], iteration_bounds = array<i64: 1>, scalar_prefetch = 0 : i64, scratch_operands = 0 : i64, tpu.core_type = #tpu.core_type<tc>, window_params = [{pipeline_mode = #tpu.pipeline_mode<synchronous>, transform_indices = @transform_0, window_bounds = array<i64: 64, 172>}, {pipeline_mode = #tpu.pipeline_mode<synchronous>, transform_indices = @transform_1, window_bounds = array<i64: 4, 32, 64>}, {pipeline_mode = #tpu.pipeline_mode<synchronous>, transform_indices = @transform_2, window_bounds = array<i64: 32, 1>}, {pipeline_mode = #tpu.pipeline_mode<synchronous>, transform_indices = @transform_3, window_bounds = array<i64: 162, 2>}, {pipeline_mode = #tpu.pipeline_mode<synchronous>, transform_indices = @transform_4, window_bounds = array<i64: 4, 32>}, {pipeline_mode = #tpu.pipeline_mode<synchronous>, transform_indices = @transform_5, window_bounds = array<i64: 4, 1>}, {pipeline_mode = #tpu.pipeline_mode<synchronous>, transform_indices = @transform_6, window_bounds = array<i64: 32, 2>}, {pipeline_mode = #tpu.pipeline_mode<synchronous>, transform_indices = @transform_7, window_bounds = array<i64: 4, 2>}]} {
    %c0 = arith.constant 0 : index
    %c0_0 = arith.constant 0 : index
    %0 = vector.load %arg1[%c0, %c0_0] : memref<64x172xbf16, #tpu.memory_space<vmem>>, vector<64x172xbf16>
    %c0_1 = arith.constant 0 : index
    %c0_2 = arith.constant 0 : index
    %c0_3 = arith.constant 0 : index
    %1 = vector.load %arg2[%c0_1, %c0_2, %c0_3] : memref<4x32x64xbf16, #tpu.memory_space<vmem>>, vector<1x32x64xbf16>
    %2 = vector.shape_cast %1 : vector<1x32x64xbf16> to vector<32x64xbf16>
    %3 = vector.extract_strided_slice %0 {offsets = [0, 0], sizes = [64, 162], strides = [1, 1]} : vector<64x172xbf16> to vector<64x162xbf16>
    %cst = arith.constant dense<0.000000e+00> : vector<32x162xf32>
    %4 = tpu.matmul %2, %3, %cst {dimension_numbers = #tpu.dot_dimension_numbers<[1], [0], [0], [1], [0, 0, 1, 1], [], []>} : vector<32x64xbf16>, vector<64x162xbf16>, vector<32x162xf32> -> vector<32x162xf32>
    %c1 = arith.constant 1 : index
    %c0_4 = arith.constant 0 : index
    %c0_5 = arith.constant 0 : index
    %5 = vector.load %arg2[%c1, %c0_4, %c0_5] : memref<4x32x64xbf16, #tpu.memory_space<vmem>>, vector<1x32x64xbf16>
    %6 = vector.shape_cast %5 : vector<1x32x64xbf16> to vector<32x64xbf16>
    %7 = vector.extract_strided_slice %0 {offsets = [0, 1], sizes = [64, 162], strides = [1, 1]} : vector<64x172xbf16> to vector<64x162xbf16>
    %cst_6 = arith.constant dense<0.000000e+00> : vector<32x162xf32>
    %8 = tpu.matmul %6, %7, %cst_6 {dimension_numbers = #tpu.dot_dimension_numbers<[1], [0], [0], [1], [0, 0, 1, 1], [], []>} : vector<32x64xbf16>, vector<64x162xbf16>, vector<32x162xf32> -> vector<32x162xf32>
    %9 = arith.addf %4, %8 : vector<32x162xf32>
    %c2 = arith.constant 2 : index
    %c0_7 = arith.constant 0 : index
    %c0_8 = arith.constant 0 : index
    %10 = vector.load %arg2[%c2, %c0_7, %c0_8] : memref<4x32x64xbf16, #tpu.memory_space<vmem>>, vector<1x32x64xbf16>
    %11 = vector.shape_cast %10 : vector<1x32x64xbf16> to vector<32x64xbf16>
    %12 = vector.extract_strided_slice %0 {offsets = [0, 9], sizes = [64, 162], strides = [1, 1]} : vector<64x172xbf16> to vector<64x162xbf16>
    %cst_9 = arith.constant dense<0.000000e+00> : vector<32x162xf32>
    %13 = tpu.matmul %11, %12, %cst_9 {dimension_numbers = #tpu.dot_dimension_numbers<[1], [0], [0], [1], [0, 0, 1, 1], [], []>} : vector<32x64xbf16>, vector<64x162xbf16>, vector<32x162xf32> -> vector<32x162xf32>
    %14 = arith.addf %9, %13 : vector<32x162xf32>
    %c3 = arith.constant 3 : index
    %c0_10 = arith.constant 0 : index
    %c0_11 = arith.constant 0 : index
    %15 = vector.load %arg2[%c3, %c0_10, %c0_11] : memref<4x32x64xbf16, #tpu.memory_space<vmem>>, vector<1x32x64xbf16>
    %16 = vector.shape_cast %15 : vector<1x32x64xbf16> to vector<32x64xbf16>
    %17 = vector.extract_strided_slice %0 {offsets = [0, 10], sizes = [64, 162], strides = [1, 1]} : vector<64x172xbf16> to vector<64x162xbf16>
    %cst_12 = arith.constant dense<0.000000e+00> : vector<32x162xf32>
    %18 = tpu.matmul %16, %17, %cst_12 {dimension_numbers = #tpu.dot_dimension_numbers<[1], [0], [0], [1], [0, 0, 1, 1], [], []>} : vector<32x64xbf16>, vector<64x162xbf16>, vector<32x162xf32> -> vector<32x162xf32>
    %19 = arith.addf %14, %18 : vector<32x162xf32>
    %c0_13 = arith.constant 0 : index
    %c0_14 = arith.constant 0 : index
    %20 = vector.load %arg3[%c0_13, %c0_14] : memref<32x1xf32, #tpu.memory_space<vmem>>, vector<32x1xf32>
    %21 = vector.broadcast %20 : vector<32x1xf32> to vector<32x162xf32>
    %22 = arith.addf %19, %21 : vector<32x162xf32>
    %cst_15 = arith.constant 0.000000e+00 : f32
    %23 = vector.broadcast %cst_15 : f32 to vector<32x162xf32>
    %24 = arith.maximumf %22, %23 : vector<32x162xf32>
    %c0_16 = arith.constant 0 : index
    %c0_17 = arith.constant 0 : index
    %25 = vector.load %arg4[%c0_16, %c0_17] : memref<162x2xf32, #tpu.memory_space<vmem>>, vector<162x2xf32>
    %cst_18 = arith.constant dense<0.000000e+00> : vector<32x2xf32>
    %26 = tpu.matmul %24, %25, %cst_18 {dimension_numbers = #tpu.dot_dimension_numbers<[1], [0], [0], [1], [0, 0, 1, 1], [], []>} : vector<32x162xf32>, vector<162x2xf32>, vector<32x2xf32> -> vector<32x2xf32>
    %c0_19 = arith.constant 0 : index
    %c0_20 = arith.constant 0 : index
    %27 = vector.load %arg7[%c0_19, %c0_20] : memref<32x2xf32, #tpu.memory_space<vmem>>, vector<32x2xf32>
    tpu.vector_store %arg7[%c0_19, %c0_20], %26 {strides = array<i32>} : memref<32x2xf32, #tpu.memory_space<vmem>>, vector<32x2xf32>,
    %c0_21 = arith.constant 0 : index
    %c0_22 = arith.constant 0 : index
    %28 = vector.load %arg5[%c0_21, %c0_22] : memref<4x32xf32, #tpu.memory_space<vmem>>, vector<4x32xf32>
    %cst_23 = arith.constant dense<0.000000e+00> : vector<4x2xf32>
    %29 = tpu.matmul %28, %26, %cst_23 {dimension_numbers = #tpu.dot_dimension_numbers<[1], [0], [0], [1], [0, 0, 1, 1], [], []>} : vector<4x32xf32>, vector<32x2xf32>, vector<4x2xf32> -> vector<4x2xf32>
    %c0_24 = arith.constant 0 : index
    %c0_25 = arith.constant 0 : index
    %30 = vector.load %arg6[%c0_24, %c0_25] : memref<4x1xf32, #tpu.memory_space<vmem>>, vector<4x1xf32>
    %31 = vector.broadcast %30 : vector<4x1xf32> to vector<4x2xf32>
    %32 = arith.addf %29, %31 : vector<4x2xf32>
    %c0_26 = arith.constant 0 : index
    %c0_27 = arith.constant 0 : index
    %33 = vector.load %arg8[%c0_26, %c0_27] : memref<4x2xf32, #tpu.memory_space<vmem>>, vector<4x2xf32>
    tpu.vector_store %arg8[%c0_26, %c0_27], %32 {strides = array<i32>} : memref<4x2xf32, #tpu.memory_space<vmem>>, vector<4x2xf32>,
    return
  }
  func.func @transform_0(%arg0: i32) -> (i32, i32) {
    %c0_i32 = arith.constant 0 : i32
    %c0_i32_0 = arith.constant 0 : i32
    %c0_i32_1 = arith.constant 0 : i32
    return %c0_i32, %c0_i32_0 : i32, i32
  }
  func.func @transform_1(%arg0: i32) -> (i32, i32, i32) {
    %c0_i32 = arith.constant 0 : i32
    %c0_i32_0 = arith.constant 0 : i32
    %c0_i32_1 = arith.constant 0 : i32
    %c0_i32_2 = arith.constant 0 : i32
    return %c0_i32, %c0_i32_0, %c0_i32_1 : i32, i32, i32
  }
  func.func @transform_2(%arg0: i32) -> (i32, i32) {
    %c0_i32 = arith.constant 0 : i32
    %c0_i32_0 = arith.constant 0 : i32
    %c0_i32_1 = arith.constant 0 : i32
    return %c0_i32, %c0_i32_0 : i32, i32
  }
  func.func @transform_3(%arg0: i32) -> (i32, i32) {
    %c0_i32 = arith.constant 0 : i32
    %c0_i32_0 = arith.constant 0 : i32
    %c0_i32_1 = arith.constant 0 : i32
    return %c0_i32, %c0_i32_0 : i32, i32
  }
  func.func @transform_4(%arg0: i32) -> (i32, i32) {
    %c0_i32 = arith.constant 0 : i32
    %c0_i32_0 = arith.constant 0 : i32
    %c0_i32_1 = arith.constant 0 : i32
    return %c0_i32, %c0_i32_0 : i32, i32
  }
  func.func @transform_5(%arg0: i32) -> (i32, i32) {
    %c0_i32 = arith.constant 0 : i32
    %c0_i32_0 = arith.constant 0 : i32
    %c0_i32_1 = arith.constant 0 : i32
    return %c0_i32, %c0_i32_0 : i32, i32
  }
  func.func @transform_6(%arg0: i32) -> (i32, i32) {
    %c0_i32 = arith.constant 0 : i32
    %c0_i32_0 = arith.constant 0 : i32
    %c0_i32_1 = arith.constant 0 : i32
    return %c0_i32, %c0_i32_0 : i32, i32
  }
  func.func @transform_7(%arg0: i32) -> (i32, i32) {
    %c0_i32 = arith.constant 0 : i32
    %c0_i32_0 = arith.constant 0 : i32
    %c0_i32_1 = arith.constant 0 : i32
    return %c0_i32, %c0_i32_0 : i32, i32
  }
}

</mosaic_0001>

<bundles_post_ra>
// kernel: _lambda_.3
= control target key start
LH: loop header
LB: loop body
LE: loop exit
PB: predicated region body
PF: predicated region fallthrough
CT: control target
= control target key end

     0   :  { %v8700_v1 = vmov 0   ;;  %s8701_s16 = smov 127   ;;  %s8702_s27 = smov 126   ;;  %vm158_vm0 = vcmask 1039360   ;;  %vm198_vm1 = vcmask 130048   ;;  %vm1087_vm2 = vcmask 1031168   ;;  %s11713_s0 = inlined_call_operand.vmem [shape: bf16[16,2558], index: 0, kind: input, shape index: {}]   ;;  %s11714_s1 = inlined_call_operand.vmem [shape: bf16[16,8,16], index: 1, kind: input, shape index: {}]   ;;  %s11715_s2 = inlined_call_operand.vmem [shape: f32[8,1], index: 2, kind: input, shape index: {}]   ;;  %s11716_s3 = inlined_call_operand.vmem [shape: bf16[8,2450], index: 3, kind: output, shape index: {}]  }
   0x1   :  { %v8739_v0 = vld [vmem:[%s11713_s0 + $0xc] ss:$80 sps:$4 sm:$0xff]   ;;  %234 = vmatprep.mubr.bf16.mxu0 %v8700_v1  ;;  %275 = vmatprep.mubr.bf16.mxu1 %v8700_v1  ;;  %v8746_v2 = vld [vmem:[%s11713_s0 + $0x4] ss:$80 sps:$4 sm:$0xff]   ;;  %v8754_v3 = vld [vmem:[%s11713_s0 + $0x10] ss:$80 sps:$4 sm:$0xff]  }
   0x2   :  { %8629 = vset.pattern.permute.xlu0 %v8700_v1  ;;  %124 = vrot.lane.b32.xlu1 %v8739_v0, %s8701_s16  ;;  %v8761_v4 = vld [vmem:[%s11713_s0 + $0x8] ss:$80 sps:$4 sm:$0xff]   ;;  %v8768_v5 = vld [vmem:[%s11713_s0 + $0x14] ss:$80 sps:$4 sm:$0xff]   ;;  %v8775_v6 = vld [vmem:[%s11713_s0] ss:$80 sps:$4 sm:$0xff]  }
   0x3   :  { %120 = vrot.lane.b32.xlu0 %v8746_v2, %s8701_s16  ;;  %v8782_v7 = vld [vmem:[%s11713_s0 + $0x1c] ss:$80 sps:$4 sm:$0xff]   ;;  %v8789_v8 = vld [vmem:[%s11713_s0 + $0x18] ss:$80 sps:$4 sm:$0xff]   ;;  %v8796_v9 = vld [vmem:[%s11713_s0 + $0x24] ss:$80 sps:$4 sm:$0xff]  }
   0x4   :  { %v8803_v10 = vld [vmem:[%s11713_s0 + $0x20] ss:$80 sps:$4 sm:$0xff]   ;;  %v8810_v11 = vld [vmem:[%s11713_s0 + $0x2c] ss:$80 sps:$4 sm:$0xff]   ;;  %v8817_v12 = vld [vmem:[%s11713_s0 + $0x28] ss:$80 sps:$4 sm:$0xff]  }
   0x5   :  { %v8824_v13 = vld [vmem:[%s11713_s0 + $0x34] ss:$80 sps:$4 sm:$0xff]   ;;  %v8831_v14 = vld [vmem:[%s11713_s0 + $0x30] ss:$80 sps:$4 sm:$0xff]   ;;  %v8838_v15 = vld [vmem:[%s11713_s0 + $0x3c] ss:$80 sps:$4 sm:$0xff]  }
   0x6   :  { %126 = vrot.lane.b32.xlu1 %v8754_v3, %s8701_s16  ;;  %v8845_v16 = vld [vmem:[%s11713_s0 + $0x38] ss:$80 sps:$4 sm:$0xff]   ;;  %v8852_v17 = vld [vmem:[%s11713_s0 + $0x44] ss:$80 sps:$4 sm:$0xff]   ;;  %v8859_v18 = vld [vmem:[%s11713_s0 + $0x40] ss:$80 sps:$4 sm:$0xff]  }
   0x7   :  { %122 = vrot.lane.b32.xlu0 %v8761_v4, %s8701_s16  ;;  %v8866_v19 = vld [vmem:[%s11713_s0 + $0x4c] ss:$80 sps:$4 sm:$0xff]   ;;  %v8873_v20 = vld [vmem:[%s11713_s0 + $0x48] ss:$80 sps:$4 sm:$0xff]   ;;  %s8704_s28 = smov 93   ;;  %s8705_s6 = smov 92  }
   0x8   :  { %v8927_v28 = vld [vmem:[%s11714_s1 + $0x4] sm:$0xf]  ;;  %s8706_s9 = smov 91   ;;  %vm1602_vm3 = vcmask 1022976   ;;  %s8707_s12 = smov 90   ;;  %vm2117_vm4 = vcmask 760832  }
   0x9   :  { %vm2632_vm5 = vcmask 752640   ;;  %s8708_s18 = smov 58   ;;  %vm3147_vm6 = vcmask 744448   ;;  %s8709_s30 = smov 57   ;;  %vm3662_vm7 = vcmask 736256   ;;  %vm4177_vm8 = vcmask 474112  }
   0xa   :  { %128 = vrot.lane.b32.xlu1 %v8768_v5, %s8701_s16  ;;  %s8710_s7 = smov 56   ;;  %s8711_s10 = smov 55   ;;  %vm4692_vm9 = vcmask 465920   ;;  %vm5207_vm10 = vcmask 457728   ;;  %vm5722_vm11 = vcmask 449536   ;;  %vm6237_vm12 = vcmask 187392  }
   0xb   :  { %118 = vrot.lane.b32.xlu0 %v8775_v6, %s8701_s16  ;;  %s8712_s15 = smov 23   ;;  %s8713_s29 = smov 22   ;;  %vm6752_vm13 = vcmask 179200   ;;  %vm7267_vm14 = vcmask 171008   ;;  %vm7782_vm15 = vcmask 162816  }
   0xc   :  { %s8714_s5 = smov 21  }
   0xe   :  { %132 = vrot.lane.b32.xlu1 %v8782_v7, %s8701_s16 }
   0xf   :  { %130 = vrot.lane.b32.xlu0 %v8789_v8, %s8701_s16 }
  0x12   :  { %136 = vrot.lane.b32.xlu1 %v8796_v9, %s8701_s16 }
  0x13   :  { %134 = vrot.lane.b32.xlu0 %v8803_v10, %s8701_s16 }
  0x16   :  { %140 = vrot.lane.b32.xlu1 %v8810_v11, %s8701_s16 }
  0x17   :  { %138 = vrot.lane.b32.xlu0 %v8817_v12, %s8701_s16 }
  0x1a   :  { %144 = vrot.lane.b32.xlu1 %v8824_v13, %s8701_s16 }
  0x1b   :  { %142 = vrot.lane.b32.xlu0 %v8831_v14, %s8701_s16 }
  0x1e   :  { %148 = vrot.lane.b32.xlu1 %v8838_v15, %s8701_s16 }
  0x1f   :  { %146 = vrot.lane.b32.xlu0 %v8845_v16, %s8701_s16 }
  0x22   :  { %152 = vrot.lane.b32.xlu1 %v8852_v17, %s8701_s16 }
  0x23   :  { %150 = vrot.lane.b32.xlu0 %v8859_v18, %s8701_s16 }
  0x26   :  { %156 = vrot.lane.b32.xlu1 %v8866_v19, %s8701_s16 }
  0x27   :  { %154 = vrot.lane.b32.xlu0 %v8873_v20, %s8701_s16  ;;  %s8703_s16 = smov 125  }
  0x2a   :  { %1051 = vrot.lane.b32.xlu1 %v8761_v4, %s8702_s27 }
  0x2b   :  { %1049 = vrot.lane.b32.xlu0 %v8746_v2, %s8702_s27 }
  0x2e   :  { %1055 = vrot.lane.b32.xlu1 %v8754_v3, %s8702_s27 }
  0x2f   :  { %1053 = vrot.lane.b32.xlu0 %v8739_v0, %s8702_s27 }
  0x32   :  { %1057 = vrot.lane.b32.xlu1 %v8768_v5, %s8702_s27 }
  0x33   :  { %1047 = vrot.lane.b32.xlu0 %v8775_v6, %s8702_s27 }
  0x36   :  { %1061 = vrot.lane.b32.xlu1 %v8782_v7, %s8702_s27 }
  0x37   :  { %1059 = vrot.lane.b32.xlu0 %v8789_v8, %s8702_s27 }
  0x3a   :  { %1065 = vrot.lane.b32.xlu1 %v8796_v9, %s8702_s27 }
  0x3b   :  { %1063 = vrot.lane.b32.xlu0 %v8803_v10, %s8702_s27 }
  0x3e   :  { %1069 = vrot.lane.b32.xlu1 %v8810_v11, %s8702_s27 }
  0x3f   :  { %1067 = vrot.lane.b32.xlu0 %v8817_v12, %s8702_s27 }
  0x42   :  { %1073 = vrot.lane.b32.xlu1 %v8824_v13, %s8702_s27 }
  0x43   :  { %1071 = vrot.lane.b32.xlu0 %v8831_v14, %s8702_s27 }
  0x46   :  { %1077 = vrot.lane.b32.xlu1 %v8838_v15, %s8702_s27 }
  0x47   :  { %1075 = vrot.lane.b32.xlu0 %v8845_v16, %s8702_s27 }
  0x4a   :  { %1081 = vrot.lane.b32.xlu1 %v8852_v17, %s8702_s27 }
  0x4b   :  { %1079 = vrot.lane.b32.xlu0 %v8859_v18, %s8702_s27 }
  0x4e   :  { %1085 = vrot.lane.b32.xlu1 %v8866_v19, %s8702_s27 }
  0x4f   :  { %1083 = vrot.lane.b32.xlu0 %v8873_v20, %s8702_s27 }
  0x52   :  { %1566 = vrot.lane.b32.xlu1 %v8761_v4, %s8703_s16 }
  0x53   :  { %1564 = vrot.lane.b32.xlu0 %v8746_v2, %s8703_s16 }
  0x56   :  { %1570 = vrot.lane.b32.xlu1 %v8754_v3, %s8703_s16 }
  0x57   :  { %1568 = vrot.lane.b32.xlu0 %v8739_v0, %s8703_s16 }
  0x5a   :  { %1572 = vrot.lane.b32.xlu1 %v8768_v5, %s8703_s16 }
  0x5b   :  { %1562 = vrot.lane.b32.xlu0 %v8775_v6, %s8703_s16 }
  0x5e   :  { %1576 = vrot.lane.b32.xlu1 %v8782_v7, %s8703_s16 }
  0x5f   :  { %1574 = vrot.lane.b32.xlu0 %v8789_v8, %s8703_s16 }
  0x62   :  { %1580 = vrot.lane.b32.xlu1 %v8796_v9, %s8703_s16 }
  0x63   :  { %1578 = vrot.lane.b32.xlu0 %v8803_v10, %s8703_s16 }
  0x66   :  { %1584 = vrot.lane.b32.xlu1 %v8810_v11, %s8703_s16 }
  0x67   :  { %1582 = vrot.lane.b32.xlu0 %v8817_v12, %s8703_s16 }
  0x6a   :  { %1588 = vrot.lane.b32.xlu1 %v8824_v13, %s8703_s16 }
  0x6b   :  { %1586 = vrot.lane.b32.xlu0 %v8831_v14, %s8703_s16 }
  0x6e   :  { %1592 = vrot.lane.b32.xlu1 %v8838_v15, %s8703_s16 }
  0x6f   :  { %1590 = vrot.lane.b32.xlu0 %v8845_v16, %s8703_s16 }
  0x72   :  { %1596 = vrot.lane.b32.xlu1 %v8852_v17, %s8703_s16 }
  0x73   :  { %1594 = vrot.lane.b32.xlu0 %v8859_v18, %s8703_s16 }
  0x74   :  { %v125_v21 = vpop.permute.xlu1 %124 }
  0x75   :  { %v121_v22 = vpop.permute.xlu0 %120 }
  0x76   :  { %1600 = vrot.lane.b32.xlu1 %v8866_v19, %s8703_s16 }
  0x77   :  { %1598 = vrot.lane.b32.xlu0 %v8873_v20, %s8703_s16 }
  0x78   :  { %v127_v23 = vpop.permute.xlu1 %126 }
  0x79   :  { %v123_v24 = vpop.permute.xlu0 %122  ;;  %v162_v25 = vsel %vm158_vm0, %v125_v21, %v127_v23 }
  0x7a   :  { %v160_v26 = vsel %vm158_vm0, %v121_v22, %v123_v24  ;;  %257 = vmatprep.subr.bf16.mxu1 %v162_v25  ;;  %v161_v27 = vsel %vm158_vm0, %v123_v24, %v125_v21  ;;  %2081 = vrot.lane.b32.xlu1 %v8761_v4, %s8704_s28  ;;  %v9034_v24 = vld [vmem:[%s11714_s1] sm:$0xf] }
  0x7b   :  { %216 = vmatprep.subr.bf16.mxu0 %v160_v26  ;;  %258 = vmatpush1.bf16.msra.mxu1 %v161_v27 }
  0x7c   :  { %v129_v29 = vpop.permute.xlu1 %128  ;;  %2079 = vrot.lane.b32.xlu0 %v8746_v2, %s8704_s28 }
  0x7d   :  { %v119_v30 = vpop.permute.xlu0 %118  ;;  %v163_v35 = vsel %vm158_vm0, %v127_v23, %v129_v29 }
  0x7e   :  { %v159_v31 = vsel %vm158_vm0, %v119_v30, %v121_v22  ;;  %8420 = vmatmul.mubr.msk.bf16.vlgmr.msra.gmra.mxu1 %vm198_vm1, %v8927_v28  ;;  %2085 = vrot.lane.b32.xlu1 %v8754_v3, %s8704_s28 }
  0x7f   :  { %217 = vmatpush1.bf16.msra.mxu0 %v159_v31  ;;  %357 = vmatprep.mubr.bf16.mxu1 %v8700_v1 }
  0x80   :  { %v133_v32 = vpop.permute.xlu1 %132  ;;  %2083 = vrot.lane.b32.xlu0 %v8739_v0, %s8704_s28 }
  0x81   :  { %v131_v33 = vpop.permute.xlu0 %130 }
  0x82   :  { %8419 = vmatmul.mubr.msk.bf16.vlgmr.msra.gmra.mxu0 %vm198_vm1, %v8927_v28  ;;  %v164_v34 = vsel %vm158_vm0, %v129_v29, %v131_v33  ;;  %2087 = vrot.lane.b32.xlu1 %v8768_v5, %s8704_s28  ;;  %v165_v39 = vsel %vm158_vm0, %v131_v33, %v133_v32 }
  0x83   :  { %298 = vmatprep.subr.bf16.mxu0 %v164_v34  ;;  %316 = vmatprep.mubr.bf16.mxu0 %v8700_v1 }
  0x84   :  { %299 = vmatpush1.bf16.msra.mxu0 %v163_v35  ;;  %v137_v36 = vpop.permute.xlu1 %136  ;;  %2077 = vrot.lane.b32.xlu0 %v8775_v6, %s8704_s28 }
  0x85   :  { %v135_v37 = vpop.permute.xlu0 %134 }
  0x86   :  { %v166_v38 = vsel %vm158_vm0, %v133_v32, %v135_v37  ;;  %2091 = vrot.lane.b32.xlu1 %v8782_v7, %s8704_s28  ;;  %v167_v43 = vsel %vm158_vm0, %v135_v37, %v137_v36 }
  0x87   :  { %339 = vmatprep.subr.bf16.mxu1 %v166_v38 }
  0x88   :  { %340 = vmatpush1.bf16.msra.mxu1 %v165_v39  ;;  %v141_v40 = vpop.permute.xlu1 %140  ;;  %2089 = vrot.lane.b32.xlu0 %v8789_v8, %s8704_s28 }
  0x89   :  { %v139_v41 = vpop.permute.xlu0 %138 }
  0x8a   :  { %8421 = vmatmul.mubr.msk.bf16.vlgmr.msra.gmra.mxu0 %vm198_vm1, %v8927_v28  ;;  %v168_v42 = vsel %vm158_vm0, %v137_v36, %v139_v41  ;;  %2095 = vrot.lane.b32.xlu1 %v8796_v9, %s8704_s28  ;;  %v169_v47 = vsel %vm158_vm0, %v139_v41, %v141_v40 }
  0x8b   :  { %8422 = vmatmul.mubr.msk.bf16.vlgmr.msra.gmra.mxu1 %vm198_vm1, %v8927_v28  ;;  %380 = vmatprep.subr.bf16.mxu0 %v168_v42 }
  0x8c   :  { %381 = vmatpush1.bf16.msra.mxu0 %v167_v43  ;;  %v145_v44 = vpop.permute.xlu1 %144  ;;  %398 = vmatprep.mubr.bf16.mxu0 %v8700_v1 }
  0x8d   :  { %v143_v45 = vpop.permute.xlu0 %142  ;;  %439 = vmatprep.mubr.bf16.mxu1 %v8700_v1  ;;  %2093 = vrot.lane.b32.xlu0 %v8803_v10, %s8704_s28 }
  0x8e   :  { %v170_v46 = vsel %vm158_vm0, %v141_v40, %v143_v45  ;;  %2099 = vrot.lane.b32.xlu1 %v8810_v11, %s8704_s28  ;;  %v171_v51 = vsel %vm158_vm0, %v143_v45, %v145_v44 }
  0x8f   :  { %421 = vmatprep.subr.bf16.mxu1 %v170_v46 }
  0x90   :  { %422 = vmatpush1.bf16.msra.mxu1 %v169_v47  ;;  %v149_v48 = vpop.permute.xlu1 %148 }
  0x91   :  { %v147_v49 = vpop.permute.xlu0 %146  ;;  %2097 = vrot.lane.b32.xlu0 %v8817_v12, %s8704_s28 }
  0x92   :  { %8423 = vmatmul.mubr.msk.bf16.vlgmr.msra.gmra.mxu0 %vm198_vm1, %v8927_v28  ;;  %v172_v50 = vsel %vm158_vm0, %v145_v44, %v147_v49  ;;  %2103 = vrot.lane.b32.xlu1 %v8824_v13, %s8704_s28  ;;  %v173_v55 = vsel %vm158_vm0, %v147_v49, %v149_v48 }
  0x93   :  { %8424 = vmatmul.mubr.msk.bf16.vlgmr.msra.gmra.mxu1 %vm198_vm1, %v8927_v28  ;;  %462 = vmatprep.subr.bf16.mxu0 %v172_v50 }
  0x94   :  { %463 = vmatpush1.bf16.msra.mxu0 %v171_v51  ;;  %v153_v52 = vpop.permute.xlu1 %152  ;;  %480 = vmatprep.mubr.bf16.mxu0 %v8700_v1  ;;  %v9171_v51 = vld [vmem:[%s11714_s1 + $0x8] sm:$0xf] }
  0x95   :  { %v151_v53 = vpop.permute.xlu0 %150  ;;  %521 = vmatprep.mubr.bf16.mxu1 %v8700_v1  ;;  %2101 = vrot.lane.b32.xlu0 %v8831_v14, %s8704_s28 }
  0x96   :  { %v174_v54 = vsel %vm158_vm0, %v149_v48, %v151_v53  ;;  %2107 = vrot.lane.b32.xlu1 %v8838_v15, %s8704_s28  ;;  %v175_v60 = vsel %vm158_vm0, %v151_v53, %v153_v52 }
  0x97   :  { %503 = vmatprep.subr.bf16.mxu1 %v174_v54 }
  0x98   :  { %504 = vmatpush1.bf16.msra.mxu1 %v173_v55  ;;  %v157_v56 = vpop.permute.xlu1 %156 }
  0x99   :  { %v155_v57 = vpop.permute.xlu0 %154  ;;  %585 = vmatprep.subr.bf16.mxu1 %v157_v56  ;;  %2105 = vrot.lane.b32.xlu0 %v8845_v16, %s8704_s28 }
  0x9a   :  { %8425 = vmatmul.mubr.msk.bf16.vlgmr.msra.gmra.mxu0 %vm198_vm1, %v8927_v28  ;;  %v176_v58 = vsel %vm158_vm0, %v153_v52, %v155_v57  ;;  %v177_v59 = vsel %vm158_vm0, %v155_v57, %v157_v56  ;;  %2111 = vrot.lane.b32.xlu1 %v8852_v17, %s8704_s28  ;;  %vm8390_vm0 = vcmask 1043456  }
  0x9b   :  { %8426 = vmatmul.mubr.msk.bf16.vlgmr.msra.gmra.mxu1 %vm198_vm1, %v8927_v28  ;;  %544 = vmatprep.subr.bf16.mxu0 %v176_v58 }
  0x9c   :  { %545 = vmatpush1.bf16.msra.mxu0 %v175_v60  ;;  %586 = vmatpush1.bf16.msra.mxu1 %v177_v59  ;;  %v8999_v61 = vpop.permute.xlu1 %1051 }
  0x9d   :  { %562 = vmatprep.mubr.bf16.mxu0 %v8700_v1  ;;  %603 = vmatprep.mubr.bf16.mxu1 %v8700_v1  ;;  %v9003_v62 = vpop.permute.xlu0 %1049 }
  0x9e   :  { %649 = vmatprep.subr.bf16.mxu0 %v8746_v2  ;;  %690 = vmatprep.subr.bf16.mxu1 %v8739_v0  ;;  %v1089_v38 = vsel %vm1087_vm2, %v9003_v62, %v8999_v61 }
  0x9f   :  { %2109 = vrot.lane.b32.xlu0 %v8859_v18, %s8704_s28  ;;  %2115 = vrot.lane.b32.xlu1 %v8866_v19, %s8704_s28 }
  0xa0   :  { %v9011_v63 = vpop.permute.xlu1 %1055 }
  0xa1   :  { %v9013_v21 = vpop.permute.xlu0 %1053 }
  0xa2   :  { %8427 = vmatmul.mubr.msk.bf16.vlgmr.msra.gmra.mxu0 %vm198_vm1, %v8927_v28  ;;  %v1091_v40 = vsel %vm1087_vm2, %v9013_v21, %v9011_v63  ;;  %v1090_v44 = vsel %vm1087_vm2, %v8999_v61, %v9013_v21 }
  0xa3   :  { %8428 = vmatmul.mubr.msk.bf16.vlgmr.msra.gmra.mxu1 %vm198_vm1, %v8927_v28  ;;  %650 = vmatpush1.bf16.msra.mxu0 %v8775_v6 }
  0xa4   :  { %691 = vmatpush1.bf16.msra.mxu1 %v8761_v4  ;;  %667 = vmatprep.mubr.bf16.mxu0 %v8700_v1  ;;  %v9022_v22 = vpop.permute.xlu1 %1057 }
  0xa5   :  { %708 = vmatprep.mubr.bf16.mxu1 %v8700_v1  ;;  %731 = vmatprep.subr.bf16.mxu0 %v8768_v5  ;;  %v9026_v23 = vpop.permute.xlu0 %1047  ;;  %v1092_v55 = vsel %vm1087_vm2, %v9011_v63, %v9022_v22 }
  0xa6   :  { %772 = vmatprep.subr.bf16.mxu1 %v8782_v7  ;;  %2113 = vrot.lane.b32.xlu0 %v8873_v20, %s8704_s28  ;;  %v1088_v46 = vsel %vm1087_vm2, %v9026_v23, %v9003_v62 }
  0xa7   :  { %2596 = vrot.lane.b32.xlu1 %v8761_v4, %s8705_s6 }
  0xa8   :  { %v9038_v25 = vpop.permute.xlu1 %1061 }
  0xa9   :  { %v9040_v26 = vpop.permute.xlu0 %1059 }
  0xaa   :  { %8429 = vmatmul.mubr.msk.bf16.vlgmr.msra.gmra.mxu0 %vm198_vm1, %v9034_v24  ;;  %2594 = vrot.lane.b32.xlu0 %v8746_v2, %s8705_s6  ;;  %v1093_v47 = vsel %vm1087_vm2, %v9022_v22, %v9040_v26  ;;  %v1094_v53 = vsel %vm1087_vm2, %v9040_v26, %v9038_v25 }
  0xab   :  { %8430 = vmatmul.mubr.msk.bf16.vlgmr.msra.gmra.mxu1 %vm198_vm1, %v9034_v24  ;;  %732 = vmatpush1.bf16.msra.mxu0 %v8754_v3 }
  0xac   :  { %773 = vmatpush1.bf16.msra.mxu1 %v8789_v8  ;;  %749 = vmatprep.mubr.bf16.mxu0 %v8700_v1  ;;  %v9051_v27 = vpop.permute.xlu1 %1065 }
  0xad   :  { %790 = vmatprep.mubr.bf16.mxu1 %v8700_v1  ;;  %813 = vmatprep.subr.bf16.mxu0 %v8796_v9  ;;  %v9055_v28 = vpop.permute.xlu0 %1063 }
  0xae   :  { %854 = vmatprep.subr.bf16.mxu1 %v8810_v11  ;;  %2598 = vrot.lane.b32.xlu0 %v8739_v0, %s8705_s6  ;;  %v1095_v48 = vsel %vm1087_vm2, %v9038_v25, %v9055_v28  ;;  %v1096_v63 = vsel %vm1087_vm2, %v9055_v28, %v9051_v27 }
  0xaf   :  { %2600 = vrot.lane.b32.xlu1 %v8754_v3, %s8705_s6 }
  0xb0   :  { %v9062_v29 = vpop.permute.xlu1 %1069 }
  0xb1   :  { %v9064_v30 = vpop.permute.xlu0 %1067 }
  0xb2   :  { %8431 = vmatmul.mubr.msk.bf16.vlgmr.msra.gmra.mxu0 %vm198_vm1, %v9034_v24  ;;  %2592 = vrot.lane.b32.xlu0 %v8775_v6, %s8705_s6  ;;  %v1097_v56 = vsel %vm1087_vm2, %v9051_v27, %v9064_v30  ;;  %v1098_v61 = vsel %vm1087_vm2, %v9064_v30, %v9062_v29 }
  0xb3   :  { %8432 = vmatmul.mubr.msk.bf16.vlgmr.msra.gmra.mxu1 %vm198_vm1, %v9034_v24  ;;  %814 = vmatpush1.bf16.msra.mxu0 %v8803_v10 }
  0xb4   :  { %855 = vmatpush1.bf16.msra.mxu1 %v8817_v12  ;;  %831 = vmatprep.mubr.bf16.mxu0 %v8700_v1  ;;  %v9075_v31 = vpop.permute.xlu1 %1073 }
  0xb5   :  { %872 = vmatprep.mubr.bf16.mxu1 %v8700_v1  ;;  %895 = vmatprep.subr.bf16.mxu0 %v8824_v13  ;;  %v9079_v32 = vpop.permute.xlu0 %1071 }
  0xb6   :  { %936 = vmatprep.subr.bf16.mxu1 %v8838_v15  ;;  %2604 = vrot.lane.b32.xlu0 %v8789_v8, %s8705_s6  ;;  %v1099_v57 = vsel %vm1087_vm2, %v9062_v29, %v9079_v32  ;;  %v1100_v28 = vsel %vm1087_vm2, %v9079_v32, %v9075_v31 }
  0xb7   :  { %2602 = vrot.lane.b32.xlu1 %v8768_v5, %s8705_s6 }
  0xb8   :  { %v9086_v33 = vpop.permute.xlu1 %1077 }
  0xb9   :  { %v9088_v34 = vpop.permute.xlu0 %1075 }
  0xba   :  { %8433 = vmatmul.mubr.msk.bf16.vlgmr.msra.gmra.mxu0 %vm198_vm1, %v9034_v24  ;;  %2608 = vrot.lane.b32.xlu0 %v8803_v10, %s8705_s6  ;;  %v1101_v21 = vsel %vm1087_vm2, %v9075_v31, %v9088_v34  ;;  %v1102_v26 = vsel %vm1087_vm2, %v9088_v34, %v9086_v33 }
  0xbb   :  { %8434 = vmatmul.mubr.msk.bf16.vlgmr.msra.gmra.mxu1 %vm198_vm1, %v9034_v24  ;;  %896 = vmatpush1.bf16.msra.mxu0 %v8831_v14 }
  0xbc   :  { %937 = vmatpush1.bf16.msra.mxu1 %v8845_v16  ;;  %913 = vmatprep.mubr.bf16.mxu0 %v8700_v1  ;;  %v9099_v35 = vpop.permute.xlu1 %1081 }
  0xbd   :  { %954 = vmatprep.mubr.bf16.mxu1 %v8700_v1  ;;  %977 = vmatprep.subr.bf16.mxu0 %v8852_v17  ;;  %v9103_v36 = vpop.permute.xlu0 %1079 }
  0xbe   :  { %1018 = vmatprep.subr.bf16.mxu1 %v8866_v19  ;;  %2606 = vrot.lane.b32.xlu1 %v8782_v7, %s8705_s6  ;;  %v1103_v22 = vsel %vm1087_vm2, %v9086_v33, %v9103_v36 }
  0xbf   :  { %2612 = vrot.lane.b32.xlu0 %v8817_v12, %s8705_s6 }
  0xc0   :  { %v9110_v37 = vpop.permute.xlu1 %1085 }
  0xc1   :  { %v9115_v39 = vpop.permute.xlu0 %1083 }
  0xc2   :  { %8435 = vmatmul.mubr.msk.bf16.vlgmr.msra.gmra.mxu0 %vm198_vm1, %v9034_v24  ;;  %2610 = vrot.lane.b32.xlu1 %v8796_v9, %s8705_s6  ;;  %v1105_v29 = vsel %vm1087_vm2, %v9099_v35, %v9115_v39  ;;  %v1106_v33 = vsel %vm1087_vm2, %v9115_v39, %v9110_v37 }
  0xc3   :  { %8436 = vmatmul.mubr.msk.bf16.vlgmr.msra.gmra.mxu1 %vm198_vm1, %v9034_v24  ;;  %978 = vmatpush1.bf16.msra.mxu0 %v8859_v18 }
  0xc4   :  { %1019 = vmatpush1.bf16.msra.mxu1 %v8873_v20  ;;  %1144 = vmatprep.subr.bf16.mxu0 %v1089_v38  ;;  %v9128_v41 = vpop.permute.xlu1 %1566 }
  0xc5   :  { %995 = vmatprep.mubr.bf16.mxu0 %v8700_v1  ;;  %1036 = vmatprep.mubr.bf16.mxu1 %v8700_v1  ;;  %v9132_v42 = vpop.permute.xlu0 %1564 }
  0xc6   :  { %1185 = vmatprep.subr.bf16.mxu1 %v1091_v40  ;;  %2616 = vrot.lane.b32.xlu0 %v8831_v14, %s8705_s6  ;;  %v1604_v34 = vsel %vm1602_vm3, %v9132_v42, %v9128_v41  ;;  %v1104_v40 = vsel %vm1087_vm2, %v9103_v36, %v9099_v35 }
  0xc7   :  { %2614 = vrot.lane.b32.xlu1 %v8810_v11, %s8705_s6 }
  0xc8   :  { %v9138_v43 = vpop.permute.xlu1 %1570 }
  0xc9   :  { %v9143_v45 = vpop.permute.xlu0 %1568 }
  0xca   :  { %8437 = vmatmul.mubr.msk.bf16.vlgmr.msra.gmra.mxu0 %vm198_vm1, %v9034_v24  ;;  %2620 = vrot.lane.b32.xlu0 %v8845_v16, %s8705_s6 }
  0xcb   :  { %1145 = vmatpush1.bf16.msra.mxu0 %v1088_v46  ;;  %8438 = vmatmul.mubr.msk.bf16.vlgmr.msra.gmra.mxu1 %vm198_vm1, %v9034_v24 }
  0xcc   :  { %1186 = vmatpush1.bf16.msra.mxu1 %v1090_v44  ;;  %1162 = vmatprep.mubr.bf16.mxu0 %v8700_v1  ;;  %v9161_v49 = vpop.permute.xlu1 %1572  ;;  %v1605_v44 = vsel %vm1602_vm3, %v9128_v41, %v9143_v45 }
  0xcd   :  { %1226 = vmatprep.subr.bf16.mxu0 %v1093_v47  ;;  %1203 = vmatprep.mubr.bf16.mxu1 %v8700_v1  ;;  %v9164_v50 = vpop.permute.xlu0 %1562 }
  0xce   :  { %1267 = vmatprep.subr.bf16.mxu1 %v1095_v48  ;;  %2618 = vrot.lane.b32.xlu1 %v8824_v13, %s8705_s6  ;;  %v1603_v46 = vsel %vm1602_vm3, %v9164_v50, %v9132_v42  ;;  %v9334_v50 = vld [vmem:[%s11714_s1 + $0xc] sm:$0xf] }
  0xcf   :  { %2624 = vrot.lane.b32.xlu0 %v8859_v18, %s8705_s6 }
  0xd0   :  { %v9175_v52 = vpop.permute.xlu1 %1576 }
  0xd1   :  { %v9180_v54 = vpop.permute.xlu0 %1574 }
  0xd2   :  { %8440 = vmatmul.mubr.msk.bf16.vlgmr.msra.gmra.mxu0 %vm198_vm1, %v9171_v51  ;;  %2622 = vrot.lane.b32.xlu1 %v8838_v15, %s8705_s6  ;;  %v1608_v47 = vsel %vm1602_vm3, %v9161_v49, %v9180_v54 }
  0xd3   :  { %1227 = vmatpush1.bf16.msra.mxu0 %v1092_v55  ;;  %8441 = vmatmul.mubr.msk.bf16.vlgmr.msra.gmra.mxu1 %vm198_vm1, %v9171_v51  ;;  %v1607_v55 = vsel %vm1602_vm3, %v9138_v43, %v9161_v49 }
  0xd4   :  { %1268 = vmatpush1.bf16.msra.mxu1 %v1094_v53  ;;  %1244 = vmatprep.mubr.bf16.mxu0 %v8700_v1  ;;  %v9198_v58 = vpop.permute.xlu1 %1580  ;;  %v1609_v53 = vsel %vm1602_vm3, %v9180_v54, %v9175_v52 }
  0xd5   :  { %1308 = vmatprep.subr.bf16.mxu0 %v1097_v56  ;;  %1285 = vmatprep.mubr.bf16.mxu1 %v8700_v1  ;;  %v9201_v59 = vpop.permute.xlu0 %1578 }
  0xd6   :  { %1349 = vmatprep.subr.bf16.mxu1 %v1099_v57  ;;  %2628 = vrot.lane.b32.xlu0 %v8873_v20, %s8705_s6  ;;  %v1610_v41 = vsel %vm1602_vm3, %v9175_v52, %v9201_v59 }
  0xd7   :  { %2626 = vrot.lane.b32.xlu1 %v8852_v17, %s8705_s6 }
  0xd8   :  { %v9207_v60 = vpop.permute.xlu1 %1584 }
  0xd9   :  { %v9212_v62 = vpop.permute.xlu0 %1582 }
  0xda   :  { %8442 = vmatmul.mubr.msk.bf16.vlgmr.msra.gmra.mxu0 %vm198_vm1, %v9171_v51  ;;  %3109 = vrot.lane.b32.xlu0 %v8746_v2, %s8706_s9  ;;  %v1612_v56 = vsel %vm1602_vm3, %v9198_v58, %v9212_v62 }
  0xdb   :  { %1309 = vmatpush1.bf16.msra.mxu0 %v1096_v63  ;;  %8443 = vmatmul.mubr.msk.bf16.vlgmr.msra.gmra.mxu1 %vm198_vm1, %v9171_v51  ;;  %v1611_v63 = vsel %vm1602_vm3, %v9201_v59, %v9198_v58 }
  0xdc   :  { %1350 = vmatpush1.bf16.msra.mxu1 %v1098_v61  ;;  %1326 = vmatprep.mubr.bf16.mxu0 %v8700_v1  ;;  %v9230_v23 = vpop.permute.xlu1 %1588  ;;  %v1613_v61 = vsel %vm1602_vm3, %v9212_v62, %v9207_v60 }
  0xdd   :  { %1390 = vmatprep.subr.bf16.mxu0 %v1101_v21  ;;  %1367 = vmatprep.mubr.bf16.mxu1 %v8700_v1  ;;  %v9233_v24 = vpop.permute.xlu0 %1586 }
  0xde   :  { %1431 = vmatprep.subr.bf16.mxu1 %v1103_v22  ;;  %2630 = vrot.lane.b32.xlu1 %v8866_v19, %s8705_s6  ;;  %v1614_v52 = vsel %vm1602_vm3, %v9207_v60, %v9233_v24 }
  0xdf   :  { %3113 = vrot.lane.b32.xlu0 %v8739_v0, %s8706_s9 }
  0xe0   :  { %v9239_v25 = vpop.permute.xlu1 %1592 }
  0xe1   :  { %v9244_v27 = vpop.permute.xlu0 %1590 }
  0xe2   :  { %8444 = vmatmul.mubr.msk.bf16.vlgmr.msra.gmra.mxu0 %vm198_vm1, %v9171_v51  ;;  %3111 = vrot.lane.b32.xlu1 %v8761_v4, %s8706_s9  ;;  %v1616_v21 = vsel %vm1602_vm3, %v9230_v23, %v9244_v27  ;;  %v1617_v22 = vsel %vm1602_vm3, %v9244_v27, %v9239_v25 }
  0xe3   :  { %1391 = vmatpush1.bf16.msra.mxu0 %v1100_v28  ;;  %8445 = vmatmul.mubr.msk.bf16.vlgmr.msra.gmra.mxu1 %vm198_vm1, %v9171_v51 }
  0xe4   :  { %1432 = vmatpush1.bf16.msra.mxu1 %v1102_v26  ;;  %1408 = vmatprep.mubr.bf16.mxu0 %v8700_v1  ;;  %v9259_v30 = vpop.permute.xlu1 %1596  ;;  %v1615_v26 = vsel %vm1602_vm3, %v9233_v24, %v9230_v23 }
  0xe5   :  { %1472 = vmatprep.subr.bf16.mxu0 %v1105_v29  ;;  %1449 = vmatprep.mubr.bf16.mxu1 %v8700_v1  ;;  %v9262_v31 = vpop.permute.xlu0 %1594 }
  0xe6   :  { %1513 = vmatprep.subr.bf16.mxu1 %v9110_v37  ;;  %3107 = vrot.lane.b32.xlu0 %v8775_v6, %s8706_s9  ;;  %v1606_v37 = vsel %vm1602_vm3, %v9143_v45, %v9138_v43  ;;  %v1618_v60 = vsel %vm1602_vm3, %v9239_v25, %v9262_v31  ;;  %v1619_v24 = vsel %vm1602_vm3, %v9262_v31, %v9259_v30 }
  0xe7   :  { %3115 = vrot.lane.b32.xlu1 %v8754_v3, %s8706_s9 }
  0xe8   :  { %v9269_v32 = vpop.permute.xlu1 %1600 }
  0xe9   :  { %v9277_v38 = vpop.permute.xlu0 %1598 }
  0xea   :  { %8446 = vmatmul.mubr.msk.bf16.vlgmr.msra.gmra.mxu0 %vm198_vm1, %v9171_v51  ;;  %3119 = vrot.lane.b32.xlu0 %v8789_v8, %s8706_s9  ;;  %v1620_v28 = vsel %vm1602_vm3, %v9259_v30, %v9277_v38  ;;  %v1621_v23 = vsel %vm1602_vm3, %v9277_v38, %v9269_v32 }
  0xeb   :  { %1473 = vmatpush1.bf16.msra.mxu0 %v1104_v40  ;;  %8447 = vmatmul.mubr.msk.bf16.vlgmr.msra.gmra.mxu1 %vm198_vm1, %v9171_v51 }
  0xec   :  { %1514 = vmatpush1.bf16.msra.mxu1 %v1106_v33  ;;  %1659 = vmatprep.subr.bf16.mxu0 %v1604_v34  ;;  %v9291_v39 = vpop.permute.xlu1 %2081 }
  0xed   :  { %1490 = vmatprep.mubr.bf16.mxu0 %v8700_v1  ;;  %1531 = vmatprep.mubr.bf16.mxu1 %v8700_v1 }
  0xee   :  { %1700 = vmatprep.subr.bf16.mxu1 %v1606_v37  ;;  %3117 = vrot.lane.b32.xlu1 %v8768_v5, %s8706_s9  ;;  %v9297_v35 = vpop.permute.xlu0 %2079 }
  0xef   :  { %3123 = vrot.lane.b32.xlu0 %v8803_v10, %s8706_s9  ;;  %v2119_v29 = vsel %vm2117_vm4, %v9297_v35, %v9291_v39 }
  0xf0   :  { %v9301_v36 = vpop.permute.xlu1 %2085 }
  0xf2   :  { %8448 = vmatmul.mubr.msk.bf16.vlgmr.msra.gmra.mxu0 %vm198_vm1, %v9171_v51  ;;  %3121 = vrot.lane.b32.xlu1 %v8782_v7, %s8706_s9  ;;  %v9316_v48 = vpop.permute.xlu0 %2083 }
  0xf3   :  { %1660 = vmatpush1.bf16.msra.mxu0 %v1603_v46  ;;  %8449 = vmatmul.mubr.msk.bf16.vlgmr.msra.gmra.mxu1 %vm198_vm1, %v9171_v51  ;;  %v2121_v30 = vsel %vm2117_vm4, %v9316_v48, %v9301_v36 }
  0xf4   :  { %1701 = vmatpush1.bf16.msra.mxu1 %v1605_v44  ;;  %1677 = vmatprep.mubr.bf16.mxu0 %v8700_v1  ;;  %v9324_v42 = vpop.permute.xlu1 %2087 }
  0xf5   :  { %1741 = vmatprep.subr.bf16.mxu0 %v1608_v47  ;;  %1718 = vmatprep.mubr.bf16.mxu1 %v8700_v1 }
  0xf6   :  { %1782 = vmatprep.subr.bf16.mxu1 %v1610_v41  ;;  %3127 = vrot.lane.b32.xlu0 %v8817_v12, %s8706_s9  ;;  %v9329_v45 = vpop.permute.xlu0 %2077 }
  0xf7   :  { %3125 = vrot.lane.b32.xlu1 %v8796_v9, %s8706_s9  ;;  %v2118_v34 = vsel %vm2117_vm4, %v9329_v45, %v9297_v35 }
  0xf8   :  { %v9338_v51 = vpop.permute.xlu1 %2091 }
  0xfa   :  { %8451 = vmatmul.mubr.msk.bf16.vlgmr.msra.gmra.mxu0 %vm198_vm1, %v9334_v50  ;;  %3131 = vrot.lane.b32.xlu0 %v8831_v14, %s8706_s9  ;;  %v9353_v57 = vpop.permute.xlu0 %2089 }
  0xfb   :  { %1742 = vmatpush1.bf16.msra.mxu0 %v1607_v55  ;;  %8452 = vmatmul.mubr.msk.bf16.vlgmr.msra.gmra.mxu1 %vm198_vm1, %v9334_v50  ;;  %v2124_v37 = vsel %vm2117_vm4, %v9353_v57, %v9338_v51  ;;  %v9631_v55 = vld [vmem:[%s11713_s0 + $0x8] ss:$80 sps:$4 sm:$0xff]  }
  0xfc   :  { %1783 = vmatpush1.bf16.msra.mxu1 %v1609_v53  ;;  %1759 = vmatprep.mubr.bf16.mxu0 %v8700_v1  ;;  %v9361_v43 = vpop.permute.xlu1 %2095 }
  0xfd   :  { %1823 = vmatprep.subr.bf16.mxu0 %v1612_v56  ;;  %1800 = vmatprep.mubr.bf16.mxu1 %v8700_v1 }
  0xfe   :  { %1864 = vmatprep.subr.bf16.mxu1 %v1614_v52  ;;  %3129 = vrot.lane.b32.xlu1 %v8810_v11, %s8706_s9 }
  0xff   :  { %3135 = vrot.lane.b32.xlu0 %v8845_v16, %s8706_s9  ;;  %v9368_v49 = vpop.permute.xlu0 %2093 }
 0x100   :  { %v9370_v54 = vpop.permute.xlu1 %2099  ;;  %v2126_v44 = vsel %vm2117_vm4, %v9368_v49, %v9361_v43 }
 0x102   :  { %8453 = vmatmul.mubr.msk.bf16.vlgmr.msra.gmra.mxu0 %vm198_vm1, %v9334_v50  ;;  %3133 = vrot.lane.b32.xlu1 %v8824_v13, %s8706_s9 }
 0x103   :  { %1824 = vmatpush1.bf16.msra.mxu0 %v1611_v63  ;;  %8454 = vmatmul.mubr.msk.bf16.vlgmr.msra.gmra.mxu1 %vm198_vm1, %v9334_v50  ;;  %v9390_v62 = vpop.permute.xlu0 %2097 }
 0x104   :  { %1865 = vmatpush1.bf16.msra.mxu1 %v1613_v61  ;;  %1841 = vmatprep.mubr.bf16.mxu0 %v8700_v1  ;;  %v9396_v58 = vpop.permute.xlu1 %2103 }
 0x105   :  { %1905 = vmatprep.subr.bf16.mxu0 %v1616_v21  ;;  %1882 = vmatprep.mubr.bf16.mxu1 %v8700_v1  ;;  %v9664_v21 = vld [vmem:[%s11713_s0 + $0x10] ss:$80 sps:$4 sm:$0xff]  }
 0x106   :  { %1946 = vmatprep.subr.bf16.mxu1 %v1618_v60  ;;  %3139 = vrot.lane.b32.xlu0 %v8859_v18, %s8706_s9 }
 0x107   :  { %3137 = vrot.lane.b32.xlu1 %v8838_v15, %s8706_s9  ;;  %v9400_v59 = vpop.permute.xlu0 %2101 }
 0x108   :  { %v9420_v27 = vpop.permute.xlu1 %2107 }
 0x10a   :  { %8455 = vmatmul.mubr.msk.bf16.vlgmr.msra.gmra.mxu0 %vm198_vm1, %v9334_v50  ;;  %3143 = vrot.lane.b32.xlu0 %v8873_v20, %s8706_s9 }
 0x10b   :  { %1906 = vmatpush1.bf16.msra.mxu0 %v1615_v26  ;;  %8456 = vmatmul.mubr.msk.bf16.vlgmr.msra.gmra.mxu1 %vm198_vm1, %v9334_v50  ;;  %v9418_v25 = vpop.permute.xlu0 %2105 }
 0x10c   :  { %1947 = vmatpush1.bf16.msra.mxu1 %v1617_v22  ;;  %1923 = vmatprep.mubr.bf16.mxu0 %v8700_v1  ;;  %v9443_v33 = vpop.permute.xlu1 %2111 }
 0x10d   :  { %1987 = vmatprep.subr.bf16.mxu0 %v1620_v28  ;;  %3141 = vrot.lane.b32.xlu1 %v8852_v17, %s8706_s9 }
 0x10e   :  { %1964 = vmatprep.mubr.bf16.mxu1 %v8700_v1  ;;  %2028 = vmatprep.subr.bf16.mxu1 %v9269_v32 }
 0x10f   :  { %3624 = vrot.lane.b32.xlu0 %v8746_v2, %s8707_s12 }
 0x111   :  { %3145 = vrot.lane.b32.xlu1 %v8866_v19, %s8706_s9  ;;  %v9441_v2 = vpop.permute.xlu0 %2109  ;;  %v9460_v32 = vpop.permute.xlu1 %2115 }
 0x112   :  { %8457 = vmatmul.mubr.msk.bf16.vlgmr.msra.gmra.mxu0 %vm198_vm1, %v9334_v50  ;;  %v2133_v46 = vsel %vm2117_vm4, %v9420_v27, %v9441_v2 }
 0x113   :  { %1988 = vmatpush1.bf16.msra.mxu0 %v1619_v24  ;;  %8458 = vmatmul.mubr.msk.bf16.vlgmr.msra.gmra.mxu1 %vm198_vm1, %v9334_v50 }
 0x114   :  { %2029 = vmatpush1.bf16.msra.mxu1 %v1621_v23  ;;  %3628 = vrot.lane.b32.xlu0 %v8739_v0, %s8707_s12  ;;  %v2120_v0 = vsel %vm2117_vm4, %v9291_v39, %v9316_v48  ;;  %v2129_v39 = vsel %vm2117_vm4, %v9370_v54, %v9400_v59  ;;  %v2130_v48 = vsel %vm2117_vm4, %v9400_v59, %v9396_v58  ;;  %v9678_v59 = vld [vmem:[%s11713_s0 + $0x18] ss:$80 sps:$4 sm:$0xff]   ;;  %v9699_v23 = vld [vmem:[%s11714_s1 + $0x14] sm:$0xf] }
 0x115   :  { %2174 = vmatprep.subr.bf16.mxu0 %v2119_v29  ;;  %2005 = vmatprep.mubr.bf16.mxu0 %v8700_v1  ;;  %v9704_v29 = vld [vmem:[%s11713_s0 + $0x20] ss:$80 sps:$4 sm:$0xff]  }
 0x116   :  { %3626 = vrot.lane.b32.xlu1 %v8761_v4, %s8707_s12  ;;  %2046 = vmatprep.mubr.bf16.mxu1 %v8700_v1  ;;  %v2123_v4 = vsel %vm2117_vm4, %v9324_v42, %v9353_v57  ;;  %v9641_v57 = vld [vmem:[%s11713_s0] ss:$80 sps:$4 sm:$0xff]  }
 0x117   :  { %2215 = vmatprep.subr.bf16.mxu1 %v2121_v30 }
 0x118   :  { %3622 = vrot.lane.b32.xlu0 %v8775_v6, %s8707_s12  ;;  %v9458_v31 = vpop.permute.xlu0 %2113  ;;  %v2125_v6 = vsel %vm2117_vm4, %v9338_v51, %v9368_v49  ;;  %v9618_v51 = vld [vmem:[%s11713_s0 + $0xc] ss:$80 sps:$4 sm:$0xff]  }
 0x11a   :  { %8459 = vmatmul.mubr.msk.bf16.vlgmr.msra.gmra.mxu0 %vm198_vm1, %v9334_v50  ;;  %3630 = vrot.lane.b32.xlu1 %v8754_v3, %s8707_s12  ;;  %v9488_v3 = vpop.permute.xlu1 %2596 }
 0x11b   :  { %2175 = vmatpush1.bf16.msra.mxu0 %v2118_v34  ;;  %8460 = vmatmul.mubr.msk.bf16.vlgmr.msra.gmra.mxu1 %vm198_vm1, %v9334_v50 }
 0x11c   :  { %2216 = vmatpush1.bf16.msra.mxu1 %v2120_v0  ;;  %3634 = vrot.lane.b32.xlu0 %v8789_v8, %s8707_s12  ;;  %v9482_v38 = vpop.permute.xlu0 %2594  ;;  %v9493_v8 = vld [vmem:[%s11714_s1 + $0x10] sm:$0xf] }
 0x11d   :  { %2192 = vmatprep.mubr.bf16.mxu0 %v8700_v1  ;;  %2256 = vmatprep.subr.bf16.mxu0 %v2123_v4  ;;  %v2634_v45 = vsel %vm2632_vm5, %v9482_v38, %v9488_v3 }
 0x11e   :  { %3632 = vrot.lane.b32.xlu1 %v8768_v5, %s8707_s12  ;;  %2233 = vmatprep.mubr.bf16.mxu1 %v8700_v1  ;;  %v2122_v5 = vsel %vm2117_vm4, %v9301_v36, %v9324_v42  ;;  %v2134_v42 = vsel %vm2117_vm4, %v9441_v2, %v9443_v33 }
 0x11f   :  { %2297 = vmatprep.subr.bf16.mxu1 %v2125_v6 }
 0x120   :  { %3638 = vrot.lane.b32.xlu0 %v8803_v10, %s8707_s12  ;;  %v9497_v40 = vpop.permute.xlu0 %2598  ;;  %v2127_v10 = vsel %vm2117_vm4, %v9361_v43, %v9390_v62 }
 0x121   :  { %v9521_v36 = vpop.permute.xlu1 %2600  ;;  %v2635_v49 = vsel %vm2632_vm5, %v9488_v3, %v9497_v40 }
 0x122   :  { %8462 = vmatmul.mubr.msk.bf16.vlgmr.msra.gmra.mxu0 %vm198_vm1, %v9493_v8  ;;  %3636 = vrot.lane.b32.xlu1 %v8782_v7, %s8707_s12 }
 0x123   :  { %2257 = vmatpush1.bf16.msra.mxu0 %v2122_v5  ;;  %8463 = vmatmul.mubr.msk.bf16.vlgmr.msra.gmra.mxu1 %vm198_vm1, %v9493_v8  ;;  %v9756_v5 = vld [vmem:[%s11713_s0 + $0x24] ss:$80 sps:$4 sm:$0xff]  }
 0x124   :  { %2298 = vmatpush1.bf16.msra.mxu1 %v2124_v37  ;;  %3642 = vrot.lane.b32.xlu0 %v8817_v12, %s8707_s12  ;;  %v9519_v35 = vpop.permute.xlu0 %2592  ;;  %v2128_v12 = vsel %vm2117_vm4, %v9390_v62, %v9370_v54 }
 0x125   :  { %2274 = vmatprep.mubr.bf16.mxu0 %v8700_v1  ;;  %2338 = vmatprep.subr.bf16.mxu0 %v2127_v10  ;;  %v2633_v61 = vsel %vm2632_vm5, %v9519_v35, %v9482_v38  ;;  %v9741_v38 = vld [vmem:[%s11713_s0 + $0x28] ss:$80 sps:$4 sm:$0xff]   ;;  %v9764_v35 = vld [vmem:[%s11713_s0 + $0x30] ss:$80 sps:$4 sm:$0xff]  }
 0x126   :  { %3640 = vrot.lane.b32.xlu1 %v8796_v9, %s8707_s12  ;;  %2315 = vmatprep.mubr.bf16.mxu1 %v8700_v1  ;;  %v2131_v9 = vsel %vm2117_vm4, %v9396_v58, %v9418_v25 }
 0x127   :  { %2379 = vmatprep.subr.bf16.mxu1 %v2129_v39 }
 0x128   :  { %3646 = vrot.lane.b32.xlu0 %v8831_v14, %s8707_s12  ;;  %v9529_v7 = vpop.permute.xlu0 %2604 }
 0x129   :  { %v9544_v14 = vpop.permute.xlu1 %2602 }
 0x12a   :  { %8464 = vmatmul.mubr.msk.bf16.vlgmr.msra.gmra.mxu0 %vm198_vm1, %v9493_v8  ;;  %3644 = vrot.lane.b32.xlu1 %v8810_v11, %s8707_s12  ;;  %v2638_v62 = vsel %vm2632_vm5, %v9544_v14, %v9529_v7 }
 0x12b   :  { %2339 = vmatpush1.bf16.msra.mxu0 %v2126_v44  ;;  %8465 = vmatmul.mubr.msk.bf16.vlgmr.msra.gmra.mxu1 %vm198_vm1, %v9493_v8 }
 0x12c   :  { %2380 = vmatpush1.bf16.msra.mxu1 %v2128_v12  ;;  %3650 = vrot.lane.b32.xlu0 %v8845_v16, %s8707_s12  ;;  %v9553_v47 = vpop.permute.xlu0 %2608  ;;  %v2132_v16 = vsel %vm2117_vm4, %v9418_v25, %v9420_v27  ;;  %v9691_v27 = vld [vmem:[%s11713_s0 + $0x14] ss:$80 sps:$4 sm:$0xff]  }
 0x12d   :  { %2356 = vmatprep.mubr.bf16.mxu0 %v8700_v1  ;;  %2420 = vmatprep.subr.bf16.mxu0 %v2131_v9 }
 0x12e   :  { %3648 = vrot.lane.b32.xlu1 %v8824_v13, %s8707_s12  ;;  %2397 = vmatprep.mubr.bf16.mxu1 %v8700_v1  ;;  %v2135_v13 = vsel %vm2117_vm4, %v9443_v33, %v9458_v31 }
 0x12f   :  { %2461 = vmatprep.subr.bf16.mxu1 %v2133_v46 }
 0x130   :  { %3654 = vrot.lane.b32.xlu0 %v8859_v18, %s8707_s12  ;;  %v9561_v11 = vpop.permute.xlu1 %2606 }
 0x131   :  { %v9576_v18 = vpop.permute.xlu0 %2612  ;;  %v2640_v26 = vsel %vm2632_vm5, %v9561_v11, %v9553_v47  ;;  %v2639_v33 = vsel %vm2632_vm5, %v9529_v7, %v9561_v11 }
 0x132   :  { %8466 = vmatmul.mubr.msk.bf16.vlgmr.msra.gmra.mxu0 %vm198_vm1, %v9493_v8  ;;  %3652 = vrot.lane.b32.xlu1 %v8838_v15, %s8707_s12  ;;  %v9592_v15 = vld [vmem:[%s11713_s0 + $0x4] ss:$80 sps:$4 sm:$0xff]  }
 0x133   :  { %2421 = vmatpush1.bf16.msra.mxu0 %v2130_v48  ;;  %8467 = vmatmul.mubr.msk.bf16.vlgmr.msra.gmra.mxu1 %vm198_vm1, %v9493_v8  ;;  %v9801_v48 = vld [vmem:[%s11713_s0 + $0x38] ss:$80 sps:$4 sm:$0xff]  }
 0x134   :  { %2462 = vmatpush1.bf16.msra.mxu1 %v2132_v16  ;;  %3658 = vrot.lane.b32.xlu0 %v8873_v20, %s8707_s12  ;;  %v9582_v41 = vpop.permute.xlu1 %2610 }
 0x135   :  { %2438 = vmatprep.mubr.bf16.mxu0 %v8700_v1  ;;  %2502 = vmatprep.subr.bf16.mxu0 %v2135_v13  ;;  %v2642_v0 = vsel %vm2632_vm5, %v9582_v41, %v9576_v18  ;;  %v2641_v9 = vsel %vm2632_vm5, %v9553_v47, %v9582_v41 }
 0x136   :  { %3656 = vrot.lane.b32.xlu1 %v8852_v17, %s8707_s12  ;;  %2479 = vmatprep.mubr.bf16.mxu1 %v8700_v1  ;;  %v2136_v17 = vsel %vm2117_vm4, %v9458_v31, %v9460_v32  ;;  %v2637_v31 = vsel %vm2632_vm5, %v9521_v36, %v9544_v14  ;;  %v9783_v14 = vld [vmem:[%s11713_s0 + $0x2c] ss:$80 sps:$4 sm:$0xff]  }
 0x137   :  { %2543 = vmatprep.subr.bf16.mxu1 %v9460_v32  ;;  %v9723_v32 = vld [vmem:[%s11713_s0 + $0x1c] ss:$80 sps:$4 sm:$0xff]  }
 0x138   :  { %4139 = vrot.lane.b32.xlu0 %v9592_v15, %s8708_s18  ;;  %v9596_v20 = vpop.permute.xlu0 %2616 }
 0x139   :  { %v9611_v50 = vpop.permute.xlu1 %2614 }
 0x13a   :  { %8468 = vmatmul.mubr.msk.bf16.vlgmr.msra.gmra.mxu0 %vm198_vm1, %v9493_v8  ;;  %3660 = vrot.lane.b32.xlu1 %v8866_v19, %s8707_s12  ;;  %v2636_v19 = vsel %vm2632_vm5, %v9497_v40, %v9521_v36  ;;  %v2644_v3 = vsel %vm2632_vm5, %v9611_v50, %v9596_v20  ;;  %v2643_v12 = vsel %vm2632_vm5, %v9576_v18, %v9611_v50 }
 0x13b   :  { %2503 = vmatpush1.bf16.msra.mxu0 %v2134_v42  ;;  %8469 = vmatmul.mubr.msk.bf16.vlgmr.msra.gmra.mxu1 %vm198_vm1, %v9493_v8  ;;  %v9816_v42 = vld [vmem:[%s11713_s0 + $0x34] ss:$80 sps:$4 sm:$0xff]  }
 0x13c   :  { %2544 = vmatpush1.bf16.msra.mxu1 %v2136_v17  ;;  %4143 = vrot.lane.b32.xlu0 %v9618_v51, %s8708_s18  ;;  %v9625_v53 = vpop.permute.xlu0 %2620 }
 0x13d   :  { %2689 = vmatprep.subr.bf16.mxu0 %v2634_v45  ;;  %2520 = vmatprep.mubr.bf16.mxu0 %v8700_v1 }
 0x13e   :  { %4141 = vrot.lane.b32.xlu1 %v9631_v55, %s8708_s18  ;;  %v9635_v56 = vpop.f32.mrf.mxu1  ;;  %2561 = vmatprep.mubr.bf16.mxu1 %v8700_v1 }
 0x13f   :  { %2730 = vmatprep.subr.bf16.mxu1 %v2636_v19  ;;  %v9824_v19 = vld [vmem:[%s11713_s0 + $0x40] ss:$80 sps:$4 sm:$0xff]  }
 0x140   :  { %4137 = vrot.lane.b32.xlu0 %v9641_v57, %s8708_s18  ;;  %v9645_v52 = vpop.f32.mrf.mxu1  ;;  %v9647_v43 = vpop.permute.xlu1 %2618 }
 0x141   :  { %v9652_v54 = vpop.permute.xlu0 %2624  ;;  %v2646_v46 = vsel %vm2632_vm5, %v9647_v43, %v9625_v53 }
 0x142   :  { %v9657_v63 = vpop.f32.mrf.mxu0  ;;  %8470 = vmatmul.mubr.msk.bf16.vlgmr.msra.gmra.mxu0 %vm198_vm1, %v9493_v8  ;;  %4145 = vrot.lane.b32.xlu1 %v9664_v21, %s8708_s18  ;;  %v281_v60 = vpop.f32.mrf.mxu1 }
 0x143   :  { %2690 = vmatpush1.bf16.msra.mxu0 %v2633_v61  ;;  %8471 = vmatmul.mubr.msk.bf16.vlgmr.msra.gmra.mxu1 %vm198_vm1, %v9493_v8 }
 0x144   :  { %2731 = vmatpush1.bf16.msra.mxu1 %v2635_v49  ;;  %v9673_v58 = vpop.f32.mrf.mxu0  ;;  %4149 = vrot.lane.b32.xlu0 %v9678_v59, %s8708_s18  ;;  %v282_v22 = vpop.f32.mrf.mxu1 }
 0x145   :  { %2707 = vmatprep.mubr.bf16.mxu0 %v8700_v1  ;;  %2771 = vmatprep.subr.bf16.mxu0 %v2638_v62  ;;  %v9686_v28 = vpop.permute.xlu1 %2622  ;;  %v2645_v22 = vsel %vm2632_vm5, %v9596_v20, %v9647_v43  ;;  %v9861_v43 = vld [vmem:[%s11713_s0 + $0x48] ss:$80 sps:$4 sm:$0xff]  }
 0x146   :  { %v240_v25 = vpop.f32.mrf.mxu0  ;;  %4147 = vrot.lane.b32.xlu1 %v9691_v27, %s8708_s18  ;;  %2748 = vmatprep.mubr.bf16.mxu1 %v8700_v1  ;;  %v2648_v13 = vsel %vm2632_vm5, %v9686_v28, %v9652_v54  ;;  %v2647_v60 = vsel %vm2632_vm5, %v9625_v53, %v9686_v28 }
 0x147   :  { %2812 = vmatprep.subr.bf16.mxu1 %v2640_v26  ;;  %v9843_v26 = vld [vmem:[%s11713_s0 + $0x3c] ss:$80 sps:$4 sm:$0xff]  }
 0x148   :  { %v241_v24 = vpop.f32.mrf.mxu0  ;;  %4153 = vrot.lane.b32.xlu0 %v9704_v29, %s8708_s18  ;;  %v9708_v2 = vpop.permute.xlu0 %2628 }
 0x149   :  { %v9730_v34 = vpop.permute.xlu1 %2626 }
 0x14a   :  { %v9713_v30 = vpop.f32.mrf.mxu0  ;;  %8473 = vmatmul.mubr.msk.bf16.vlgmr.msra.gmra.mxu0 %vm198_vm1, %v9699_v23  ;;  %4151 = vrot.lane.b32.xlu1 %v9723_v32, %s8708_s18  ;;  %v2650_v53 = vsel %vm2632_vm5, %v9730_v34, %v9708_v2 }
 0x14b   :  { %2772 = vmatpush1.bf16.msra.mxu0 %v2637_v31  ;;  %v9732_v4 = vpop.f32.mrf.mxu1  ;;  %8474 = vmatmul.mubr.msk.bf16.vlgmr.msra.gmra.mxu1 %vm198_vm1, %v9699_v23 }
 0x14c   :  { %2813 = vmatpush1.bf16.msra.mxu1 %v2639_v33  ;;  %v9736_v6 = vpop.f32.mrf.mxu0  ;;  %4157 = vrot.lane.b32.xlu0 %v9741_v38, %s8708_s18  ;;  %v9748_v8 = vpop.permute.xlu0 %3109 }
 0x14d   :  { %v9750_v40 = vpop.f32.mrf.mxu1  ;;  %2789 = vmatprep.mubr.bf16.mxu0 %v8700_v1  ;;  %2853 = vmatprep.subr.bf16.mxu0 %v2642_v0  ;;  %v9873_v0 = vld [vmem:[%s11713_s0 + $0x44] ss:$80 sps:$4 sm:$0xff]  }
 0x14e   :  { %v322_v37 = vpop.f32.mrf.mxu0  ;;  %4155 = vrot.lane.b32.xlu1 %v9756_v5, %s8708_s18  ;;  %2830 = vmatprep.mubr.bf16.mxu1 %v8700_v1 }
 0x14f   :  { %v363_v10 = vpop.f32.mrf.mxu1  ;;  %2894 = vmatprep.subr.bf16.mxu1 %v2644_v3 }
 0x150   :  { %v323_v39 = vpop.f32.mrf.mxu0  ;;  %4161 = vrot.lane.b32.xlu0 %v9764_v35, %s8708_s18  ;;  %v9768_v36 = vpop.permute.xlu1 %2630 }
 0x151   :  { %v364_v7 = vpop.f32.mrf.mxu1  ;;  %v9790_v11 = vpop.permute.xlu0 %3113 }
 0x152   :  { %v9773_v44 = vpop.f32.mrf.mxu0  ;;  %8475 = vmatmul.mubr.msk.bf16.vlgmr.msra.gmra.mxu0 %vm198_vm1, %v9699_v23  ;;  %4159 = vrot.lane.b32.xlu1 %v9783_v14, %s8708_s18  ;;  %v2651_v7 = vsel %vm2632_vm5, %v9708_v2, %v9768_v36 }
 0x153   :  { %2854 = vmatpush1.bf16.msra.mxu0 %v2641_v9  ;;  %v9792_v16 = vpop.f32.mrf.mxu1  ;;  %8476 = vmatmul.mubr.msk.bf16.vlgmr.msra.gmra.mxu1 %vm198_vm1, %v9699_v23  ;;  %v2649_v9 = vsel %vm2632_vm5, %v9652_v54, %v9730_v34 }
 0x154   :  { %2895 = vmatpush1.bf16.msra.mxu1 %v2643_v12  ;;  %v9796_v47 = vpop.f32.mrf.mxu0  ;;  %4165 = vrot.lane.b32.xlu0 %v9801_v48, %s8708_s18  ;;  %v9808_v18 = vpop.permute.xlu1 %3111 }
 0x155   :  { %v9810_v41 = vpop.f32.mrf.mxu1  ;;  %2871 = vmatprep.mubr.bf16.mxu0 %v8700_v1  ;;  %2935 = vmatprep.subr.bf16.mxu0 %v2646_v46  ;;  %v9896_v46 = vld [vmem:[%s11713_s0 + $0x4c] ss:$80 sps:$4 sm:$0xff]   ;;  %v3149_v2 = vsel %vm3147_vm6, %v9748_v8, %v9808_v18 }
 0x156   :  { %v404_v17 = vpop.f32.mrf.mxu0  ;;  %4163 = vrot.lane.b32.xlu1 %v9816_v42, %s8708_s18  ;;  %2912 = vmatprep.mubr.bf16.mxu1 %v8700_v1 }
 0x157   :  { %v445_v45 = vpop.f32.mrf.mxu1  ;;  %2976 = vmatprep.subr.bf16.mxu1 %v2648_v13 }
 0x158   :  { %v405_v50 = vpop.f32.mrf.mxu0  ;;  %4169 = vrot.lane.b32.xlu0 %v9824_v19, %s8708_s18  ;;  %v9828_v49 = vpop.permute.xlu0 %3107 }
 0x159   :  { %v446_v61 = vpop.f32.mrf.mxu1  ;;  %v9850_v28 = vpop.permute.xlu1 %3115 }
 0x15a   :  { %v9833_v62 = vpop.f32.mrf.mxu0  ;;  %8477 = vmatmul.mubr.msk.bf16.vlgmr.msra.gmra.mxu0 %vm198_vm1, %v9699_v23  ;;  %4167 = vrot.lane.b32.xlu1 %v9843_v26, %s8708_s18  ;;  %v3151_v34 = vsel %vm3147_vm6, %v9790_v11, %v9850_v28 }
 0x15b   :  { %2936 = vmatpush1.bf16.msra.mxu0 %v2645_v22  ;;  %v9852_v25 = vpop.f32.mrf.mxu1  ;;  %8478 = vmatmul.mubr.msk.bf16.vlgmr.msra.gmra.mxu1 %vm198_vm1, %v9699_v23 }
 0x15c   :  { %2977 = vmatpush1.bf16.msra.mxu1 %v2647_v60  ;;  %v9856_v20 = vpop.f32.mrf.mxu0  ;;  %4173 = vrot.lane.b32.xlu0 %v9861_v43, %s8708_s18  ;;  %v9865_v24 = vpop.permute.xlu0 %3119 }
 0x15d   :  { %v9867_v33 = vpop.f32.mrf.mxu1  ;;  %2953 = vmatprep.mubr.bf16.mxu0 %v8700_v1  ;;  %3017 = vmatprep.subr.bf16.mxu0 %v2650_v53 }
 0x15e   :  { %v486_v31 = vpop.f32.mrf.mxu0  ;;  %4171 = vrot.lane.b32.xlu1 %v9873_v0, %s8708_s18  ;;  %2994 = vmatprep.mubr.bf16.mxu1 %v8700_v1 }
 0x15f   :  { %v527_v3 = vpop.f32.mrf.mxu1  ;;  %3058 = vmatprep.subr.bf16.mxu1 %v9768_v36  ;;  %v3150_v31 = vsel %vm3147_vm6, %v9808_v18, %v9790_v11 }
 0x160   :  { %v487_v37 = vpop.f32.mrf.mxu0  ;;  %4654 = vrot.lane.b32.xlu0 %v9592_v15, %s8709_s30  ;;  %v9881_v10 = vpop.permute.xlu1 %3117  ;;  %v3148_v3 = vsel %vm3147_vm6, %v9828_v49, %v9748_v8 }
 0x161   :  { %v528_v39 = vpop.f32.mrf.mxu1  ;;  %v9903_v36 = vpop.permute.xlu0 %3123 }
 0x162   :  { %v9886_v12 = vpop.f32.mrf.mxu0  ;;  %8479 = vmatmul.mubr.msk.bf16.vlgmr.msra.gmra.mxu0 %vm198_vm1, %v9699_v23  ;;  %4175 = vrot.lane.b32.xlu1 %v9896_v46, %s8708_s18  ;;  %v3153_v39 = vsel %vm3147_vm6, %v9881_v10, %v9865_v24 }
 0x163   :  { %3018 = vmatpush1.bf16.msra.mxu0 %v2649_v9  ;;  %v9905_v13 = vpop.f32.mrf.mxu1  ;;  %8480 = vmatmul.mubr.msk.bf16.vlgmr.msra.gmra.mxu1 %vm198_vm1, %v9699_v23 }
 0x164   :  { %3059 = vmatpush1.bf16.msra.mxu1 %v2651_v7  ;;  %v9909_v54 = vpop.f32.mrf.mxu0  ;;  %4658 = vrot.lane.b32.xlu0 %v9618_v51, %s8709_s30  ;;  %v3122_v17 = vpop.permute.xlu1 %3121 }
 0x165   :  { %v9916_v45 = vpop.f32.mrf.mxu1  ;;  %3204 = vmatprep.subr.bf16.mxu0 %v3149_v2  ;;  %3035 = vmatprep.mubr.bf16.mxu0 %v8700_v1  ;;  %v3155_v49 = vsel %vm3147_vm6, %v3122_v17, %v9903_v36 }
 0x166   :  { %v568_v50 = vpop.f32.mrf.mxu0  ;;  %4656 = vrot.lane.b32.xlu1 %v9631_v55, %s8709_s30  ;;  %3076 = vmatprep.mubr.bf16.mxu1 %v8700_v1 }
 0x167   :  { %v609_v61 = vpop.f32.mrf.mxu1  ;;  %3245 = vmatprep.subr.bf16.mxu1 %v3151_v34 }
 0x168   :  { %v569_v60 = vpop.f32.mrf.mxu0  ;;  %4652 = vrot.lane.b32.xlu0 %v9641_v57, %s8709_s30  ;;  %v9924_v22 = vpop.permute.xlu0 %3127  ;;  %v9966_v61 = vld [vmem:[%s11714_s1 + $0x18] sm:$0xf] }
 0x169   :  { %v610_v53 = vpop.f32.mrf.mxu1  ;;  %v3126_v7 = vpop.permute.xlu1 %3125 }
 0x16a   :  { %v669_v37 = vpop.f32.mrf.mxu0  ;;  %8481 = vmatmul.mubr.msk.bf16.vlgmr.msra.gmra.mxu0 %vm198_vm1, %v9699_v23  ;;  %4660 = vrot.lane.b32.xlu1 %v9664_v21, %s8709_s30  ;;  %v3154_v53 = vsel %vm3147_vm6, %v9865_v24, %v3122_v17 }
 0x16b   :  { %v9940_v9 = vadd.f32 %v669_v37, %v9657_v63  ;;  %3205 = vmatpush1.bf16.msra.mxu0 %v3148_v3  ;;  %v710_v11 = vpop.f32.mrf.mxu1  ;;  %8482 = vmatmul.mubr.msk.bf16.vlgmr.msra.gmra.mxu1 %vm198_vm1, %v9699_v23  ;;  %v3152_v3 = vsel %vm3147_vm6, %v9850_v28, %v9881_v10  ;;  %v3157_v37 = vsel %vm3147_vm6, %v3126_v7, %v9924_v22 }
 0x16c   :  { %v9945_v8 = vadd.f32 %v710_v11, %v9635_v56  ;;  %3246 = vmatpush1.bf16.msra.mxu1 %v3150_v31  ;;  %v671_v18 = vpop.f32.mrf.mxu0  ;;  %4664 = vrot.lane.b32.xlu0 %v9678_v59, %s8709_s30  ;;  %v9951_v2 = vpop.permute.xlu0 %3131 }
 0x16d   :  { %v9954_v63 = vadd.f32 %v671_v18, %v9673_v58  ;;  %v712_v34 = vpop.f32.mrf.mxu1  ;;  %3222 = vmatprep.mubr.bf16.mxu0 %v8700_v1  ;;  %3286 = vmatprep.subr.bf16.mxu0 %v3153_v39 }
 0x16e   :  { %v9958_v56 = vadd.f32 %v712_v34, %v9645_v52  ;;  %v673_v23 = vpop.f32.mrf.mxu0  ;;  %4662 = vrot.lane.b32.xlu1 %v9691_v27, %s8709_s30  ;;  %3263 = vmatprep.mubr.bf16.mxu1 %v8700_v1 }
 0x16f   :  { %v714_v50 = vpop.f32.mrf.mxu1  ;;  %3327 = vmatprep.subr.bf16.mxu1 %v3155_v49 }
 0x170   :  { %v674_v58 = vpop.f32.mrf.mxu0  ;;  %4668 = vrot.lane.b32.xlu0 %v9704_v29, %s8709_s30  ;;  %v3130_v60 = vpop.permute.xlu1 %3129 }
 0x171   :  { %v715_v52 = vpop.f32.mrf.mxu1  ;;  %v3136_v39 = vpop.permute.xlu0 %3135  ;;  %v3159_v10 = vsel %vm3147_vm6, %v3130_v60, %v9951_v2 }
 0x172   :  { %v751_v31 = vpop.f32.mrf.mxu0  ;;  %8484 = vmatmul.mubr.msk.bf16.vlgmr.msra.gmra.mxu0 %vm198_vm1, %v9966_v61  ;;  %4666 = vrot.lane.b32.xlu1 %v9723_v32, %s8709_s30  ;;  %v3158_v52 = vsel %vm3147_vm6, %v9924_v22, %v3130_v60 }
 0x173   :  { %v9982_v11 = vadd.f32 %v751_v31, %v9713_v30  ;;  %3287 = vmatpush1.bf16.msra.mxu0 %v3152_v3  ;;  %v792_v24 = vpop.f32.mrf.mxu1  ;;  %8485 = vmatmul.mubr.msk.bf16.vlgmr.msra.gmra.mxu1 %vm198_vm1, %v9966_v61  ;;  %v3156_v31 = vsel %vm3147_vm6, %v9903_v36, %v3126_v7 }
 0x174   :  { %v9987_v17 = vadd.f32 %v792_v24, %v9732_v4  ;;  %3328 = vmatpush1.bf16.msra.mxu1 %v3154_v53  ;;  %v753_v28 = vpop.f32.mrf.mxu0  ;;  %4672 = vrot.lane.b32.xlu0 %v9741_v38, %s8709_s30  ;;  %v3134_v18 = vpop.permute.xlu1 %3133 }
 0x175   :  { %v9994_v30 = vadd.f32 %v753_v28, %v9736_v6  ;;  %v794_v49 = vpop.f32.mrf.mxu1  ;;  %3304 = vmatprep.mubr.bf16.mxu0 %v8700_v1  ;;  %3368 = vmatprep.subr.bf16.mxu0 %v3157_v37  ;;  %v3161_v3 = vsel %vm3147_vm6, %v3134_v18, %v3136_v39 }
 0x176   :  { %v9998_v34 = vadd.f32 %v794_v49, %v9750_v40  ;;  %v755_v4 = vpop.f32.mrf.mxu0  ;;  %4670 = vrot.lane.b32.xlu1 %v9756_v5, %s8709_s30  ;;  %3345 = vmatprep.mubr.bf16.mxu1 %v8700_v1 }
 0x177   :  { %v796_v23 = vpop.f32.mrf.mxu1  ;;  %3409 = vmatprep.subr.bf16.mxu1 %v3159_v10 }
 0x178   :  { %v756_v50 = vpop.f32.mrf.mxu0  ;;  %4676 = vrot.lane.b32.xlu0 %v9764_v35, %s8709_s30  ;;  %v10005_v6 = vpop.permute.xlu0 %3139 }
 0x179   :  { %v797_v58 = vpop.f32.mrf.mxu1  ;;  %v3138_v40 = vpop.permute.xlu1 %3137 }
 0x17a   :  { %v833_v53 = vpop.f32.mrf.mxu0  ;;  %8486 = vmatmul.mubr.msk.bf16.vlgmr.msra.gmra.mxu0 %vm198_vm1, %v9966_v61  ;;  %4674 = vrot.lane.b32.xlu1 %v9783_v14, %s8709_s30  ;;  %v3163_v7 = vsel %vm3147_vm6, %v3138_v40, %v10005_v6  ;;  %v3162_v50 = vsel %vm3147_vm6, %v3136_v39, %v3138_v40 }
 0x17b   :  { %v10017_v37 = vadd.f32 %v833_v53, %v9773_v44  ;;  %3369 = vmatpush1.bf16.msra.mxu0 %v3156_v31  ;;  %v874_v24 = vpop.f32.mrf.mxu1  ;;  %8487 = vmatmul.mubr.msk.bf16.vlgmr.msra.gmra.mxu1 %vm198_vm1, %v9966_v61 }
 0x17c   :  { %v10022_v22 = vadd.f32 %v874_v24, %v9792_v16  ;;  %3410 = vmatpush1.bf16.msra.mxu1 %v3158_v52  ;;  %v835_v60 = vpop.f32.mrf.mxu0  ;;  %4680 = vrot.lane.b32.xlu0 %v9801_v48, %s8709_s30  ;;  %v3144_v36 = vpop.permute.xlu0 %3143  ;;  %v3160_v52 = vsel %vm3147_vm6, %v9951_v2, %v3134_v18 }
 0x17d   :  { %v10029_v44 = vadd.f32 %v835_v60, %v9796_v47  ;;  %v876_v28 = vpop.f32.mrf.mxu1  ;;  %3386 = vmatprep.mubr.bf16.mxu0 %v8700_v1  ;;  %3450 = vmatprep.subr.bf16.mxu0 %v3161_v3 }
 0x17e   :  { %v10033_v10 = vadd.f32 %v876_v28, %v9810_v41  ;;  %v837_v16 = vpop.f32.mrf.mxu0  ;;  %4678 = vrot.lane.b32.xlu1 %v9816_v42, %s8709_s30  ;;  %3427 = vmatprep.mubr.bf16.mxu1 %v8700_v1 }
 0x17f   :  { %v878_v49 = vpop.f32.mrf.mxu1  ;;  %3491 = vmatprep.subr.bf16.mxu1 %v3163_v7  ;;  %v3142_v4 = vpop.permute.xlu1 %3141 }
 0x180   :  { %v838_v23 = vpop.f32.mrf.mxu0  ;;  %4684 = vrot.lane.b32.xlu0 %v9824_v19, %s8709_s30  ;;  %v3165_v53 = vsel %vm3147_vm6, %v3142_v4, %v3144_v36 }
 0x181   :  { %v879_v47 = vpop.f32.mrf.mxu1  ;;  %v10041_v58 = vpop.permute.xlu0 %3624  ;;  %v3164_v23 = vsel %vm3147_vm6, %v10005_v6, %v3142_v4 }
 0x182   :  { %v915_v41 = vpop.f32.mrf.mxu0  ;;  %8488 = vmatmul.mubr.msk.bf16.vlgmr.msra.gmra.mxu0 %vm198_vm1, %v9966_v61  ;;  %4682 = vrot.lane.b32.xlu1 %v9843_v26, %s8709_s30 }
 0x183   :  { %v10051_v31 = vadd.f32 %v915_v41, %v9833_v62  ;;  %3451 = vmatpush1.bf16.msra.mxu0 %v3160_v52  ;;  %v956_v3 = vpop.f32.mrf.mxu1  ;;  %8489 = vmatmul.mubr.msk.bf16.vlgmr.msra.gmra.mxu1 %vm198_vm1, %v9966_v61  ;;  %v3146_v39 = vpop.permute.xlu1 %3145 }
 0x184   :  { %v10056_v40 = vadd.f32 %v956_v3, %v9852_v25  ;;  %3492 = vmatpush1.bf16.msra.mxu1 %v3162_v50  ;;  %v917_v24 = vpop.f32.mrf.mxu0  ;;  %4688 = vrot.lane.b32.xlu0 %v9861_v43, %s8709_s30 }
 0x185   :  { %v10061_v2 = vadd.f32 %v917_v24, %v9856_v20  ;;  %v958_v18 = vpop.f32.mrf.mxu1  ;;  %3468 = vmatprep.mubr.bf16.mxu0 %v8700_v1  ;;  %3532 = vmatprep.subr.bf16.mxu0 %v3165_v53 }
 0x186   :  { %v10065_v62 = vadd.f32 %v958_v18, %v9867_v33  ;;  %v919_v60 = vpop.f32.mrf.mxu0  ;;  %v3629_v7 = vpop.permute.xlu0 %3628  ;;  %4686 = vrot.lane.b32.xlu1 %v9873_v0, %s8709_s30  ;;  %3509 = vmatprep.mubr.bf16.mxu1 %v8700_v1  ;;  %v3166_v33 = vsel %vm3147_vm6, %v3144_v36, %v3146_v39 }
 0x187   :  { %v960_v25 = vpop.f32.mrf.mxu1  ;;  %3573 = vmatprep.subr.bf16.mxu1 %v3146_v39 }
 0x188   :  { %v920_v28 = vpop.f32.mrf.mxu0  ;;  %5169 = vrot.lane.b32.xlu0 %v9592_v15, %s8710_s7  ;;  %v3627_v20 = vpop.permute.xlu1 %3626 }
 0x189   :  { %v961_v16 = vpop.f32.mrf.mxu1  ;;  %v3664_v50 = vsel %vm3662_vm7, %v10041_v58, %v3627_v20  ;;  %v3665_v28 = vsel %vm3662_vm7, %v3627_v20, %v3629_v7 }
 0x18a   :  { %v997_v49 = vpop.f32.mrf.mxu0  ;;  %8490 = vmatmul.mubr.msk.bf16.vlgmr.msra.gmra.mxu0 %vm198_vm1, %v9966_v61  ;;  %v3623_v47 = vpop.permute.xlu0 %3622  ;;  %4690 = vrot.lane.b32.xlu1 %v9896_v46, %s8709_s30 }
 0x18b   :  { %v10082_v41 = vadd.f32 %v997_v49, %v9886_v12  ;;  %3533 = vmatpush1.bf16.msra.mxu0 %v3164_v23  ;;  %v1038_v52 = vpop.f32.mrf.mxu1  ;;  %8491 = vmatmul.mubr.msk.bf16.vlgmr.msra.gmra.mxu1 %vm198_vm1, %v9966_v61 }
 0x18c   :  { %v10087_v36 = vadd.f32 %v1038_v52, %v9905_v13  ;;  %3574 = vmatpush1.bf16.msra.mxu1 %v3166_v33  ;;  %v999_v6 = vpop.f32.mrf.mxu0  ;;  %5173 = vrot.lane.b32.xlu0 %v9618_v51, %s8710_s7  ;;  %v3631_v4 = vpop.permute.xlu1 %3630 }
 0x18d   :  { %v10092_v53 = vadd.f32 %v999_v6, %v9909_v54  ;;  %v1040_v3 = vpop.f32.mrf.mxu1  ;;  %3719 = vmatprep.subr.bf16.mxu0 %v3664_v50  ;;  %3550 = vmatprep.mubr.bf16.mxu0 %v8700_v1  ;;  %v3666_v12 = vsel %vm3662_vm7, %v3629_v7, %v3631_v4 }
 0x18e   :  { %v10097_v39 = vadd.f32 %v1040_v3, %v9916_v45  ;;  %v1001_v13 = vpop.f32.mrf.mxu0  ;;  %v3635_v24 = vpop.permute.xlu0 %3634  ;;  %5171 = vrot.lane.b32.xlu1 %v9631_v55, %s8710_s7  ;;  %3591 = vmatprep.mubr.bf16.mxu1 %v8700_v1  ;;  %v3663_v45 = vsel %vm3662_vm7, %v3623_v47, %v10041_v58 }
 0x18f   :  { %v1042_v18 = vpop.f32.mrf.mxu1  ;;  %3760 = vmatprep.subr.bf16.mxu1 %v3666_v12 }
 0x190   :  { %v1002_v54 = vpop.f32.mrf.mxu0  ;;  %5167 = vrot.lane.b32.xlu0 %v9641_v57, %s8710_s7  ;;  %v3633_v60 = vpop.permute.xlu1 %3632 }
 0x191   :  { %v1043_v25 = vpop.f32.mrf.mxu1  ;;  %v3668_v49 = vsel %vm3662_vm7, %v3633_v60, %v3635_v24 }
 0x192   :  { %v1164_v16 = vpop.f32.mrf.mxu0  ;;  %8492 = vmatmul.mubr.msk.bf16.vlgmr.msra.gmra.mxu0 %vm198_vm1, %v9966_v61  ;;  %v10109_v33 = vpop.permute.xlu0 %3638  ;;  %5175 = vrot.lane.b32.xlu1 %v9664_v21, %s8710_s7  ;;  %v3667_v25 = vsel %vm3662_vm7, %v3631_v4, %v3633_v60 }
 0x193   :  { %v10115_v23 = vadd.f32 %v1164_v16, %v9940_v9  ;;  %3720 = vmatpush1.bf16.msra.mxu0 %v3663_v45  ;;  %v1205_v50 = vpop.f32.mrf.mxu1  ;;  %8493 = vmatmul.mubr.msk.bf16.vlgmr.msra.gmra.mxu1 %vm198_vm1, %v9966_v61 }
 0x194   :  { %v10120_v58 = vadd.f32 %v1205_v50, %v9945_v8  ;;  %3761 = vmatpush1.bf16.msra.mxu1 %v3665_v28  ;;  %v1166_v7 = vpop.f32.mrf.mxu0  ;;  %5179 = vrot.lane.b32.xlu0 %v9678_v59, %s8710_s7  ;;  %v3637_v20 = vpop.permute.xlu1 %3636 }
 0x195   :  { %v10125_v47 = vadd.f32 %v1166_v7, %v9954_v63  ;;  %v1207_v52 = vpop.f32.mrf.mxu1  ;;  %3737 = vmatprep.mubr.bf16.mxu0 %v8700_v1  ;;  %3801 = vmatprep.subr.bf16.mxu0 %v3668_v49  ;;  %v3670_v9 = vsel %vm3662_vm7, %v3637_v20, %v10109_v33  ;;  %v10139_v63 = vld [vmem:[%s11714_s1 + $0x1c] sm:$0xf]  ;;  %v3669_v18 = vsel %vm3662_vm7, %v3635_v24, %v3637_v20 }
 0x196   :  { %v10131_v61 = vadd.f32 %v1207_v52, %v9958_v56  ;;  %v1168_v8 = vpop.f32.mrf.mxu0  ;;  %v3643_v6 = vpop.permute.xlu0 %3642  ;;  %5177 = vrot.lane.b32.xlu1 %v9691_v27, %s8710_s7  ;;  %3778 = vmatprep.mubr.bf16.mxu1 %v8700_v1 }
 0x197   :  { %v1209_v3 = vpop.f32.mrf.mxu1  ;;  %3842 = vmatprep.subr.bf16.mxu1 %v3670_v9 }
 0x198   :  { %v1169_v12 = vpop.f32.mrf.mxu0  ;;  %5183 = vrot.lane.b32.xlu0 %v9704_v29, %s8710_s7  ;;  %v3641_v56 = vpop.permute.xlu1 %3640 }
 0x199   :  { %v1210_v13 = vpop.f32.mrf.mxu1  ;;  %v3672_v45 = vsel %vm3662_vm7, %v3641_v56, %v3643_v6 }
 0x19a   :  { %v1246_v54 = vpop.f32.mrf.mxu0  ;;  %8495 = vmatmul.mubr.msk.bf16.vlgmr.msra.gmra.mxu0 %vm198_vm1, %v10139_v63  ;;  %v10147_v28 = vpop.permute.xlu0 %3646  ;;  %5181 = vrot.lane.b32.xlu1 %v9723_v32, %s8710_s7 }
 0x19b   :  { %v10153_v16 = vadd.f32 %v1246_v54, %v9982_v11  ;;  %3802 = vmatpush1.bf16.msra.mxu0 %v3667_v25  ;;  %v1287_v49 = vpop.f32.mrf.mxu1  ;;  %8496 = vmatmul.mubr.msk.bf16.vlgmr.msra.gmra.mxu1 %vm198_vm1, %v10139_v63 }
 0x19c   :  { %v10158_v24 = vadd.f32 %v1287_v49, %v9987_v17  ;;  %3843 = vmatpush1.bf16.msra.mxu1 %v3669_v18  ;;  %v1248_v4 = vpop.f32.mrf.mxu0  ;;  %5187 = vrot.lane.b32.xlu0 %v9741_v38, %s8710_s7  ;;  %v3645_v60 = vpop.permute.xlu1 %3644 }
 0x19d   :  { %v10163_v50 = vadd.f32 %v1248_v4, %v9994_v30  ;;  %v1289_v7 = vpop.f32.mrf.mxu1  ;;  %3819 = vmatprep.mubr.bf16.mxu0 %v8700_v1  ;;  %3883 = vmatprep.subr.bf16.mxu0 %v3672_v45  ;;  %v3674_v11 = vsel %vm3662_vm7, %v3645_v60, %v10147_v28  ;;  %v3673_v12 = vsel %vm3662_vm7, %v3643_v6, %v3645_v60 }
 0x19e   :  { %v10169_v20 = vadd.f32 %v1289_v7, %v9998_v34  ;;  %v1250_v17 = vpop.f32.mrf.mxu0  ;;  %v3651_v52 = vpop.permute.xlu0 %3650  ;;  %5185 = vrot.lane.b32.xlu1 %v9756_v5, %s8710_s7  ;;  %3860 = vmatprep.mubr.bf16.mxu1 %v8700_v1  ;;  %v3671_v34 = vsel %vm3662_vm7, %v10109_v33, %v3641_v56 }
 0x19f   :  { %v1291_v9 = vpop.f32.mrf.mxu1  ;;  %3924 = vmatprep.subr.bf16.mxu1 %v3674_v11 }
 0x1a0   :  { %v1251_v30 = vpop.f32.mrf.mxu0  ;;  %5191 = vrot.lane.b32.xlu0 %v9764_v35, %s8710_s7  ;;  %v3649_v8 = vpop.permute.xlu1 %3648 }
 0x1a1   :  { %v1292_v3 = vpop.f32.mrf.mxu1  ;;  %v3676_v54 = vsel %vm3662_vm7, %v3649_v8, %v3651_v52 }
 0x1a2   :  { %v1328_v13 = vpop.f32.mrf.mxu0  ;;  %8497 = vmatmul.mubr.msk.bf16.vlgmr.msra.gmra.mxu0 %vm198_vm1, %v10139_v63  ;;  %v10181_v18 = vpop.permute.xlu0 %3654  ;;  %5189 = vrot.lane.b32.xlu1 %v9783_v14, %s8710_s7 }
 0x1a3   :  { %v10187_v25 = vadd.f32 %v1328_v13, %v10017_v37  ;;  %3884 = vmatpush1.bf16.msra.mxu0 %v3671_v34  ;;  %v1369_v45 = vpop.f32.mrf.mxu1  ;;  %8498 = vmatmul.mubr.msk.bf16.vlgmr.msra.gmra.mxu1 %vm198_vm1, %v10139_v63 }
 0x1a4   :  { %v10192_v6 = vadd.f32 %v1369_v45, %v10022_v22  ;;  %3925 = vmatpush1.bf16.msra.mxu1 %v3673_v12  ;;  %v1330_v33 = vpop.f32.mrf.mxu0  ;;  %5195 = vrot.lane.b32.xlu0 %v9801_v48, %s8710_s7  ;;  %v3653_v56 = vpop.permute.xlu1 %3652 }
 0x1a5   :  { %v10197_v49 = vadd.f32 %v1330_v33, %v10029_v44  ;;  %v1371_v4 = vpop.f32.mrf.mxu1  ;;  %3901 = vmatprep.mubr.bf16.mxu0 %v8700_v1  ;;  %3965 = vmatprep.subr.bf16.mxu0 %v3676_v54  ;;  %v3678_v37 = vsel %vm3662_vm7, %v3653_v56, %v10181_v18  ;;  %v3677_v30 = vsel %vm3662_vm7, %v3651_v52, %v3653_v56 }
 0x1a6   :  { %v10203_v60 = vadd.f32 %v1371_v4, %v10033_v10  ;;  %v1332_v22 = vpop.f32.mrf.mxu0  ;;  %v3659_v7 = vpop.permute.xlu0 %3658  ;;  %5193 = vrot.lane.b32.xlu1 %v9816_v42, %s8710_s7  ;;  %3942 = vmatprep.mubr.bf16.mxu1 %v8700_v1  ;;  %v3675_v10 = vsel %vm3662_vm7, %v10147_v28, %v3649_v8 }
 0x1a7   :  { %v1373_v11 = vpop.f32.mrf.mxu1  ;;  %4006 = vmatprep.subr.bf16.mxu1 %v3678_v37 }
 0x1a8   :  { %v1333_v44 = vpop.f32.mrf.mxu0  ;;  %5199 = vrot.lane.b32.xlu0 %v9824_v19, %s8710_s7  ;;  %v3657_v17 = vpop.permute.xlu1 %3656 }
 0x1a9   :  { %v1374_v9 = vpop.f32.mrf.mxu1  ;;  %v3680_v13 = vsel %vm3662_vm7, %v3657_v17, %v3659_v7  ;;  %v3679_v44 = vsel %vm3662_vm7, %v10181_v18, %v3657_v17 }
 0x1aa   :  { %v1410_v3 = vpop.f32.mrf.mxu0  ;;  %8499 = vmatmul.mubr.msk.bf16.vlgmr.msra.gmra.mxu0 %vm198_vm1, %v10139_v63  ;;  %v10215_v12 = vpop.permute.xlu0 %4139  ;;  %5197 = vrot.lane.b32.xlu1 %v9843_v26, %s8710_s7 }
 0x1ab   :  { %v10221_v34 = vadd.f32 %v1410_v3, %v10051_v31  ;;  %3966 = vmatpush1.bf16.msra.mxu0 %v3675_v10  ;;  %v1451_v54 = vpop.f32.mrf.mxu1  ;;  %8500 = vmatmul.mubr.msk.bf16.vlgmr.msra.gmra.mxu1 %vm198_vm1, %v10139_v63 }
 0x1ac   :  { %v10226_v52 = vadd.f32 %v1451_v54, %v10056_v40  ;;  %4007 = vmatpush1.bf16.msra.mxu1 %v3677_v30  ;;  %v1412_v28 = vpop.f32.mrf.mxu0  ;;  %5203 = vrot.lane.b32.xlu0 %v9861_v43, %s8710_s7  ;;  %v3661_v8 = vpop.permute.xlu1 %3660 }
 0x1ad   :  { %v10231_v45 = vadd.f32 %v1412_v28, %v10061_v2  ;;  %v1453_v33 = vpop.f32.mrf.mxu1  ;;  %3983 = vmatprep.mubr.bf16.mxu0 %v8700_v1  ;;  %4047 = vmatprep.subr.bf16.mxu0 %v3680_v13 }
 0x1ae   :  { %v10235_v31 = vadd.f32 %v1453_v33, %v10065_v62  ;;  %v1414_v56 = vpop.f32.mrf.mxu0  ;;  %v4144_v4 = vpop.permute.xlu0 %4143  ;;  %5201 = vrot.lane.b32.xlu1 %v9873_v0, %s8710_s7  ;;  %4024 = vmatprep.mubr.bf16.mxu1 %v8700_v1  ;;  %v3681_v62 = vsel %vm3662_vm7, %v3659_v7, %v3661_v8 }
 0x1af   :  { %v1455_v40 = vpop.f32.mrf.mxu1  ;;  %4088 = vmatprep.subr.bf16.mxu1 %v3661_v8 }
 0x1b0   :  { %v1415_v37 = vpop.f32.mrf.mxu0  ;;  %5684 = vrot.lane.b32.xlu0 %v9592_v15, %s8711_s10  ;;  %v4142_v2 = vpop.permute.xlu1 %4141 }
 0x1b1   :  { %v1456_v22 = vpop.f32.mrf.mxu1  ;;  %v4179_v30 = vsel %vm4177_vm8, %v10215_v12, %v4142_v2  ;;  %v4180_v56 = vsel %vm4177_vm8, %v4142_v2, %v4144_v4 }
 0x1b2   :  { %v1492_v11 = vpop.f32.mrf.mxu0  ;;  %8501 = vmatmul.mubr.msk.bf16.vlgmr.msra.gmra.mxu0 %vm198_vm1, %v10139_v63  ;;  %v4138_v9 = vpop.permute.xlu0 %4137  ;;  %5205 = vrot.lane.b32.xlu1 %v9896_v46, %s8710_s7  ;;  %s8715_s7 = smov 20  }
 0x1b3   :  { %v10252_v15 = vadd.f32 %v1492_v11, %v10082_v41  ;;  %4048 = vmatpush1.bf16.msra.mxu0 %v3679_v44  ;;  %v1533_v3 = vpop.f32.mrf.mxu1  ;;  %8502 = vmatmul.mubr.msk.bf16.vlgmr.msra.gmra.mxu1 %vm198_vm1, %v10139_v63 }
 0x1b4   :  { %v10257_v7 = vadd.f32 %v1533_v3, %v10087_v36  ;;  %4089 = vmatpush1.bf16.msra.mxu1 %v3681_v62  ;;  %v1494_v18 = vpop.f32.mrf.mxu0  ;;  %5688 = vrot.lane.b32.xlu0 %v9618_v51, %s8711_s10  ;;  %v4146_v17 = vpop.permute.xlu1 %4145 }
 0x1b5   :  { %v10262_v10 = vadd.f32 %v1494_v18, %v10092_v53  ;;  %v1535_v13 = vpop.f32.mrf.mxu1  ;;  %4234 = vmatprep.subr.bf16.mxu0 %v4179_v30  ;;  %4065 = vmatprep.mubr.bf16.mxu0 %v8700_v1  ;;  %v4181_v41 = vsel %vm4177_vm8, %v4144_v4, %v4146_v17 }
 0x1b6   :  { %v10267_v54 = vadd.f32 %v1535_v13, %v10097_v39  ;;  %v1496_v36 = vpop.f32.mrf.mxu0  ;;  %v4150_v28 = vpop.permute.xlu0 %4149  ;;  %5686 = vrot.lane.b32.xlu1 %v9631_v55, %s8711_s10  ;;  %4106 = vmatprep.mubr.bf16.mxu1 %v8700_v1  ;;  %v4178_v39 = vsel %vm4177_vm8, %v4138_v9, %v10215_v12 }
 0x1b7   :  { %v1537_v51 = vpop.f32.mrf.mxu1  ;;  %4275 = vmatprep.subr.bf16.mxu1 %v4181_v41 }
 0x1b8   :  { %v1497_v53 = vpop.f32.mrf.mxu0  ;;  %5682 = vrot.lane.b32.xlu0 %v9641_v57, %s8711_s10  ;;  %v4148_v8 = vpop.permute.xlu1 %4147 }
 0x1b9   :  { %v1538_v33 = vpop.f32.mrf.mxu1  ;;  %v4183_v37 = vsel %vm4177_vm8, %v4148_v8, %v4150_v28 }
 0x1ba   :  { %v1679_v40 = vpop.f32.mrf.mxu0  ;;  %8503 = vmatmul.mubr.msk.bf16.vlgmr.msra.gmra.mxu0 %vm198_vm1, %v10139_v63  ;;  %v10279_v55 = vpop.permute.xlu0 %4153  ;;  %5690 = vrot.lane.b32.xlu1 %v9664_v21, %s8711_s10 }
 0x1bb   :  { %v10285_v57 = vadd.f32 %v1679_v40, %v10115_v23  ;;  %4235 = vmatpush1.bf16.msra.mxu0 %v4178_v39  ;;  %v1720_v22 = vpop.f32.mrf.mxu1  ;;  %8504 = vmatmul.mubr.msk.bf16.vlgmr.msra.gmra.mxu1 %vm198_vm1, %v10139_v63 }
 0x1bc   :  { %v10290_v12 = vadd.f32 %v1720_v22, %v10120_v58  ;;  %4276 = vmatpush1.bf16.msra.mxu1 %v4180_v56  ;;  %v1681_v4 = vpop.f32.mrf.mxu0  ;;  %5694 = vrot.lane.b32.xlu0 %v9678_v59, %s8711_s10  ;;  %v4152_v2 = vpop.permute.xlu1 %4151 }
 0x1bd   :  { %v10295_v21 = vadd.f32 %v1681_v4, %v10125_v47  ;;  %v1722_v62 = vpop.f32.mrf.mxu1  ;;  %4252 = vmatprep.mubr.bf16.mxu0 %v8700_v1  ;;  %4316 = vmatprep.subr.bf16.mxu0 %v4183_v37  ;;  %v4185_v23 = vsel %vm4177_vm8, %v4152_v2, %v10279_v55  ;;  %v10309_v47 = vld [vmem:[%s11714_s1 + $0x20] sm:$0xf]  ;;  %v4184_v30 = vsel %vm4177_vm8, %v4150_v28, %v4152_v2 }
 0x1be   :  { %v10301_v63 = vadd.f32 %v1722_v62, %v10131_v61  ;;  %v1683_v58 = vpop.f32.mrf.mxu0  ;;  %v4158_v11 = vpop.permute.xlu0 %4157  ;;  %5692 = vrot.lane.b32.xlu1 %v9691_v27, %s8711_s10  ;;  %4293 = vmatprep.mubr.bf16.mxu1 %v8700_v1  ;;  %v4182_v27 = vsel %vm4177_vm8, %v4146_v17, %v4148_v8 }
 0x1bf   :  { %v1724_v59 = vpop.f32.mrf.mxu1  ;;  %4357 = vmatprep.subr.bf16.mxu1 %v4185_v23 }
 0x1c0   :  { %v1684_v44 = vpop.f32.mrf.mxu0  ;;  %5698 = vrot.lane.b32.xlu0 %v9704_v29, %s8711_s10  ;;  %v4156_v61 = vpop.permute.xlu1 %4155 }
 0x1c1   :  { %v1725_v9 = vpop.f32.mrf.mxu1  ;;  %v4187_v13 = vsel %vm4177_vm8, %v4156_v61, %v4158_v11 }
 0x1c2   :  { %v1761_v3 = vpop.f32.mrf.mxu0  ;;  %8506 = vmatmul.mubr.msk.bf16.vlgmr.msra.gmra.mxu0 %vm198_vm1, %v10309_v47  ;;  %v10317_v18 = vpop.permute.xlu0 %4161  ;;  %5696 = vrot.lane.b32.xlu1 %v9723_v32, %s8711_s10 }
 0x1c3   :  { %v10323_v41 = vadd.f32 %v1761_v3, %v10153_v16  ;;  %4317 = vmatpush1.bf16.msra.mxu0 %v4182_v27  ;;  %v1802_v29 = vpop.f32.mrf.mxu1  ;;  %8507 = vmatmul.mubr.msk.bf16.vlgmr.msra.gmra.mxu1 %vm198_vm1, %v10309_v47 }
 0x1c4   :  { %v10328_v36 = vadd.f32 %v1802_v29, %v10158_v24  ;;  %4358 = vmatpush1.bf16.msra.mxu1 %v4184_v30  ;;  %v1763_v17 = vpop.f32.mrf.mxu0  ;;  %5702 = vrot.lane.b32.xlu0 %v9741_v38, %s8711_s10  ;;  %v4160_v28 = vpop.permute.xlu1 %4159 }
 0x1c5   :  { %v10333_v32 = vadd.f32 %v1763_v17, %v10163_v50  ;;  %v1804_v51 = vpop.f32.mrf.mxu1  ;;  %4334 = vmatprep.mubr.bf16.mxu0 %v8700_v1  ;;  %4398 = vmatprep.subr.bf16.mxu0 %v4187_v13  ;;  %v4189_v16 = vsel %vm4177_vm8, %v4160_v28, %v10317_v18  ;;  %v4188_v39 = vsel %vm4177_vm8, %v4158_v11, %v4160_v28 }
 0x1c6   :  { %v10339_v53 = vadd.f32 %v1804_v51, %v10169_v20  ;;  %v1765_v24 = vpop.f32.mrf.mxu0  ;;  %v4166_v8 = vpop.permute.xlu0 %4165  ;;  %5700 = vrot.lane.b32.xlu1 %v9756_v5, %s8711_s10  ;;  %4375 = vmatprep.mubr.bf16.mxu1 %v8700_v1  ;;  %v4186_v20 = vsel %vm4177_vm8, %v10279_v55, %v4156_v61 }
 0x1c7   :  { %v1806_v38 = vpop.f32.mrf.mxu1  ;;  %4439 = vmatprep.subr.bf16.mxu1 %v4189_v16 }
 0x1c8   :  { %v1766_v50 = vpop.f32.mrf.mxu0  ;;  %5706 = vrot.lane.b32.xlu0 %v9764_v35, %s8711_s10  ;;  %v4164_v33 = vpop.permute.xlu1 %4163 }
 0x1c9   :  { %v1807_v56 = vpop.f32.mrf.mxu1  ;;  %v4191_v37 = vsel %vm4177_vm8, %v4164_v33, %v4166_v8 }
 0x1ca   :  { %v1843_v40 = vpop.f32.mrf.mxu0  ;;  %8508 = vmatmul.mubr.msk.bf16.vlgmr.msra.gmra.mxu0 %vm198_vm1, %v10309_v47  ;;  %v10351_v5 = vpop.permute.xlu0 %4169  ;;  %5704 = vrot.lane.b32.xlu1 %v9783_v14, %s8711_s10 }
 0x1cb   :  { %v10357_v35 = vadd.f32 %v1843_v40, %v10187_v25  ;;  %4399 = vmatpush1.bf16.msra.mxu0 %v4186_v20  ;;  %v1884_v22 = vpop.f32.mrf.mxu1  ;;  %8509 = vmatmul.mubr.msk.bf16.vlgmr.msra.gmra.mxu1 %vm198_vm1, %v10309_v47 }
 0x1cc   :  { %v10362_v4 = vadd.f32 %v1884_v22, %v10192_v6  ;;  %4440 = vmatpush1.bf16.msra.mxu1 %v4188_v39  ;;  %v1845_v55 = vpop.f32.mrf.mxu0  ;;  %5710 = vrot.lane.b32.xlu0 %v9801_v48, %s8711_s10  ;;  %v4168_v2 = vpop.permute.xlu1 %4167  ;;  %v10452_v22 = vld [vmem:[%s11713_s0 + $0x8] ss:$80 sps:$4 sm:$0xff]  }
 0x1cd   :  { %v10367_v14 = vadd.f32 %v1845_v55, %v10197_v49  ;;  %v1886_v62 = vpop.f32.mrf.mxu1  ;;  %4416 = vmatprep.mubr.bf16.mxu0 %v8700_v1  ;;  %4480 = vmatprep.subr.bf16.mxu0 %v4191_v37  ;;  %v4193_v25 = vsel %vm4177_vm8, %v4168_v2, %v10351_v5  ;;  %v4192_v44 = vsel %vm4177_vm8, %v4166_v8, %v4168_v2 }
 0x1ce   :  { %v10373_v23 = vadd.f32 %v1886_v62, %v10203_v60  ;;  %v1847_v6 = vpop.f32.mrf.mxu0  ;;  %v4174_v58 = vpop.permute.xlu0 %4173  ;;  %5708 = vrot.lane.b32.xlu1 %v9816_v42, %s8711_s10  ;;  %4457 = vmatprep.mubr.bf16.mxu1 %v8700_v1  ;;  %v4190_v60 = vsel %vm4177_vm8, %v10317_v18, %v4164_v33 }
 0x1cf   :  { %v1888_v48 = vpop.f32.mrf.mxu1  ;;  %4521 = vmatprep.subr.bf16.mxu1 %v4193_v25 }
 0x1d0   :  { %v1848_v49 = vpop.f32.mrf.mxu0  ;;  %5714 = vrot.lane.b32.xlu0 %v9824_v19, %s8711_s10  ;;  %v4172_v11 = vpop.permute.xlu1 %4171 }
 0x1d1   :  { %v1889_v59 = vpop.f32.mrf.mxu1  ;;  %v4195_v9 = vsel %vm4177_vm8, %v4172_v11, %v4174_v58  ;;  %v4194_v16 = vsel %vm4177_vm8, %v10351_v5, %v4172_v11  ;;  %v10474_v49 = vld [vmem:[%s11713_s0 + $0x10] ss:$80 sps:$4 sm:$0xff]  }
 0x1d2   :  { %v1925_v61 = vpop.f32.mrf.mxu0  ;;  %8510 = vmatmul.mubr.msk.bf16.vlgmr.msra.gmra.mxu0 %vm198_vm1, %v10309_v47  ;;  %v10385_v42 = vpop.permute.xlu0 %4654  ;;  %5712 = vrot.lane.b32.xlu1 %v9843_v26, %s8711_s10 }
 0x1d3   :  { %v10391_v19 = vadd.f32 %v1925_v61, %v10221_v34  ;;  %4481 = vmatpush1.bf16.msra.mxu0 %v4190_v60  ;;  %v1966_v30 = vpop.f32.mrf.mxu1  ;;  %8511 = vmatmul.mubr.msk.bf16.vlgmr.msra.gmra.mxu1 %vm198_vm1, %v10309_v47 }
 0x1d4   :  { %v10396_v3 = vadd.f32 %v1966_v30, %v10226_v52  ;;  %4522 = vmatpush1.bf16.msra.mxu1 %v4192_v44  ;;  %v1927_v27 = vpop.f32.mrf.mxu0  ;;  %5718 = vrot.lane.b32.xlu0 %v9861_v43, %s8711_s10  ;;  %v4176_v18 = vpop.permute.xlu1 %4175 }
 0x1d5   :  { %v10401_v26 = vadd.f32 %v1927_v27, %v10231_v45  ;;  %v1968_v13 = vpop.f32.mrf.mxu1  ;;  %4498 = vmatprep.mubr.bf16.mxu0 %v8700_v1  ;;  %4562 = vmatprep.subr.bf16.mxu0 %v4195_v9  ;;  %v10413_v45 = vld [vmem:[%s11713_s0 + $0x4] ss:$80 sps:$4 sm:$0xff]   ;;  %v4196_v51 = vsel %vm4177_vm8, %v4174_v58, %v4176_v18 }
 0x1d6   :  { %v10405_v34 = vadd.f32 %v1968_v13, %v10235_v31  ;;  %v1929_v29 = vpop.f32.mrf.mxu0  ;;  %v4659_v17 = vpop.permute.xlu0 %4658  ;;  %5716 = vrot.lane.b32.xlu1 %v9873_v0, %s8711_s10  ;;  %4539 = vmatprep.mubr.bf16.mxu1 %v8700_v1  ;;  %v10506_v13 = vld [vmem:[%s11713_s0 + $0x14] ss:$80 sps:$4 sm:$0xff]  }
 0x1d7   :  { %v1970_v52 = vpop.f32.mrf.mxu1  ;;  %4603 = vmatprep.subr.bf16.mxu1 %v4176_v18  ;;  %v10514_v29 = vld [vmem:[%s11714_s1 + $0x24] sm:$0xf] }
 0x1d8   :  { %v1930_v43 = vpop.f32.mrf.mxu0  ;;  %6199 = vrot.lane.b32.xlu0 %v10413_v45, %s8712_s15  ;;  %v4657_v31 = vpop.permute.xlu1 %4656 }
 0x1d9   :  { %v1971_v28 = vpop.f32.mrf.mxu1  ;;  %v4694_v8 = vsel %vm4692_vm9, %v10385_v42, %v4657_v31  ;;  %v4695_v25 = vsel %vm4692_vm9, %v4657_v31, %v4659_v17 }
 0x1da   :  { %v2007_v0 = vpop.f32.mrf.mxu0  ;;  %8512 = vmatmul.mubr.msk.bf16.vlgmr.msra.gmra.mxu0 %vm198_vm1, %v10309_v47  ;;  %v4653_v24 = vpop.permute.xlu0 %4652  ;;  %5720 = vrot.lane.b32.xlu1 %v9896_v46, %s8711_s10  ;;  %v10437_v46 = vld [vmem:[%s11713_s0 + $0xc] ss:$80 sps:$4 sm:$0xff]  }
 0x1db   :  { %v10427_v38 = vadd.f32 %v2007_v0, %v10252_v15  ;;  %4563 = vmatpush1.bf16.msra.mxu0 %v4194_v16  ;;  %v2048_v50 = vpop.f32.mrf.mxu1  ;;  %8513 = vmatmul.mubr.msk.bf16.vlgmr.msra.gmra.mxu1 %vm198_vm1, %v10309_v47  ;;  %v4693_v6 = vsel %vm4692_vm9, %v4653_v24, %v10385_v42  ;;  %v10490_v42 = vld [vmem:[%s11713_s0 + $0x18] ss:$80 sps:$4 sm:$0xff]   ;;  %v10532_v16 = vld [vmem:[%s11713_s0 + $0x1c] ss:$80 sps:$4 sm:$0xff]  }
 0x1dc   :  { %v10432_v33 = vadd.f32 %v2048_v50, %v10257_v7  ;;  %4604 = vmatpush1.bf16.msra.mxu1 %v4196_v51  ;;  %v2009_v56 = vpop.f32.mrf.mxu0  ;;  %6203 = vrot.lane.b32.xlu0 %v10437_v46, %s8712_s15  ;;  %v4661_v15 = vpop.permute.xlu1 %4660 }
 0x1dd   :  { %v10442_v39 = vadd.f32 %v2009_v56, %v10262_v10  ;;  %v2050_v40 = vpop.f32.mrf.mxu1  ;;  %4749 = vmatprep.subr.bf16.mxu0 %v4694_v8  ;;  %4580 = vmatprep.mubr.bf16.mxu0 %v8700_v1  ;;  %v4696_v7 = vsel %vm4692_vm9, %v4659_v17, %v4661_v15  ;;  %v10519_v17 = vld [vmem:[%s11713_s0 + $0x20] ss:$80 sps:$4 sm:$0xff]  }
 0x1de   :  { %v10447_v20 = vadd.f32 %v2050_v40, %v10267_v54  ;;  %v2011_v5 = vpop.f32.mrf.mxu0  ;;  %v4665_v37 = vpop.permute.xlu0 %4664  ;;  %6201 = vrot.lane.b32.xlu1 %v10452_v22, %s8712_s15  ;;  %4621 = vmatprep.mubr.bf16.mxu1 %v8700_v1  ;;  %v10460_v54 = vld [vmem:[%s11713_s0] ss:$80 sps:$4 sm:$0xff]   ;;  %v10548_v40 = vld [vmem:[%s11713_s0 + $0x28] ss:$80 sps:$4 sm:$0xff]  }
 0x1df   :  { %v2052_v10 = vpop.f32.mrf.mxu1  ;;  %4790 = vmatprep.subr.bf16.mxu1 %v4696_v7 }
 0x1e0   :  { %v2012_v55 = vpop.f32.mrf.mxu0  ;;  %6197 = vrot.lane.b32.xlu0 %v10460_v54, %s8712_s15  ;;  %v4663_v2 = vpop.permute.xlu1 %4662 }
 0x1e1   :  { %v2053_v62 = vpop.f32.mrf.mxu1  ;;  %v4698_v11 = vsel %vm4692_vm9, %v4663_v2, %v4665_v37  ;;  %v4697_v51 = vsel %vm4692_vm9, %v4661_v15, %v4663_v2  ;;  %v10564_v2 = vld [vmem:[%s11713_s0 + $0x24] ss:$80 sps:$4 sm:$0xff]  }
 0x1e2   :  { %v2194_v58 = vpop.f32.mrf.mxu0  ;;  %8514 = vmatmul.mubr.msk.bf16.vlgmr.msra.gmra.mxu0 %vm198_vm1, %v10309_v47  ;;  %v10469_v48 = vpop.permute.xlu0 %4668  ;;  %6205 = vrot.lane.b32.xlu1 %v10474_v49, %s8712_s15 }
 0x1e3   :  { %v10480_v59 = vadd.f32 %v2194_v58, %v10285_v57  ;;  %4750 = vmatpush1.bf16.msra.mxu0 %v4693_v6  ;;  %v2235_v44 = vpop.f32.mrf.mxu1  ;;  %8515 = vmatmul.mubr.msk.bf16.vlgmr.msra.gmra.mxu1 %vm198_vm1, %v10309_v47 }
 0x1e4   :  { %v10485_v61 = vadd.f32 %v2235_v44, %v10290_v12  ;;  %4791 = vmatpush1.bf16.msra.mxu1 %v4695_v25  ;;  %v2196_v60 = vpop.f32.mrf.mxu0  ;;  %6209 = vrot.lane.b32.xlu0 %v10490_v42, %s8712_s15  ;;  %v4667_v57 = vpop.permute.xlu1 %4666 }
 0x1e5   :  { %v10495_v9 = vadd.f32 %v2196_v60, %v10295_v21  ;;  %v2237_v30 = vpop.f32.mrf.mxu1  ;;  %4767 = vmatprep.mubr.bf16.mxu0 %v8700_v1  ;;  %4831 = vmatprep.subr.bf16.mxu0 %v4698_v11  ;;  %v4700_v12 = vsel %vm4692_vm9, %v4667_v57, %v10469_v48  ;;  %v4699_v31 = vsel %vm4692_vm9, %v4665_v37, %v4667_v57  ;;  %v10586_v57 = vld [vmem:[%s11713_s0 + $0x2c] ss:$80 sps:$4 sm:$0xff]  }
 0x1e6   :  { %v10501_v47 = vadd.f32 %v2237_v30, %v10301_v63  ;;  %v2198_v27 = vpop.f32.mrf.mxu0  ;;  %v4673_v18 = vpop.permute.xlu0 %4672  ;;  %6207 = vrot.lane.b32.xlu1 %v10506_v13, %s8712_s15  ;;  %4808 = vmatprep.mubr.bf16.mxu1 %v8700_v1 }
 0x1e7   :  { %v2239_v21 = vpop.f32.mrf.mxu1  ;;  %4872 = vmatprep.subr.bf16.mxu1 %v4700_v12 }
 0x1e8   :  { %v2199_v63 = vpop.f32.mrf.mxu0  ;;  %6213 = vrot.lane.b32.xlu0 %v10519_v17, %s8712_s15  ;;  %v4671_v52 = vpop.permute.xlu1 %4670  ;;  %v10602_v21 = vld [vmem:[%s11713_s0 + $0x38] ss:$80 sps:$4 sm:$0xff]  }
 0x1e9   :  { %v2240_v43 = vpop.f32.mrf.mxu1  ;;  %v4702_v24 = vsel %vm4692_vm9, %v4671_v52, %v4673_v18  ;;  %v4701_v44 = vsel %vm4692_vm9, %v10469_v48, %v4671_v52 }
 0x1ea   :  { %v2276_v28 = vpop.f32.mrf.mxu0  ;;  %8517 = vmatmul.mubr.msk.bf16.vlgmr.msra.gmra.mxu0 %vm198_vm1, %v10514_v29  ;;  %v10527_v0 = vpop.permute.xlu0 %4676  ;;  %6211 = vrot.lane.b32.xlu1 %v10532_v16, %s8712_s15 }
 0x1eb   :  { %v10538_v8 = vadd.f32 %v2276_v28, %v10323_v41  ;;  %4832 = vmatpush1.bf16.msra.mxu0 %v4697_v51  ;;  %v2317_v50 = vpop.f32.mrf.mxu1  ;;  %8518 = vmatmul.mubr.msk.bf16.vlgmr.msra.gmra.mxu1 %vm198_vm1, %v10514_v29  ;;  %v10618_v51 = vld [vmem:[%s11713_s0 + $0x34] ss:$80 sps:$4 sm:$0xff]  }
 0x1ec   :  { %v10543_v56 = vadd.f32 %v2317_v50, %v10328_v36  ;;  %4873 = vmatpush1.bf16.msra.mxu1 %v4699_v31  ;;  %v2278_v15 = vpop.f32.mrf.mxu0  ;;  %6217 = vrot.lane.b32.xlu0 %v10548_v40, %s8712_s15  ;;  %v4675_v41 = vpop.permute.xlu1 %4674 }
 0x1ed   :  { %v10553_v7 = vadd.f32 %v2278_v15, %v10333_v32  ;;  %v2319_v5 = vpop.f32.mrf.mxu1  ;;  %4849 = vmatprep.mubr.bf16.mxu0 %v8700_v1  ;;  %4913 = vmatprep.subr.bf16.mxu0 %v4702_v24  ;;  %v4704_v36 = vsel %vm4692_vm9, %v4675_v41, %v10527_v0  ;;  %v4703_v58 = vsel %vm4692_vm9, %v4673_v18, %v4675_v41 }
 0x1ee   :  { %v10559_v37 = vadd.f32 %v2319_v5, %v10339_v53  ;;  %v2280_v10 = vpop.f32.mrf.mxu0  ;;  %v4681_v55 = vpop.permute.xlu0 %4680  ;;  %6215 = vrot.lane.b32.xlu1 %v10564_v2, %s8712_s15  ;;  %4890 = vmatprep.mubr.bf16.mxu1 %v8700_v1  ;;  %v10572_v53 = vld [vmem:[%s11713_s0 + $0x30] ss:$80 sps:$4 sm:$0xff]  }
 0x1ef   :  { %v2321_v32 = vpop.f32.mrf.mxu1  ;;  %4954 = vmatprep.subr.bf16.mxu1 %v4704_v36 }
 0x1f0   :  { %v2281_v62 = vpop.f32.mrf.mxu0  ;;  %6221 = vrot.lane.b32.xlu0 %v10572_v53, %s8712_s15  ;;  %v4679_v25 = vpop.permute.xlu1 %4678  ;;  %v10640_v32 = vld [vmem:[%s11713_s0 + $0x3c] ss:$80 sps:$4 sm:$0xff]  }
 0x1f1   :  { %v2322_v6 = vpop.f32.mrf.mxu1  ;;  %v4706_v30 = vsel %vm4692_vm9, %v4679_v25, %v4681_v55  ;;  %v4705_v36 = vsel %vm4692_vm9, %v10527_v0, %v4679_v25 }
 0x1f2   :  { %v2358_v11 = vpop.f32.mrf.mxu0  ;;  %8519 = vmatmul.mubr.msk.bf16.vlgmr.msra.gmra.mxu0 %vm198_vm1, %v10514_v29  ;;  %v10581_v60 = vpop.permute.xlu0 %4684  ;;  %6219 = vrot.lane.b32.xlu1 %v10586_v57, %s8712_s15 }
 0x1f3   :  { %v10592_v12 = vadd.f32 %v2358_v11, %v10357_v35  ;;  %4914 = vmatpush1.bf16.msra.mxu0 %v4701_v44  ;;  %v2399_v27 = vpop.f32.mrf.mxu1  ;;  %8520 = vmatmul.mubr.msk.bf16.vlgmr.msra.gmra.mxu1 %vm198_vm1, %v10514_v29 }
 0x1f4   :  { %v10597_v48 = vadd.f32 %v2399_v27, %v10362_v4  ;;  %4955 = vmatpush1.bf16.msra.mxu1 %v4703_v58  ;;  %v2360_v18 = vpop.f32.mrf.mxu0  ;;  %6225 = vrot.lane.b32.xlu0 %v10602_v21, %s8712_s15  ;;  %v4683_v35 = vpop.permute.xlu1 %4682  ;;  %v10656_v58 = vld [vmem:[%s11713_s0 + $0x48] ss:$80 sps:$4 sm:$0xff]  }
 0x1f5   :  { %v10607_v63 = vadd.f32 %v2360_v18, %v10367_v14  ;;  %v2401_v52 = vpop.f32.mrf.mxu1  ;;  %4931 = vmatprep.mubr.bf16.mxu0 %v8700_v1  ;;  %4995 = vmatprep.subr.bf16.mxu0 %v4706_v30  ;;  %v4708_v4 = vsel %vm4692_vm9, %v4683_v35, %v10581_v60  ;;  %v4707_v41 = vsel %vm4692_vm9, %v4681_v55, %v4683_v35  ;;  %v10670_v18 = vld [vmem:[%s11713_s0 + $0x44] ss:$80 sps:$4 sm:$0xff]  }
 0x1f6   :  { %v10613_v43 = vadd.f32 %v2401_v52, %v10373_v23  ;;  %v2362_v31 = vpop.f32.mrf.mxu0  ;;  %v4689_v28 = vpop.permute.xlu0 %4688  ;;  %6223 = vrot.lane.b32.xlu1 %v10618_v51, %s8712_s15  ;;  %4972 = vmatprep.mubr.bf16.mxu1 %v8700_v1  ;;  %v10626_v23 = vld [vmem:[%s11713_s0 + $0x40] ss:$80 sps:$4 sm:$0xff]  }
 0x1f7   :  { %v2403_v14 = vpop.f32.mrf.mxu1  ;;  %5036 = vmatprep.subr.bf16.mxu1 %v4708_v4 }
 0x1f8   :  { %v2363_v24 = vpop.f32.mrf.mxu0  ;;  %6229 = vrot.lane.b32.xlu0 %v10626_v23, %s8712_s15  ;;  %v4687_v50 = vpop.permute.xlu1 %4686 }
 0x1f9   :  { %v2404_v15 = vpop.f32.mrf.mxu1  ;;  %v4710_v62 = vsel %vm4692_vm9, %v4687_v50, %v4689_v28  ;;  %v4709_v14 = vsel %vm4692_vm9, %v10581_v60, %v4687_v50 }
 0x1fa   :  { %v2440_v5 = vpop.f32.mrf.mxu0  ;;  %8521 = vmatmul.mubr.msk.bf16.vlgmr.msra.gmra.mxu0 %vm198_vm1, %v10514_v29  ;;  %v10635_v10 = vpop.permute.xlu0 %5169  ;;  %6227 = vrot.lane.b32.xlu1 %v10640_v32, %s8712_s15  ;;  %v10685_v15 = vld [vmem:[%s11713_s0 + $0x4c] ss:$80 sps:$4 sm:$0xff]  }
 0x1fb   :  { %v10646_v55 = vadd.f32 %v2440_v5, %v10391_v19  ;;  %4996 = vmatpush1.bf16.msra.mxu0 %v4705_v36  ;;  %v2481_v6 = vpop.f32.mrf.mxu1  ;;  %8522 = vmatmul.mubr.msk.bf16.vlgmr.msra.gmra.mxu1 %vm198_vm1, %v10514_v29 }
 0x1fc   :  { %v10651_v0 = vadd.f32 %v2481_v6, %v10396_v3  ;;  %5037 = vmatpush1.bf16.msra.mxu1 %v4707_v41  ;;  %v2442_v25 = vpop.f32.mrf.mxu0  ;;  %6233 = vrot.lane.b32.xlu0 %v10656_v58, %s8712_s15  ;;  %v4691_v19 = vpop.permute.xlu1 %4690 }
 0x1fd   :  { %v10661_v11 = vadd.f32 %v2442_v25, %v10401_v26  ;;  %v2483_v44 = vpop.f32.mrf.mxu1  ;;  %5013 = vmatprep.mubr.bf16.mxu0 %v8700_v1  ;;  %5077 = vmatprep.subr.bf16.mxu0 %v4710_v62  ;;  %v4711_v4 = vsel %vm4692_vm9, %v4689_v28, %v4691_v19 }
 0x1fe   :  { %v10665_v3 = vadd.f32 %v2483_v44, %v10405_v34  ;;  %v2444_v30 = vpop.f32.mrf.mxu0  ;;  %v5174_v27 = vpop.permute.xlu0 %5173  ;;  %6231 = vrot.lane.b32.xlu1 %v10670_v18, %s8712_s15  ;;  %5054 = vmatprep.mubr.bf16.mxu1 %v8700_v1 }
 0x1ff   :  { %v2485_v26 = vpop.f32.mrf.mxu1  ;;  %5118 = vmatprep.subr.bf16.mxu1 %v4691_v19 }
 0x200   :  { %v2445_v35 = vpop.f32.mrf.mxu0  ;;  %6714 = vrot.lane.b32.xlu0 %v10413_v45, %s8713_s29  ;;  %v5172_v34 = vpop.permute.xlu1 %5171 }
 0x201   :  { %v2486_v52 = vpop.f32.mrf.mxu1  ;;  %v5209_v41 = vsel %vm5207_vm10, %v10635_v10, %v5172_v34  ;;  %v5210_v35 = vsel %vm5207_vm10, %v5172_v34, %v5174_v27 }
 0x202   :  { %v2522_v31 = vpop.f32.mrf.mxu0  ;;  %8523 = vmatmul.mubr.msk.bf16.vlgmr.msra.gmra.mxu0 %vm198_vm1, %v10514_v29  ;;  %v5168_v24 = vpop.permute.xlu0 %5167  ;;  %6235 = vrot.lane.b32.xlu1 %v10685_v15, %s8712_s15 }
 0x203   :  { %v10692_v28 = vadd.f32 %v2522_v31, %v10427_v38  ;;  %5078 = vmatpush1.bf16.msra.mxu0 %v4709_v14  ;;  %v2563_v5 = vpop.f32.mrf.mxu1  ;;  %8524 = vmatmul.mubr.msk.bf16.vlgmr.msra.gmra.mxu1 %vm198_vm1, %v10514_v29 }
 0x204   :  { %v10697_v60 = vadd.f32 %v2563_v5, %v10432_v33  ;;  %5119 = vmatpush1.bf16.msra.mxu1 %v4711_v4  ;;  %v2524_v50 = vpop.f32.mrf.mxu0  ;;  %6718 = vrot.lane.b32.xlu0 %v10437_v46, %s8713_s29  ;;  %v5176_v36 = vpop.permute.xlu1 %5175 }
 0x205   :  { %v10702_v62 = vadd.f32 %v2524_v50, %v10442_v39  ;;  %v2565_v6 = vpop.f32.mrf.mxu1  ;;  %5264 = vmatprep.subr.bf16.mxu0 %v5209_v41  ;;  %5095 = vmatprep.mubr.bf16.mxu0 %v8700_v1  ;;  %v5211_v38 = vsel %vm5207_vm10, %v5174_v27, %v5176_v36 }
 0x206   :  { %v10707_v25 = vadd.f32 %v2565_v6, %v10447_v20  ;;  %v2526_v33 = vpop.f32.mrf.mxu0  ;;  %v5180_v19 = vpop.permute.xlu0 %5179  ;;  %6716 = vrot.lane.b32.xlu1 %v10452_v22, %s8713_s29  ;;  %5136 = vmatprep.mubr.bf16.mxu1 %v8700_v1  ;;  %v5208_v20 = vsel %vm5207_vm10, %v5168_v24, %v10635_v10 }
 0x207   :  { %v2567_v44 = vpop.f32.mrf.mxu1  ;;  %5305 = vmatprep.subr.bf16.mxu1 %v5211_v38 }
 0x208   :  { %v2527_v39 = vpop.f32.mrf.mxu0  ;;  %6712 = vrot.lane.b32.xlu0 %v10460_v54, %s8713_s29  ;;  %v5178_v30 = vpop.permute.xlu1 %5177 }
 0x209   :  { %v2568_v26 = vpop.f32.mrf.mxu1  ;;  %v5213_v31 = vsel %vm5207_vm10, %v5178_v30, %v5180_v19 }
 0x20a   :  { %v2709_v52 = vpop.f32.mrf.mxu0  ;;  %8525 = vmatmul.mubr.msk.bf16.vlgmr.msra.gmra.mxu0 %vm198_vm1, %v10514_v29  ;;  %v10719_v4 = vpop.permute.xlu0 %5183  ;;  %6720 = vrot.lane.b32.xlu1 %v10474_v49, %s8713_s29  ;;  %v5212_v26 = vsel %vm5207_vm10, %v5176_v36, %v5178_v30 }
 0x20b   :  { %v10725_v14 = vadd.f32 %v2709_v52, %v10480_v59  ;;  %5265 = vmatpush1.bf16.msra.mxu0 %v5208_v20  ;;  %v2750_v41 = vpop.f32.mrf.mxu1  ;;  %8526 = vmatmul.mubr.msk.bf16.vlgmr.msra.gmra.mxu1 %vm198_vm1, %v10514_v29 }
 0x20c   :  { %v10730_v10 = vadd.f32 %v2750_v41, %v10485_v61  ;;  %5306 = vmatpush1.bf16.msra.mxu1 %v5210_v35  ;;  %v2711_v27 = vpop.f32.mrf.mxu0  ;;  %6724 = vrot.lane.b32.xlu0 %v10490_v42, %s8713_s29  ;;  %v5182_v34 = vpop.permute.xlu1 %5181 }
 0x20d   :  { %v10735_v24 = vadd.f32 %v2711_v27, %v10495_v9  ;;  %v2752_v5 = vpop.f32.mrf.mxu1  ;;  %5282 = vmatprep.mubr.bf16.mxu0 %v8700_v1  ;;  %5346 = vmatprep.subr.bf16.mxu0 %v5213_v31  ;;  %v5215_v59 = vsel %vm5207_vm10, %v5182_v34, %v10719_v4  ;;  %v10749_v9 = vld [vmem:[%s11714_s1 + $0x28] sm:$0xf]  ;;  %v5214_v44 = vsel %vm5207_vm10, %v5180_v19, %v5182_v34 }
 0x20e   :  { %v10741_v29 = vadd.f32 %v2752_v5, %v10501_v47  ;;  %v2713_v61 = vpop.f32.mrf.mxu0  ;;  %v5188_v50 = vpop.permute.xlu0 %5187  ;;  %6722 = vrot.lane.b32.xlu1 %v10506_v13, %s8713_s29  ;;  %5323 = vmatprep.mubr.bf16.mxu1 %v8700_v1 }
 0x20f   :  { %v2754_v6 = vpop.f32.mrf.mxu1  ;;  %5387 = vmatprep.subr.bf16.mxu1 %v5215_v59 }
 0x210   :  { %v2714_v38 = vpop.f32.mrf.mxu0  ;;  %6728 = vrot.lane.b32.xlu0 %v10519_v17, %s8713_s29  ;;  %v5186_v47 = vpop.permute.xlu1 %5185 }
 0x211   :  { %v2755_v33 = vpop.f32.mrf.mxu1  ;;  %v5217_v20 = vsel %vm5207_vm10, %v5186_v47, %v5188_v50 }
 0x212   :  { %v2791_v39 = vpop.f32.mrf.mxu0  ;;  %8528 = vmatmul.mubr.msk.bf16.vlgmr.msra.gmra.mxu0 %vm198_vm1, %v10749_v9  ;;  %v10757_v35 = vpop.permute.xlu0 %5191  ;;  %6726 = vrot.lane.b32.xlu1 %v10532_v16, %s8713_s29 }
 0x213   :  { %v10763_v52 = vadd.f32 %v2791_v39, %v10538_v8  ;;  %5347 = vmatpush1.bf16.msra.mxu0 %v5212_v26  ;;  %v2832_v31 = vpop.f32.mrf.mxu1  ;;  %8529 = vmatmul.mubr.msk.bf16.vlgmr.msra.gmra.mxu1 %vm198_vm1, %v10749_v9 }
 0x214   :  { %v10768_v19 = vadd.f32 %v2832_v31, %v10543_v56  ;;  %5388 = vmatpush1.bf16.msra.mxu1 %v5214_v44  ;;  %v2793_v36 = vpop.f32.mrf.mxu0  ;;  %6732 = vrot.lane.b32.xlu0 %v10548_v40, %s8713_s29  ;;  %v5190_v30 = vpop.permute.xlu1 %5189 }
 0x215   :  { %v10773_v41 = vadd.f32 %v2793_v36, %v10553_v7  ;;  %v2834_v27 = vpop.f32.mrf.mxu1  ;;  %5364 = vmatprep.mubr.bf16.mxu0 %v8700_v1  ;;  %5428 = vmatprep.subr.bf16.mxu0 %v5217_v20  ;;  %v5219_v8 = vsel %vm5207_vm10, %v5190_v30, %v10757_v35  ;;  %v5218_v38 = vsel %vm5207_vm10, %v5188_v50, %v5190_v30 }
 0x216   :  { %v10779_v34 = vadd.f32 %v2834_v27, %v10559_v37  ;;  %v2795_v56 = vpop.f32.mrf.mxu0  ;;  %v5196_v5 = vpop.permute.xlu0 %5195  ;;  %6730 = vrot.lane.b32.xlu1 %v10564_v2, %s8713_s29  ;;  %5405 = vmatprep.mubr.bf16.mxu1 %v8700_v1  ;;  %v5216_v37 = vsel %vm5207_vm10, %v10719_v4, %v5186_v47 }
 0x217   :  { %v2836_v59 = vpop.f32.mrf.mxu1  ;;  %5469 = vmatprep.subr.bf16.mxu1 %v5219_v8 }
 0x218   :  { %v2796_v7 = vpop.f32.mrf.mxu0  ;;  %6736 = vrot.lane.b32.xlu0 %v10572_v53, %s8713_s29  ;;  %v5194_v61 = vpop.permute.xlu1 %5193 }
 0x219   :  { %v2837_v6 = vpop.f32.mrf.mxu1  ;;  %v5221_v39 = vsel %vm5207_vm10, %v5194_v61, %v5196_v5 }
 0x21a   :  { %v2873_v33 = vpop.f32.mrf.mxu0  ;;  %8530 = vmatmul.mubr.msk.bf16.vlgmr.msra.gmra.mxu0 %vm198_vm1, %v10749_v9  ;;  %v10791_v44 = vpop.permute.xlu0 %5199  ;;  %6734 = vrot.lane.b32.xlu1 %v10586_v57, %s8713_s29 }
 0x21b   :  { %v10797_v26 = vadd.f32 %v2873_v33, %v10592_v12  ;;  %5429 = vmatpush1.bf16.msra.mxu0 %v5216_v37  ;;  %v2914_v20 = vpop.f32.mrf.mxu1  ;;  %8531 = vmatmul.mubr.msk.bf16.vlgmr.msra.gmra.mxu1 %vm198_vm1, %v10749_v9 }
 0x21c   :  { %v10802_v50 = vadd.f32 %v2914_v20, %v10597_v48  ;;  %5470 = vmatpush1.bf16.msra.mxu1 %v5218_v38  ;;  %v2875_v4 = vpop.f32.mrf.mxu0  ;;  %6740 = vrot.lane.b32.xlu0 %v10602_v21, %s8713_s29  ;;  %v5198_v47 = vpop.permute.xlu1 %5197 }
 0x21d   :  { %v10807_v31 = vadd.f32 %v2875_v4, %v10607_v63  ;;  %v2916_v36 = vpop.f32.mrf.mxu1  ;;  %5446 = vmatprep.mubr.bf16.mxu0 %v8700_v1  ;;  %5510 = vmatprep.subr.bf16.mxu0 %v5221_v39  ;;  %v5223_v12 = vsel %vm5207_vm10, %v5198_v47, %v10791_v44  ;;  %v5222_v7 = vsel %vm5207_vm10, %v5196_v5, %v5198_v47 }
 0x21e   :  { %v10813_v30 = vadd.f32 %v2916_v36, %v10613_v43  ;;  %v2877_v48 = vpop.f32.mrf.mxu0  ;;  %v5204_v27 = vpop.permute.xlu0 %5203  ;;  %6738 = vrot.lane.b32.xlu1 %v10618_v51, %s8713_s29  ;;  %5487 = vmatprep.mubr.bf16.mxu1 %v8700_v1  ;;  %v5220_v43 = vsel %vm5207_vm10, %v10757_v35, %v5194_v61 }
 0x21f   :  { %v2918_v8 = vpop.f32.mrf.mxu1  ;;  %5551 = vmatprep.subr.bf16.mxu1 %v5223_v12 }
 0x220   :  { %v2878_v63 = vpop.f32.mrf.mxu0  ;;  %6744 = vrot.lane.b32.xlu0 %v10626_v23, %s8713_s29  ;;  %v5202_v56 = vpop.permute.xlu1 %5201 }
 0x221   :  { %v2919_v59 = vpop.f32.mrf.mxu1  ;;  %v5225_v33 = vsel %vm5207_vm10, %v5202_v56, %v5204_v27  ;;  %v5224_v63 = vsel %vm5207_vm10, %v10791_v44, %v5202_v56 }
 0x222   :  { %v2955_v6 = vpop.f32.mrf.mxu0  ;;  %8532 = vmatmul.mubr.msk.bf16.vlgmr.msra.gmra.mxu0 %vm198_vm1, %v10749_v9  ;;  %v10825_v38 = vpop.permute.xlu0 %5684  ;;  %6742 = vrot.lane.b32.xlu1 %v10640_v32, %s8713_s29 }
 0x223   :  { %v10831_v37 = vadd.f32 %v2955_v6, %v10646_v55  ;;  %5511 = vmatpush1.bf16.msra.mxu0 %v5220_v43  ;;  %v2996_v39 = vpop.f32.mrf.mxu1  ;;  %8533 = vmatmul.mubr.msk.bf16.vlgmr.msra.gmra.mxu1 %vm198_vm1, %v10749_v9 }
 0x224   :  { %v10836_v5 = vadd.f32 %v2996_v39, %v10651_v0  ;;  %5552 = vmatpush1.bf16.msra.mxu1 %v5222_v7  ;;  %v2957_v35 = vpop.f32.mrf.mxu0  ;;  %6748 = vrot.lane.b32.xlu0 %v10656_v58, %s8713_s29  ;;  %v5206_v61 = vpop.permute.xlu1 %5205 }
 0x225   :  { %v10841_v20 = vadd.f32 %v2957_v35, %v10661_v11  ;;  %v2998_v4 = vpop.f32.mrf.mxu1  ;;  %5528 = vmatprep.mubr.bf16.mxu0 %v8700_v1  ;;  %5592 = vmatprep.subr.bf16.mxu0 %v5225_v33 }
 0x226   :  { %v10845_v55 = vadd.f32 %v2998_v4, %v10665_v3  ;;  %v2959_v47 = vpop.f32.mrf.mxu0  ;;  %v5689_v36 = vpop.permute.xlu0 %5688  ;;  %6746 = vrot.lane.b32.xlu1 %v10670_v18, %s8713_s29  ;;  %5569 = vmatprep.mubr.bf16.mxu1 %v8700_v1  ;;  %v5226_v3 = vsel %vm5207_vm10, %v5204_v27, %v5206_v61 }
 0x227   :  { %v3000_v0 = vpop.f32.mrf.mxu1  ;;  %5633 = vmatprep.subr.bf16.mxu1 %v5206_v61 }
 0x228   :  { %v2960_v12 = vpop.f32.mrf.mxu0  ;;  %7229 = vrot.lane.b32.xlu0 %v10413_v45, %s8714_s5  ;;  %v5687_v11 = vpop.permute.xlu1 %5686 }
 0x229   :  { %v3001_v48 = vpop.f32.mrf.mxu1  ;;  %v5724_v7 = vsel %vm5722_vm11, %v10825_v38, %v5687_v11  ;;  %v5725_v12 = vsel %vm5722_vm11, %v5687_v11, %v5689_v36 }
 0x22a   :  { %v3037_v8 = vpop.f32.mrf.mxu0  ;;  %8534 = vmatmul.mubr.msk.bf16.vlgmr.msra.gmra.mxu0 %vm198_vm1, %v10749_v9  ;;  %v5683_v59 = vpop.permute.xlu0 %5682  ;;  %6750 = vrot.lane.b32.xlu1 %v10685_v15, %s8713_s29 }
 0x22b   :  { %v10862_v6 = vadd.f32 %v3037_v8, %v10692_v28  ;;  %5593 = vmatpush1.bf16.msra.mxu0 %v5224_v63  ;;  %v3078_v43 = vpop.f32.mrf.mxu1  ;;  %8535 = vmatmul.mubr.msk.bf16.vlgmr.msra.gmra.mxu1 %vm198_vm1, %v10749_v9 }
 0x22c   :  { %v10867_v27 = vadd.f32 %v3078_v43, %v10697_v60  ;;  %5634 = vmatpush1.bf16.msra.mxu1 %v5226_v3  ;;  %v3039_v44 = vpop.f32.mrf.mxu0  ;;  %7233 = vrot.lane.b32.xlu0 %v10437_v46, %s8714_s5  ;;  %v5691_v56 = vpop.permute.xlu1 %5690 }
 0x22d   :  { %v10872_v33 = vadd.f32 %v3039_v44, %v10702_v62  ;;  %v3080_v39 = vpop.f32.mrf.mxu1  ;;  %5779 = vmatprep.subr.bf16.mxu0 %v5724_v7  ;;  %5610 = vmatprep.mubr.bf16.mxu0 %v8700_v1  ;;  %v5726_v28 = vsel %vm5722_vm11, %v5689_v36, %v5691_v56 }
 0x22e   :  { %v10877_v35 = vadd.f32 %v3080_v39, %v10707_v25  ;;  %v3041_v60 = vpop.f32.mrf.mxu0  ;;  %v5695_v61 = vpop.permute.xlu0 %5694  ;;  %7231 = vrot.lane.b32.xlu1 %v10452_v22, %s8714_s5  ;;  %5651 = vmatprep.mubr.bf16.mxu1 %v8700_v1  ;;  %v5723_v25 = vsel %vm5722_vm11, %v5683_v59, %v10825_v38 }
 0x22f   :  { %v3082_v4 = vpop.f32.mrf.mxu1  ;;  %5820 = vmatprep.subr.bf16.mxu1 %v5726_v28 }
 0x230   :  { %v3042_v62 = vpop.f32.mrf.mxu0  ;;  %7227 = vrot.lane.b32.xlu0 %v10460_v54, %s8714_s5  ;;  %v5693_v47 = vpop.permute.xlu1 %5692 }
 0x231   :  { %v3083_v0 = vpop.f32.mrf.mxu1  ;;  %v5728_v8 = vsel %vm5722_vm11, %v5693_v47, %v5695_v61  ;;  %v5727_v62 = vsel %vm5722_vm11, %v5691_v56, %v5693_v47 }
 0x232   :  { %v3224_v48 = vpop.f32.mrf.mxu0  ;;  %8536 = vmatmul.mubr.msk.bf16.vlgmr.msra.gmra.mxu0 %vm198_vm1, %v10749_v9  ;;  %v10889_v3 = vpop.permute.xlu0 %5698  ;;  %7235 = vrot.lane.b32.xlu1 %v10474_v49, %s8714_s5 }
 0x233   :  { %v10895_v63 = vadd.f32 %v3224_v48, %v10725_v14  ;;  %5780 = vmatpush1.bf16.msra.mxu0 %v5723_v25  ;;  %v3265_v7 = vpop.f32.mrf.mxu1  ;;  %8537 = vmatmul.mubr.msk.bf16.vlgmr.msra.gmra.mxu1 %vm198_vm1, %v10749_v9 }
 0x234   :  { %v10900_v38 = vadd.f32 %v3265_v7, %v10730_v10  ;;  %5821 = vmatpush1.bf16.msra.mxu1 %v5725_v12  ;;  %v3226_v36 = vpop.f32.mrf.mxu0  ;;  %7239 = vrot.lane.b32.xlu0 %v10490_v42, %s8714_s5  ;;  %v5697_v11 = vpop.permute.xlu1 %5696 }
 0x235   :  { %v10905_v59 = vadd.f32 %v3226_v36, %v10735_v24  ;;  %v3267_v43 = vpop.f32.mrf.mxu1  ;;  %5797 = vmatprep.mubr.bf16.mxu0 %v8700_v1  ;;  %5861 = vmatprep.subr.bf16.mxu0 %v5728_v8  ;;  %v5730_v14 = vsel %vm5722_vm11, %v5697_v11, %v10889_v3  ;;  %v10919_v24 = vld [vmem:[%s11714_s1 + $0x2c] sm:$0xf]  ;;  %v5729_v60 = vsel %vm5722_vm11, %v5695_v61, %v5697_v11 }
 0x236   :  { %v10911_v9 = vadd.f32 %v3267_v43, %v10741_v29  ;;  %v3228_v10 = vpop.f32.mrf.mxu0  ;;  %v5703_v44 = vpop.permute.xlu0 %5702  ;;  %7237 = vrot.lane.b32.xlu1 %v10506_v13, %s8714_s5  ;;  %5838 = vmatprep.mubr.bf16.mxu1 %v8700_v1 }
 0x237   :  { %v3269_v39 = vpop.f32.mrf.mxu1  ;;  %5902 = vmatprep.subr.bf16.mxu1 %v5730_v14 }
 0x238   :  { %v3229_v28 = vpop.f32.mrf.mxu0  ;;  %7243 = vrot.lane.b32.xlu0 %v10519_v17, %s8714_s5  ;;  %v5701_v29 = vpop.permute.xlu1 %5700 }
 0x239   :  { %v3270_v4 = vpop.f32.mrf.mxu1  ;;  %v5732_v25 = vsel %vm5722_vm11, %v5701_v29, %v5703_v44 }
 0x23a   :  { %v3306_v0 = vpop.f32.mrf.mxu0  ;;  %8539 = vmatmul.mubr.msk.bf16.vlgmr.msra.gmra.mxu0 %vm198_vm1, %v10919_v24  ;;  %v5707_v12 = vpop.permute.xlu0 %5706  ;;  %7241 = vrot.lane.b32.xlu1 %v10532_v16, %s8714_s5 }
 0x23b   :  { %v10931_v48 = vadd.f32 %v3306_v0, %v10763_v52  ;;  %5862 = vmatpush1.bf16.msra.mxu0 %v5727_v62  ;;  %v3347_v8 = vpop.f32.mrf.mxu1  ;;  %8540 = vmatmul.mubr.msk.bf16.vlgmr.msra.gmra.mxu1 %vm198_vm1, %v10919_v24 }
 0x23c   :  { %v10936_v56 = vadd.f32 %v3347_v8, %v10768_v19  ;;  %5903 = vmatpush1.bf16.msra.mxu1 %v5729_v60  ;;  %v3308_v61 = vpop.f32.mrf.mxu0  ;;  %7247 = vrot.lane.b32.xlu0 %v10548_v40, %s8714_s5  ;;  %v5705_v47 = vpop.permute.xlu1 %5704 }
 0x23d   :  { %v10941_v7 = vadd.f32 %v3308_v61, %v10773_v41  ;;  %v3349_v36 = vpop.f32.mrf.mxu1  ;;  %5879 = vmatprep.mubr.bf16.mxu0 %v8700_v1  ;;  %5943 = vmatprep.subr.bf16.mxu0 %v5732_v25  ;;  %v5734_v52 = vsel %vm5722_vm11, %v5705_v47, %v5707_v12  ;;  %v5733_v39 = vsel %vm5722_vm11, %v5703_v44, %v5705_v47 }
 0x23e   :  { %v10946_v11 = vadd.f32 %v3349_v36, %v10779_v34  ;;  %v3310_v19 = vpop.f32.mrf.mxu0  ;;  %v5711_v43 = vpop.permute.xlu0 %5710  ;;  %7245 = vrot.lane.b32.xlu1 %v10564_v2, %s8714_s5  ;;  %5920 = vmatprep.mubr.bf16.mxu1 %v8700_v1  ;;  %v5731_v34 = vsel %vm5722_vm11, %v10889_v3, %v5701_v29 }
 0x23f   :  { %v3351_v14 = vpop.f32.mrf.mxu1  ;;  %5984 = vmatprep.subr.bf16.mxu1 %v5734_v52 }
 0x240   :  { %v3311_v41 = vpop.f32.mrf.mxu0  ;;  %7251 = vrot.lane.b32.xlu0 %v10572_v53, %s8714_s5  ;;  %v5709_v10 = vpop.permute.xlu1 %5708 }
 0x241   :  { %v3352_v28 = vpop.f32.mrf.mxu1  ;;  %v5736_v62 = vsel %vm5722_vm11, %v5709_v10, %v5711_v43 }
 0x242   :  { %v3388_v60 = vpop.f32.mrf.mxu0  ;;  %8541 = vmatmul.mubr.msk.bf16.vlgmr.msra.gmra.mxu0 %vm198_vm1, %v10919_v24  ;;  %v10958_v4 = vpop.permute.xlu0 %5714  ;;  %7249 = vrot.lane.b32.xlu1 %v10586_v57, %s8714_s5 }
 0x243   :  { %v10964_v0 = vadd.f32 %v3388_v60, %v10797_v26  ;;  %5944 = vmatpush1.bf16.msra.mxu0 %v5731_v34  ;;  %v3429_v44 = vpop.f32.mrf.mxu1  ;;  %8542 = vmatmul.mubr.msk.bf16.vlgmr.msra.gmra.mxu1 %vm198_vm1, %v10919_v24 }
 0x244   :  { %v10969_v3 = vadd.f32 %v3429_v44, %v10802_v50  ;;  %5985 = vmatpush1.bf16.msra.mxu1 %v5733_v39  ;;  %v3390_v29 = vpop.f32.mrf.mxu0  ;;  %7255 = vrot.lane.b32.xlu0 %v10602_v21, %s8714_s5  ;;  %v5713_v25 = vpop.permute.xlu1 %5712 }
 0x245   :  { %v10974_v8 = vadd.f32 %v3390_v29, %v10807_v31  ;;  %v3431_v61 = vpop.f32.mrf.mxu1  ;;  %5961 = vmatprep.mubr.bf16.mxu0 %v8700_v1  ;;  %6025 = vmatprep.subr.bf16.mxu0 %v5736_v62  ;;  %v5738_v26 = vsel %vm5722_vm11, %v5713_v25, %v10958_v4  ;;  %v5737_v14 = vsel %vm5722_vm11, %v5711_v43, %v5713_v25 }
 0x246   :  { %v10980_v47 = vadd.f32 %v3431_v61, %v10813_v30  ;;  %v3392_v50 = vpop.f32.mrf.mxu0  ;;  %v5719_v36 = vpop.permute.xlu0 %5718  ;;  %7253 = vrot.lane.b32.xlu1 %v10618_v51, %s8714_s5  ;;  %6002 = vmatprep.mubr.bf16.mxu1 %v8700_v1  ;;  %v5735_v30 = vsel %vm5722_vm11, %v5707_v12, %v5709_v10 }
 0x247   :  { %v3433_v52 = vpop.f32.mrf.mxu1  ;;  %6066 = vmatprep.subr.bf16.mxu1 %v5738_v26 }
 0x248   :  { %v3393_v31 = vpop.f32.mrf.mxu0  ;;  %7259 = vrot.lane.b32.xlu0 %v10626_v23, %s8714_s5  ;;  %v5717_v19 = vpop.permute.xlu1 %5716 }
 0x249   :  { %v3434_v41 = vpop.f32.mrf.mxu1  ;;  %v5740_v34 = vsel %vm5722_vm11, %v5717_v19, %v5719_v36  ;;  %v5739_v52 = vsel %vm5722_vm11, %v10958_v4, %v5717_v19 }
 0x24a   :  { %v3470_v39 = vpop.f32.mrf.mxu0  ;;  %8543 = vmatmul.mubr.msk.bf16.vlgmr.msra.gmra.mxu0 %vm198_vm1, %v10919_v24  ;;  %v10991_v28 = vpop.permute.xlu0 %6199  ;;  %7257 = vrot.lane.b32.xlu1 %v10640_v32, %s8714_s5 }
 0x24b   :  { %v10997_v60 = vadd.f32 %v3470_v39, %v10831_v37  ;;  %6026 = vmatpush1.bf16.msra.mxu0 %v5735_v30  ;;  %v3511_v62 = vpop.f32.mrf.mxu1  ;;  %8544 = vmatmul.mubr.msk.bf16.vlgmr.msra.gmra.mxu1 %vm198_vm1, %v10919_v24 }
 0x24c   :  { %v11002_v12 = vadd.f32 %v3511_v62, %v10836_v5  ;;  %6067 = vmatpush1.bf16.msra.mxu1 %v5737_v14  ;;  %v3472_v43 = vpop.f32.mrf.mxu0  ;;  %7263 = vrot.lane.b32.xlu0 %v10656_v58, %s8714_s5  ;;  %v5721_v10 = vpop.permute.xlu1 %5720 }
 0x24d   :  { %v11007_v44 = vadd.f32 %v3472_v43, %v10841_v20  ;;  %v3513_v29 = vpop.f32.mrf.mxu1  ;;  %6043 = vmatprep.mubr.bf16.mxu0 %v8700_v1  ;;  %6107 = vmatprep.subr.bf16.mxu0 %v5740_v34  ;;  %v5741_v50 = vsel %vm5722_vm11, %v5719_v36, %v5721_v10 }
 0x24e   :  { %v11011_v37 = vadd.f32 %v3513_v29, %v10845_v55  ;;  %v3474_v25 = vpop.f32.mrf.mxu0  ;;  %v6204_v61 = vpop.permute.xlu0 %6203  ;;  %7261 = vrot.lane.b32.xlu1 %v10670_v18, %s8714_s5  ;;  %6084 = vmatprep.mubr.bf16.mxu1 %v8700_v1 }
 0x24f   :  { %v3515_v5 = vpop.f32.mrf.mxu1  ;;  %6148 = vmatprep.subr.bf16.mxu1 %v5721_v10 }
 0x250   :  { %v3475_v26 = vpop.f32.mrf.mxu0  ;;  %7744 = vrot.lane.b32.xlu0 %v10413_v45, %s8715_s7  ;;  %v6202_v20 = vpop.permute.xlu1 %6201 }
 0x251   :  { %v3516_v55 = vpop.f32.mrf.mxu1  ;;  %v6239_v41 = vsel %vm6237_vm12, %v10991_v28, %v6202_v20  ;;  %v6240_v29 = vsel %vm6237_vm12, %v6202_v20, %v6204_v61 }
 0x252   :  { %v3552_v31 = vpop.f32.mrf.mxu0  ;;  %8545 = vmatmul.mubr.msk.bf16.vlgmr.msra.gmra.mxu0 %vm198_vm1, %v10919_v24  ;;  %v6198_v14 = vpop.permute.xlu0 %6197  ;;  %7265 = vrot.lane.b32.xlu1 %v10685_v15, %s8714_s5 }
 0x253   :  { %v11028_v45 = vadd.f32 %v3552_v31, %v10862_v6  ;;  %6108 = vmatpush1.bf16.msra.mxu0 %v5739_v52  ;;  %v3593_v36 = vpop.f32.mrf.mxu1  ;;  %8546 = vmatmul.mubr.msk.bf16.vlgmr.msra.gmra.mxu1 %vm198_vm1, %v10919_v24  ;;  %v11085_v31 = vld [vmem:[%s11714_s1 + $0x30] sm:$0xf] }
 0x254   :  { %v11033_v4 = vadd.f32 %v3593_v36, %v10867_v27  ;;  %6149 = vmatpush1.bf16.msra.mxu1 %v5741_v50  ;;  %v3554_v19 = vpop.f32.mrf.mxu0  ;;  %7748 = vrot.lane.b32.xlu0 %v10437_v46, %s8715_s7  ;;  %v6206_v30 = vpop.permute.xlu1 %6205 }
 0x255   :  { %v11038_v39 = vadd.f32 %v3554_v19, %v10872_v33  ;;  %v3595_v34 = vpop.f32.mrf.mxu1  ;;  %6294 = vmatprep.subr.bf16.mxu0 %v6239_v41  ;;  %6125 = vmatprep.mubr.bf16.mxu0 %v8700_v1  ;;  %v6241_v6 = vsel %vm6237_vm12, %v6204_v61, %v6206_v30 }
 0x256   :  { %v11043_v62 = vadd.f32 %v3595_v34, %v10877_v35  ;;  %v3556_v27 = vpop.f32.mrf.mxu0  ;;  %v6210_v43 = vpop.permute.xlu0 %6209  ;;  %7746 = vrot.lane.b32.xlu1 %v10452_v22, %s8715_s7  ;;  %6166 = vmatprep.mubr.bf16.mxu1 %v8700_v1  ;;  %v6238_v35 = vsel %vm6237_vm12, %v6198_v14, %v10991_v28 }
 0x257   :  { %v3597_v46 = vpop.f32.mrf.mxu1  ;;  %6335 = vmatprep.subr.bf16.mxu1 %v6241_v6 }
 0x258   :  { %v3557_v33 = vpop.f32.mrf.mxu0  ;;  %7742 = vrot.lane.b32.xlu0 %v10460_v54, %s8715_s7  ;;  %v6208_v10 = vpop.permute.xlu1 %6207 }
 0x259   :  { %v3598_v25 = vpop.f32.mrf.mxu1  ;;  %v6243_v26 = vsel %vm6237_vm12, %v6208_v10, %v6210_v43  ;;  %v6242_v36 = vsel %vm6237_vm12, %v6206_v30, %v6208_v10 }
 0x25a   :  { %v3739_v5 = vpop.f32.mrf.mxu0  ;;  %8547 = vmatmul.mubr.msk.bf16.vlgmr.msra.gmra.mxu0 %vm198_vm1, %v10919_v24  ;;  %v11055_v22 = vpop.permute.xlu0 %6213  ;;  %7750 = vrot.lane.b32.xlu1 %v10474_v49, %s8715_s7 }
 0x25b   :  { %v11061_v54 = vadd.f32 %v3739_v5, %v10895_v63  ;;  %6295 = vmatpush1.bf16.msra.mxu0 %v6238_v35  ;;  %v3780_v61 = vpop.f32.mrf.mxu1  ;;  %8548 = vmatmul.mubr.msk.bf16.vlgmr.msra.gmra.mxu1 %vm198_vm1, %v10919_v24 }
 0x25c   :  { %v11066_v28 = vadd.f32 %v3780_v61, %v10900_v38  ;;  %6336 = vmatpush1.bf16.msra.mxu1 %v6240_v29  ;;  %v3741_v20 = vpop.f32.mrf.mxu0  ;;  %v6212_v50 = vpop.permute.xlu1 %6211  ;;  %6312 = vmatprep.mubr.bf16.mxu0 %v8700_v1 }
 0x25d   :  { %v11070_v49 = vadd.f32 %v3741_v20, %v10905_v59  ;;  %v3782_v55 = vpop.f32.mrf.mxu1  ;;  %6376 = vmatprep.subr.bf16.mxu0 %v6243_v26  ;;  %7754 = vrot.lane.b32.xlu0 %v10490_v42, %s8715_s7  ;;  %v6245_v63 = vsel %vm6237_vm12, %v6212_v50, %v11055_v22  ;;  %v6244_v41 = vsel %vm6237_vm12, %v6210_v43, %v6212_v50 }
 0x25e   :  { %v11077_v24 = vadd.f32 %v3782_v55, %v10911_v9  ;;  %v3743_v38 = vpop.f32.mrf.mxu0  ;;  %v6218_v52 = vpop.permute.xlu0 %6217  ;;  %7752 = vrot.lane.b32.xlu1 %v10506_v13, %s8715_s7  ;;  %6353 = vmatprep.mubr.bf16.mxu1 %v8700_v1 }
 0x25f   :  { %v3784_v59 = vpop.f32.mrf.mxu1  ;;  %6417 = vmatprep.subr.bf16.mxu1 %v6245_v63 }
 0x260   :  { %v3744_v42 = vpop.f32.mrf.mxu0  ;;  %v6216_v14 = vpop.permute.xlu1 %6215 }
 0x261   :  { %v3785_v9 = vpop.f32.mrf.mxu1  ;;  %7758 = vrot.lane.b32.xlu0 %v10519_v17, %s8715_s7  ;;  %v6247_v34 = vsel %vm6237_vm12, %v6216_v14, %v6218_v52 }
 0x262   :  { %v3821_v13 = vpop.f32.mrf.mxu0  ;;  %8550 = vmatmul.mubr.msk.bf16.vlgmr.msra.gmra.mxu0 %vm198_vm1, %v11085_v31  ;;  %v6222_v19 = vpop.permute.xlu0 %6221  ;;  %7756 = vrot.lane.b32.xlu1 %v10532_v16, %s8715_s7 }
 0x263   :  { %v11097_v6 = vadd.f32 %v3821_v13, %v10931_v48  ;;  %6377 = vmatpush1.bf16.msra.mxu0 %v6242_v36  ;;  %v3862_v27 = vpop.f32.mrf.mxu1  ;;  %8551 = vmatmul.mubr.msk.bf16.vlgmr.msra.gmra.mxu1 %vm198_vm1, %v11085_v31 }
 0x264   :  { %v11102_v17 = vadd.f32 %v3862_v27, %v10936_v56  ;;  %6418 = vmatpush1.bf16.msra.mxu1 %v6244_v41  ;;  %v3823_v30 = vpop.f32.mrf.mxu0  ;;  %v6220_v43 = vpop.permute.xlu1 %6219  ;;  %6394 = vmatprep.mubr.bf16.mxu0 %v8700_v1 }
 0x265   :  { %v11106_v16 = vadd.f32 %v3823_v30, %v10941_v7  ;;  %v3864_v46 = vpop.f32.mrf.mxu1  ;;  %6458 = vmatprep.subr.bf16.mxu0 %v6247_v34  ;;  %7762 = vrot.lane.b32.xlu0 %v10548_v40, %s8715_s7  ;;  %v6249_v48 = vsel %vm6237_vm12, %v6220_v43, %v6222_v19  ;;  %v6248_v35 = vsel %vm6237_vm12, %v6218_v52, %v6220_v43 }
 0x266   :  { %v11112_v33 = vadd.f32 %v3864_v46, %v10946_v11  ;;  %v3825_v56 = vpop.f32.mrf.mxu0  ;;  %v6226_v10 = vpop.permute.xlu0 %6225  ;;  %7760 = vrot.lane.b32.xlu1 %v10564_v2, %s8715_s7  ;;  %6435 = vmatprep.mubr.bf16.mxu1 %v8700_v1  ;;  %v6246_v40 = vsel %vm6237_vm12, %v11055_v22, %v6216_v14 }
 0x267   :  { %v3866_v29 = vpop.f32.mrf.mxu1  ;;  %6499 = vmatprep.subr.bf16.mxu1 %v6249_v48 }
 0x268   :  { %v3826_v7 = vpop.f32.mrf.mxu0  ;;  %v6224_v25 = vpop.permute.xlu1 %6223 }
 0x269   :  { %v3867_v5 = vpop.f32.mrf.mxu1  ;;  %7766 = vrot.lane.b32.xlu0 %v10572_v53, %s8715_s7  ;;  %v6251_v26 = vsel %vm6237_vm12, %v6224_v25, %v6226_v10 }
 0x26a   :  { %v3903_v11 = vpop.f32.mrf.mxu0  ;;  %8552 = vmatmul.mubr.msk.bf16.vlgmr.msra.gmra.mxu0 %vm198_vm1, %v11085_v31  ;;  %v6230_v2 = vpop.permute.xlu0 %6229  ;;  %7764 = vrot.lane.b32.xlu1 %v10586_v57, %s8715_s7 }
 0x26b   :  { %v11128_v61 = vadd.f32 %v3903_v11, %v10964_v0  ;;  %6459 = vmatpush1.bf16.msra.mxu0 %v6246_v40  ;;  %v3944_v20 = vpop.f32.mrf.mxu1  ;;  %8553 = vmatmul.mubr.msk.bf16.vlgmr.msra.gmra.mxu1 %vm198_vm1, %v11085_v31 }
 0x26c   :  { %v11133_v53 = vadd.f32 %v3944_v20, %v10969_v3  ;;  %6500 = vmatpush1.bf16.msra.mxu1 %v6248_v35  ;;  %v3905_v22 = vpop.f32.mrf.mxu0  ;;  %v6228_v50 = vpop.permute.xlu1 %6227  ;;  %6476 = vmatprep.mubr.bf16.mxu0 %v8700_v1 }
 0x26d   :  { %v11137_v57 = vadd.f32 %v3905_v22, %v10974_v8  ;;  %v3946_v55 = vpop.f32.mrf.mxu1  ;;  %6540 = vmatprep.subr.bf16.mxu0 %v6251_v26  ;;  %7770 = vrot.lane.b32.xlu0 %v10602_v21, %s8715_s7  ;;  %v6253_v0 = vsel %vm6237_vm12, %v6228_v50, %v6230_v2  ;;  %v6252_v42 = vsel %vm6237_vm12, %v6226_v10, %v6228_v50 }
 0x26e   :  { %v11143_v63 = vadd.f32 %v3946_v55, %v10980_v47  ;;  %v3907_v3 = vpop.f32.mrf.mxu0  ;;  %v6234_v38 = vpop.permute.xlu0 %6233  ;;  %7768 = vrot.lane.b32.xlu1 %v10618_v51, %s8715_s7  ;;  %6517 = vmatprep.mubr.bf16.mxu1 %v8700_v1  ;;  %v6250_v21 = vsel %vm6237_vm12, %v6222_v19, %v6224_v25 }
 0x26f   :  { %v3948_v52 = vpop.f32.mrf.mxu1  ;;  %6581 = vmatprep.subr.bf16.mxu1 %v6253_v0 }
 0x270   :  { %v3908_v8 = vpop.f32.mrf.mxu0  ;;  %v6232_v59 = vpop.permute.xlu1 %6231 }
 0x271   :  { %v3949_v14 = vpop.f32.mrf.mxu1  ;;  %7774 = vrot.lane.b32.xlu0 %v10626_v23, %s8715_s7  ;;  %v6255_v51 = vsel %vm6237_vm12, %v6232_v59, %v6234_v38 }
 0x272   :  { %v3985_v47 = vpop.f32.mrf.mxu0  ;;  %8554 = vmatmul.mubr.msk.bf16.vlgmr.msra.gmra.mxu0 %vm198_vm1, %v11085_v31  ;;  %v6715_v41 = vpop.permute.xlu0 %6714  ;;  %7772 = vrot.lane.b32.xlu1 %v10640_v32, %s8715_s7 }
 0x273   :  { %v11158_v9 = vadd.f32 %v3985_v47, %v10997_v60  ;;  %6541 = vmatpush1.bf16.msra.mxu0 %v6250_v21  ;;  %v4026_v36 = vpop.f32.mrf.mxu1  ;;  %8555 = vmatmul.mubr.msk.bf16.vlgmr.msra.gmra.mxu1 %vm198_vm1, %v11085_v31 }
 0x274   :  { %v11163_v23 = vadd.f32 %v4026_v36, %v11002_v12  ;;  %6582 = vmatpush1.bf16.msra.mxu1 %v6252_v42  ;;  %v3987_v13 = vpop.f32.mrf.mxu0  ;;  %v6236_v19 = vpop.permute.xlu1 %6235  ;;  %6558 = vmatprep.mubr.bf16.mxu0 %v8700_v1 }
 0x275   :  { %v11167_v32 = vadd.f32 %v3987_v13, %v11007_v44  ;;  %v4028_v34 = vpop.f32.mrf.mxu1  ;;  %6622 = vmatprep.subr.bf16.mxu0 %v6255_v51  ;;  %6599 = vmatprep.mubr.bf16.mxu1 %v8700_v1  ;;  %v6256_v46 = vsel %vm6237_vm12, %v6234_v38, %v6236_v19 }
 0x276   :  { %v11171_v60 = vadd.f32 %v4028_v34, %v11011_v37  ;;  %v3989_v27 = vpop.f32.mrf.mxu0  ;;  %v6719_v30 = vpop.permute.xlu0 %6718  ;;  %6663 = vmatprep.subr.bf16.mxu1 %v6236_v19  ;;  %7776 = vrot.lane.b32.xlu1 %v10670_v18, %s8715_s7  ;;  %v6254_v37 = vsel %vm6237_vm12, %v6230_v2, %v6232_v59 }
 0x277   :  { %v4030_v12 = vpop.f32.mrf.mxu1  ;;  %7778 = vrot.lane.b32.xlu0 %v10656_v58, %s8715_s7 }
 0x278   :  { %v3990_v44 = vpop.f32.mrf.mxu0  ;;  %v6717_v43 = vpop.permute.xlu1 %6716 }
 0x279   :  { %v4031_v48 = vpop.f32.mrf.mxu1  ;;  %v6754_v56 = vsel %vm6752_vm13, %v6715_v41, %v6717_v43  ;;  %v6755_v22 = vsel %vm6752_vm13, %v6717_v43, %v6719_v30 }
 0x27a   :  { %v4067_v10 = vpop.f32.mrf.mxu0  ;;  %8556 = vmatmul.mubr.msk.bf16.vlgmr.msra.gmra.mxu0 %vm198_vm1, %v11085_v31  ;;  %v6713_v29 = vpop.permute.xlu0 %6712  ;;  %7780 = vrot.lane.b32.xlu1 %v10685_v15, %s8715_s7 }
 0x27b   :  { %v11185_v18 = vadd.f32 %v4067_v10, %v11028_v45  ;;  %6623 = vmatpush1.bf16.msra.mxu0 %v6254_v37  ;;  %v4108_v58 = vpop.f32.mrf.mxu1  ;;  %8557 = vmatmul.mubr.msk.bf16.vlgmr.msra.gmra.mxu1 %vm198_vm1, %v11085_v31  ;;  %v6753_v50 = vsel %vm6752_vm13, %v6713_v29, %v6715_v41  ;;  %v11226_v41 = vld [vmem:[%s11714_s1 + $0x34] sm:$0xf] }
 0x27c   :  { %v11190_v7 = vadd.f32 %v4108_v58, %v11033_v4  ;;  %6664 = vmatpush1.bf16.msra.mxu1 %v6256_v46  ;;  %v4069_v25 = vpop.f32.mrf.mxu0  ;;  %6809 = vmatprep.subr.bf16.mxu0 %v6754_v56  ;;  %v6721_v35 = vpop.permute.xlu1 %6720 }
 0x27d   :  { %v11193_v5 = vadd.f32 %v4069_v25, %v11038_v39  ;;  %v4110_v40 = vpop.f32.mrf.mxu1  ;;  %6640 = vmatprep.mubr.bf16.mxu0 %v8700_v1  ;;  %6681 = vmatprep.mubr.bf16.mxu1 %v8700_v1  ;;  %v6756_v15 = vsel %vm6752_vm13, %v6719_v30, %v6721_v35 }
 0x27e   :  { %v11199_v45 = vadd.f32 %v4110_v40, %v11043_v62  ;;  %v4071_v11 = vpop.f32.mrf.mxu0  ;;  %v6725_v4 = vpop.permute.xlu0 %6724  ;;  %6850 = vmatprep.subr.bf16.mxu1 %v6756_v15 }
 0x27f   :  { %v4112_v2 = vpop.f32.mrf.mxu1 }
 0x280   :  { %v4072_v26 = vpop.f32.mrf.mxu0  ;;  %v6723_v20 = vpop.permute.xlu1 %6722 }
 0x281   :  { %v4113_v39 = vpop.f32.mrf.mxu1  ;;  %v6758_v3 = vsel %vm6752_vm13, %v6723_v20, %v6725_v4  ;;  %v6757_v19 = vsel %vm6752_vm13, %v6721_v35, %v6723_v20 }
 0x282   :  { %v4254_v55 = vpop.f32.mrf.mxu0  ;;  %8558 = vmatmul.mubr.msk.bf16.vlgmr.msra.gmra.mxu0 %vm198_vm1, %v11085_v31  ;;  %v6729_v0 = vpop.permute.xlu0 %6728 }
 0x283   :  { %v11207_v62 = vadd.f32 %v4254_v55, %v11061_v54  ;;  %6810 = vmatpush1.bf16.msra.mxu0 %v6753_v50  ;;  %v4295_v38 = vpop.f32.mrf.mxu1  ;;  %8559 = vmatmul.mubr.msk.bf16.vlgmr.msra.gmra.mxu1 %vm198_vm1, %v11085_v31 }
 0x284   :  { %v11212_v52 = vadd.f32 %v4295_v38, %v11066_v28  ;;  %6851 = vmatpush1.bf16.msra.mxu1 %v6755_v22  ;;  %v4256_v8 = vpop.f32.mrf.mxu0  ;;  %v6727_v59 = vpop.permute.xlu1 %6726  ;;  %6827 = vmatprep.mubr.bf16.mxu0 %v8700_v1 }
 0x285   :  { %v11216_v42 = vadd.f32 %v4256_v8, %v11070_v49  ;;  %v4297_v14 = vpop.f32.mrf.mxu1  ;;  %6891 = vmatprep.subr.bf16.mxu0 %v6758_v3  ;;  %6868 = vmatprep.mubr.bf16.mxu1 %v8700_v1  ;;  %v6760_v54 = vsel %vm6752_vm13, %v6727_v59, %v6729_v0  ;;  %v6759_v36 = vsel %vm6752_vm13, %v6725_v4, %v6727_v59 }
 0x286   :  { %v11221_v21 = vadd.f32 %v4297_v14, %v11077_v24  ;;  %v4258_v31 = vpop.f32.mrf.mxu0  ;;  %v6733_v28 = vpop.permute.xlu0 %6732  ;;  %6932 = vmatprep.subr.bf16.mxu1 %v6760_v54 }
 0x287   :  { %v4299_v47 = vpop.f32.mrf.mxu1 }
 0x288   :  { %v4259_v49 = vpop.f32.mrf.mxu0  ;;  %v6731_v51 = vpop.permute.xlu1 %6730 }
 0x289   :  { %v4300_v13 = vpop.f32.mrf.mxu1  ;;  %v6762_v27 = vsel %vm6752_vm13, %v6731_v51, %v6733_v28 }
 0x28a   :  { %v4336_v34 = vpop.f32.mrf.mxu0  ;;  %8561 = vmatmul.mubr.msk.bf16.vlgmr.msra.gmra.mxu0 %vm198_vm1, %v11226_v41  ;;  %v6737_v24 = vpop.permute.xlu0 %6736 }
 0x28b   :  { %v11234_v30 = vadd.f32 %v4336_v34, %v11097_v6  ;;  %6892 = vmatpush1.bf16.msra.mxu0 %v6757_v19  ;;  %v4377_v12 = vpop.f32.mrf.mxu1  ;;  %8562 = vmatmul.mubr.msk.bf16.vlgmr.msra.gmra.mxu1 %vm198_vm1, %v11226_v41 }
 0x28c   :  { %v11239_v44 = vadd.f32 %v4377_v12, %v11102_v17  ;;  %6933 = vmatpush1.bf16.msra.mxu1 %v6759_v36  ;;  %v4338_v43 = vpop.f32.mrf.mxu0  ;;  %v6735_v46 = vpop.permute.xlu1 %6734  ;;  %6909 = vmatprep.mubr.bf16.mxu0 %v8700_v1 }
 0x28d   :  { %v11243_v48 = vadd.f32 %v4338_v43, %v11106_v16  ;;  %v4379_v56 = vpop.f32.mrf.mxu1  ;;  %6973 = vmatprep.subr.bf16.mxu0 %v6762_v27  ;;  %6950 = vmatprep.mubr.bf16.mxu1 %v8700_v1  ;;  %v6764_v6 = vsel %vm6752_vm13, %v6735_v46, %v6737_v24  ;;  %v6763_v35 = vsel %vm6752_vm13, %v6733_v28, %v6735_v46 }
 0x28e   :  { %v11248_v37 = vadd.f32 %v4379_v56, %v11112_v33  ;;  %v4340_v10 = vpop.f32.mrf.mxu0  ;;  %v6741_v17 = vpop.permute.xlu0 %6740  ;;  %7014 = vmatprep.subr.bf16.mxu1 %v6764_v6  ;;  %v6761_v16 = vsel %vm6752_vm13, %v6729_v0, %v6731_v51  ;;  %v8255_v56 = vld [vmem:[%s11715_s2] sm:$0xff] }
 0x28f   :  { %v4381_v29 = vpop.f32.mrf.mxu1  ;;  %8258 = vperm.xlu0 %8629, %v8255_v56  }
 0x290   :  { %v4341_v58 = vpop.f32.mrf.mxu0  ;;  %v6739_v25 = vpop.permute.xlu1 %6738 }
 0x291   :  { %v4382_v40 = vpop.f32.mrf.mxu1  ;;  %v6766_v4 = vsel %vm6752_vm13, %v6739_v25, %v6741_v17 }
 0x292   :  { %v4418_v15 = vpop.f32.mrf.mxu0  ;;  %8563 = vmatmul.mubr.msk.bf16.vlgmr.msra.gmra.mxu0 %vm198_vm1, %v11226_v41  ;;  %v6745_v11 = vpop.permute.xlu0 %6744 }
 0x293   :  { %v11256_v33 = vadd.f32 %v4418_v15, %v11128_v61  ;;  %6974 = vmatpush1.bf16.msra.mxu0 %v6761_v16  ;;  %v4459_v2 = vpop.f32.mrf.mxu1  ;;  %8564 = vmatmul.mubr.msk.bf16.vlgmr.msra.gmra.mxu1 %vm198_vm1, %v11226_v41 }
 0x294   :  { %v11261_v26 = vadd.f32 %v4459_v2, %v11133_v53  ;;  %7015 = vmatpush1.bf16.msra.mxu1 %v6763_v35  ;;  %v4420_v20 = vpop.f32.mrf.mxu0  ;;  %v6743_v22 = vpop.permute.xlu1 %6742  ;;  %6991 = vmatprep.mubr.bf16.mxu0 %v8700_v1 }
 0x295   :  { %v11265_v39 = vadd.f32 %v4420_v20, %v11137_v57  ;;  %v4461_v50 = vpop.f32.mrf.mxu1  ;;  %7055 = vmatprep.subr.bf16.mxu0 %v6766_v4  ;;  %7032 = vmatprep.mubr.bf16.mxu1 %v8700_v1  ;;  %v6768_v61 = vsel %vm6752_vm13, %v6743_v22, %v6745_v11  ;;  %v6767_v59 = vsel %vm6752_vm13, %v6741_v17, %v6743_v22 }
 0x296   :  { %v11270_v55 = vadd.f32 %v4461_v50, %v11143_v63  ;;  %v4422_v0 = vpop.f32.mrf.mxu0  ;;  %v6749_v53 = vpop.permute.xlu0 %6748  ;;  %7096 = vmatprep.subr.bf16.mxu1 %v6768_v61  ;;  %v6765_v57 = vsel %vm6752_vm13, %v6737_v24, %v6739_v25 }
 0x297   :  { %v4463_v3 = vpop.f32.mrf.mxu1 }
 0x298   :  { %v4423_v38 = vpop.f32.mrf.mxu0  ;;  %v6747_v8 = vpop.permute.xlu1 %6746 }
 0x299   :  { %v4464_v14 = vpop.f32.mrf.mxu1  ;;  %v6770_v28 = vsel %vm6752_vm13, %v6747_v8, %v6749_v53  ;;  %v6769_v6 = vsel %vm6752_vm13, %v6745_v11, %v6747_v8 }
 0x29a   :  { %v4500_v54 = vpop.f32.mrf.mxu0  ;;  %8565 = vmatmul.mubr.msk.bf16.vlgmr.msra.gmra.mxu0 %vm198_vm1, %v11226_v41  ;;  %v7230_v31 = vpop.permute.xlu0 %7229 }
 0x29b   :  { %v11278_v63 = vadd.f32 %v4500_v54, %v11158_v9  ;;  %7056 = vmatpush1.bf16.msra.mxu0 %v6765_v57  ;;  %v4541_v47 = vpop.f32.mrf.mxu1  ;;  %8566 = vmatmul.mubr.msk.bf16.vlgmr.msra.gmra.mxu1 %vm198_vm1, %v11226_v41 }
 0x29c   :  { %v11283_v49 = vadd.f32 %v4541_v47, %v11163_v23  ;;  %7097 = vmatpush1.bf16.msra.mxu1 %v6767_v59  ;;  %v4502_v51 = vpop.f32.mrf.mxu0  ;;  %v6751_v36 = vpop.permute.xlu1 %6750  ;;  %7073 = vmatprep.mubr.bf16.mxu0 %v8700_v1 }
 0x29d   :  { %v11287_v13 = vadd.f32 %v4502_v51, %v11167_v32  ;;  %v4543_v19 = vpop.f32.mrf.mxu1  ;;  %7137 = vmatprep.subr.bf16.mxu0 %v6770_v28  ;;  %7114 = vmatprep.mubr.bf16.mxu1 %v8700_v1  ;;  %v6771_v43 = vsel %vm6752_vm13, %v6749_v53, %v6751_v36  ;;  %v11343_v28 = vld [vmem:[%s11714_s1 + $0x38] sm:$0xf] }
 0x29e   :  { %v11291_v9 = vadd.f32 %v4543_v19, %v11171_v60  ;;  %v4504_v34 = vpop.f32.mrf.mxu0  ;;  %v7234_v24 = vpop.permute.xlu0 %7233  ;;  %7178 = vmatprep.subr.bf16.mxu1 %v6751_v36 }
 0x29f   :  { %v4545_v23 = vpop.f32.mrf.mxu1 }
 0x2a0   :  { %v4505_v27 = vpop.f32.mrf.mxu0  ;;  %v7232_v12 = vpop.permute.xlu1 %7231 }
 0x2a1   :  { %v4546_v46 = vpop.f32.mrf.mxu1  ;;  %v7269_v32 = vsel %vm7267_vm14, %v7230_v31, %v7232_v12  ;;  %v7270_v22 = vsel %vm7267_vm14, %v7232_v12, %v7234_v24 }
 0x2a2   :  { %v4582_v60 = vpop.f32.mrf.mxu0  ;;  %8567 = vmatmul.mubr.msk.bf16.vlgmr.msra.gmra.mxu0 %vm198_vm1, %v11226_v41  ;;  %v7228_v10 = vpop.permute.xlu0 %7227 }
 0x2a3   :  { %v11302_v17 = vadd.f32 %v4582_v60, %v11185_v18  ;;  %7138 = vmatpush1.bf16.msra.mxu0 %v6769_v6  ;;  %v4623_v29 = vpop.f32.mrf.mxu1  ;;  %8568 = vmatmul.mubr.msk.bf16.vlgmr.msra.gmra.mxu1 %vm198_vm1, %v11226_v41  ;;  %v7268_v50 = vsel %vm7267_vm14, %v7228_v10, %v7230_v31 }
 0x2a4   :  { %v11307_v58 = vadd.f32 %v4623_v29, %v11190_v7  ;;  %7179 = vmatpush1.bf16.msra.mxu1 %v6771_v43  ;;  %v4584_v25 = vpop.f32.mrf.mxu0  ;;  %7324 = vmatprep.subr.bf16.mxu0 %v7269_v32  ;;  %v7236_v35 = vpop.permute.xlu1 %7235 }
 0x2a5   :  { %v11310_v40 = vadd.f32 %v4584_v25, %v11193_v5  ;;  %v4625_v16 = vpop.f32.mrf.mxu1  ;;  %7155 = vmatprep.mubr.bf16.mxu0 %v8700_v1  ;;  %7196 = vmatprep.mubr.bf16.mxu1 %v8700_v1  ;;  %v7271_v18 = vsel %vm7267_vm14, %v7234_v24, %v7236_v35 }
 0x2a6   :  { %v11316_v15 = vadd.f32 %v4625_v16, %v11199_v45  ;;  %v4586_v11 = vpop.f32.mrf.mxu0  ;;  %v7240_v7 = vpop.permute.xlu0 %7239  ;;  %7365 = vmatprep.subr.bf16.mxu1 %v7271_v18 }
 0x2a7   :  { %v4627_v4 = vpop.f32.mrf.mxu1 }
 0x2a8   :  { %v4587_v2 = vpop.f32.mrf.mxu0  ;;  %v7238_v20 = vpop.permute.xlu1 %7237 }
 0x2a9   :  { %v4628_v5 = vpop.f32.mrf.mxu1  ;;  %v7273_v53 = vsel %vm7267_vm14, %v7238_v20, %v7240_v7  ;;  %v7272_v19 = vsel %vm7267_vm14, %v7236_v35, %v7238_v20 }
 0x2aa   :  { %v4769_v61 = vpop.f32.mrf.mxu0  ;;  %8569 = vmatmul.mubr.msk.bf16.vlgmr.msra.gmra.mxu0 %vm198_vm1, %v11226_v41  ;;  %v7244_v0 = vpop.permute.xlu0 %7243 }
 0x2ab   :  { %v11324_v45 = vadd.f32 %v4769_v61, %v11207_v62  ;;  %7325 = vmatpush1.bf16.msra.mxu0 %v7268_v50  ;;  %v4810_v3 = vpop.f32.mrf.mxu1  ;;  %8570 = vmatmul.mubr.msk.bf16.vlgmr.msra.gmra.mxu1 %vm198_vm1, %v11226_v41 }
 0x2ac   :  { %v11329_v38 = vadd.f32 %v4810_v3, %v11212_v52  ;;  %7366 = vmatpush1.bf16.msra.mxu1 %v7270_v22  ;;  %v4771_v8 = vpop.f32.mrf.mxu0  ;;  %v7242_v59 = vpop.permute.xlu1 %7241  ;;  %7342 = vmatprep.mubr.bf16.mxu0 %v8700_v1 }
 0x2ad   :  { %v11333_v14 = vadd.f32 %v4771_v8, %v11216_v42  ;;  %v4812_v57 = vpop.f32.mrf.mxu1  ;;  %7406 = vmatprep.subr.bf16.mxu0 %v7273_v53  ;;  %7383 = vmatprep.mubr.bf16.mxu1 %v8700_v1  ;;  %v7275_v62 = vsel %vm7267_vm14, %v7242_v59, %v7244_v0  ;;  %v7274_v51 = vsel %vm7267_vm14, %v7240_v7, %v7242_v59 }
 0x2ae   :  { %v11338_v54 = vadd.f32 %v4812_v57, %v11221_v21  ;;  %v4773_v41 = vpop.f32.mrf.mxu0  ;;  %v7248_v52 = vpop.permute.xlu0 %7247  ;;  %7447 = vmatprep.subr.bf16.mxu1 %v7275_v62 }
 0x2af   :  { %v4814_v31 = vpop.f32.mrf.mxu1 }
 0x2b0   :  { %v4774_v42 = vpop.f32.mrf.mxu0  ;;  %v7246_v47 = vpop.permute.xlu1 %7245 }
 0x2b1   :  { %v4815_v36 = vpop.f32.mrf.mxu1  ;;  %v7277_v24 = vsel %vm7267_vm14, %v7246_v47, %v7248_v52 }
 0x2b2   :  { %v4851_v34 = vpop.f32.mrf.mxu0  ;;  %8572 = vmatmul.mubr.msk.bf16.vlgmr.msra.gmra.mxu0 %vm198_vm1, %v11343_v28  ;;  %v7252_v21 = vpop.permute.xlu0 %7251 }
 0x2b3   :  { %v11351_v23 = vadd.f32 %v4851_v34, %v11234_v30  ;;  %7407 = vmatpush1.bf16.msra.mxu0 %v7272_v19  ;;  %v4892_v27 = vpop.f32.mrf.mxu1  ;;  %8573 = vmatmul.mubr.msk.bf16.vlgmr.msra.gmra.mxu1 %vm198_vm1, %v11343_v28 }
 0x2b4   :  { %v11356_v12 = vadd.f32 %v4892_v27, %v11239_v44  ;;  %7448 = vmatpush1.bf16.msra.mxu1 %v7274_v51  ;;  %v4853_v43 = vpop.f32.mrf.mxu0  ;;  %v7250_v46 = vpop.permute.xlu1 %7249  ;;  %7424 = vmatprep.mubr.bf16.mxu0 %v8700_v1 }
 0x2b5   :  { %v11360_v32 = vadd.f32 %v4853_v43, %v11243_v48  ;;  %v4894_v56 = vpop.f32.mrf.mxu1  ;;  %7488 = vmatprep.subr.bf16.mxu0 %v7277_v24  ;;  %7465 = vmatprep.mubr.bf16.mxu1 %v8700_v1  ;;  %v7279_v30 = vsel %vm7267_vm14, %v7250_v46, %v7252_v21  ;;  %v7278_v35 = vsel %vm7267_vm14, %v7248_v52, %v7250_v46 }
 0x2b6   :  { %v11365_v6 = vadd.f32 %v4894_v56, %v11248_v37  ;;  %v4855_v60 = vpop.f32.mrf.mxu0  ;;  %v7256_v44 = vpop.permute.xlu0 %7255  ;;  %7529 = vmatprep.subr.bf16.mxu1 %v7279_v30  ;;  %v7276_v48 = vsel %vm7267_vm14, %v7244_v0, %v7246_v47 }
 0x2b7   :  { %v4896_v10 = vpop.f32.mrf.mxu1 }
 0x2b8   :  { %v4856_v29 = vpop.f32.mrf.mxu0  ;;  %v7254_v25 = vpop.permute.xlu1 %7253 }
 0x2b9   :  { %v4897_v16 = vpop.f32.mrf.mxu1  ;;  %v7281_v7 = vsel %vm7267_vm14, %v7254_v25, %v7256_v44 }
 0x2ba   :  { %v4933_v18 = vpop.f32.mrf.mxu0  ;;  %8574 = vmatmul.mubr.msk.bf16.vlgmr.msra.gmra.mxu0 %vm198_vm1, %v11343_v28  ;;  %v7260_v11 = vpop.permute.xlu0 %7259 }
 0x2bb   :  { %v11373_v37 = vadd.f32 %v4933_v18, %v11256_v33  ;;  %7489 = vmatpush1.bf16.msra.mxu0 %v7276_v48  ;;  %v4974_v4 = vpop.f32.mrf.mxu1  ;;  %8575 = vmatmul.mubr.msk.bf16.vlgmr.msra.gmra.mxu1 %vm198_vm1, %v11343_v28 }
 0x2bc   :  { %v11378_v2 = vadd.f32 %v4974_v4, %v11261_v26  ;;  %7530 = vmatpush1.bf16.msra.mxu1 %v7278_v35  ;;  %v4935_v20 = vpop.f32.mrf.mxu0  ;;  %v7258_v22 = vpop.permute.xlu1 %7257  ;;  %7506 = vmatprep.mubr.bf16.mxu0 %v8700_v1 }
 0x2bd   :  { %v11382_v5 = vadd.f32 %v4935_v20, %v11265_v39  ;;  %v4976_v50 = vpop.f32.mrf.mxu1  ;;  %7570 = vmatprep.subr.bf16.mxu0 %v7281_v7  ;;  %7547 = vmatprep.mubr.bf16.mxu1 %v8700_v1  ;;  %v7283_v33 = vsel %vm7267_vm14, %v7258_v22, %v7260_v11  ;;  %v7282_v59 = vsel %vm7267_vm14, %v7256_v44, %v7258_v22 }
 0x2be   :  { %v11387_v61 = vadd.f32 %v4976_v50, %v11270_v55  ;;  %v4937_v0 = vpop.f32.mrf.mxu0  ;;  %v7264_v26 = vpop.permute.xlu0 %7263  ;;  %7611 = vmatprep.subr.bf16.mxu1 %v7283_v33  ;;  %v7280_v39 = vsel %vm7267_vm14, %v7252_v21, %v7254_v25 }
 0x2bf   :  { %v4978_v53 = vpop.f32.mrf.mxu1 }
 0x2c0   :  { %v4938_v3 = vpop.f32.mrf.mxu0  ;;  %v7262_v8 = vpop.permute.xlu1 %7261 }
 0x2c1   :  { %v4979_v57 = vpop.f32.mrf.mxu1  ;;  %v7285_v52 = vsel %vm7267_vm14, %v7262_v8, %v7264_v26  ;;  %v7284_v56 = vsel %vm7267_vm14, %v7260_v11, %v7262_v8 }
 0x2c2   :  { %v5015_v62 = vpop.f32.mrf.mxu0  ;;  %8576 = vmatmul.mubr.msk.bf16.vlgmr.msra.gmra.mxu0 %vm198_vm1, %v11343_v28  ;;  %v7745_v41 = vpop.permute.xlu0 %7744 }
 0x2c3   :  { %v11395_v55 = vadd.f32 %v5015_v62, %v11278_v63  ;;  %7571 = vmatpush1.bf16.msra.mxu0 %v7280_v39  ;;  %v5056_v31 = vpop.f32.mrf.mxu1  ;;  %8577 = vmatmul.mubr.msk.bf16.vlgmr.msra.gmra.mxu1 %vm198_vm1, %v11343_v28  ;;  %v11457_v62 = vld [vmem:[%s11714_s1 + $0x3c] sm:$0xf] }
 0x2c4   :  { %v11400_v42 = vadd.f32 %v5056_v31, %v11283_v49  ;;  %7612 = vmatpush1.bf16.msra.mxu1 %v7282_v59  ;;  %v5017_v47 = vpop.f32.mrf.mxu0  ;;  %v7266_v51 = vpop.permute.xlu1 %7265  ;;  %7588 = vmatprep.mubr.bf16.mxu0 %v8700_v1 }
 0x2c5   :  { %v11404_v36 = vadd.f32 %v5017_v47, %v11287_v13  ;;  %v5058_v19 = vpop.f32.mrf.mxu1  ;;  %7652 = vmatprep.subr.bf16.mxu0 %v7285_v52  ;;  %7629 = vmatprep.mubr.bf16.mxu1 %v8700_v1  ;;  %v7286_v43 = vsel %vm7267_vm14, %v7264_v26, %v7266_v51 }
 0x2c6   :  { %v11408_v63 = vadd.f32 %v5058_v19, %v11291_v9  ;;  %v5019_v34 = vpop.f32.mrf.mxu0  ;;  %v7749_v21 = vpop.permute.xlu0 %7748  ;;  %7693 = vmatprep.subr.bf16.mxu1 %v7266_v51 }
 0x2c7   :  { %v5060_v49 = vpop.f32.mrf.mxu1 }
 0x2c8   :  { %v5020_v24 = vpop.f32.mrf.mxu0  ;;  %v7747_v27 = vpop.permute.xlu1 %7746 }
 0x2c9   :  { %v5061_v46 = vpop.f32.mrf.mxu1  ;;  %v7784_v13 = vsel %vm7782_vm15, %v7745_v41, %v7747_v27  ;;  %v7785_v20 = vsel %vm7782_vm15, %v7747_v27, %v7749_v21 }
 0x2ca   :  { %v5097_v30 = vpop.f32.mrf.mxu0  ;;  %8578 = vmatmul.mubr.msk.bf16.vlgmr.msra.gmra.mxu0 %vm198_vm1, %v11343_v28  ;;  %v7743_v44 = vpop.permute.xlu0 %7742 }
 0x2cb   :  { %v11416_v9 = vadd.f32 %v5097_v30, %v11302_v17  ;;  %7653 = vmatpush1.bf16.msra.mxu0 %v7284_v56  ;;  %v5138_v60 = vpop.f32.mrf.mxu1  ;;  %8579 = vmatmul.mubr.msk.bf16.vlgmr.msra.gmra.mxu1 %vm198_vm1, %v11343_v28  ;;  %v7783_v22 = vsel %vm7782_vm15, %v7743_v44, %v7745_v41 }
 0x2cc   :  { %v11421_v10 = vadd.f32 %v5138_v60, %v11307_v58  ;;  %7694 = vmatpush1.bf16.msra.mxu1 %v7286_v43  ;;  %v5099_v29 = vpop.f32.mrf.mxu0  ;;  %7839 = vmatprep.subr.bf16.mxu0 %v7784_v13  ;;  %v7751_v25 = vpop.permute.xlu1 %7750 }
 0x2cd   :  { %v11424_v35 = vadd.f32 %v5099_v29, %v11310_v40  ;;  %v5140_v16 = vpop.f32.mrf.mxu1  ;;  %7670 = vmatprep.mubr.bf16.mxu0 %v8700_v1  ;;  %7711 = vmatprep.mubr.bf16.mxu1 %v8700_v1  ;;  %v7786_v17 = vsel %vm7782_vm15, %v7749_v21, %v7751_v25 }
 0x2ce   :  { %v11430_v48 = vadd.f32 %v5140_v16, %v11316_v15  ;;  %v5101_v18 = vpop.f32.mrf.mxu0  ;;  %7880 = vmatprep.subr.bf16.mxu1 %v7786_v17 }
 0x2cf   :  { %v5142_v58 = vpop.f32.mrf.mxu1  ;;  %v7755_v11 = vpop.permute.xlu0 %7754 }
 0x2d0   :  { %v5102_v7 = vpop.f32.mrf.mxu0  ;;  %v7753_v4 = vpop.permute.xlu1 %7752 }
 0x2d1   :  { %v5143_v40 = vpop.f32.mrf.mxu1  ;;  %v7788_v33 = vsel %vm7782_vm15, %v7753_v4, %v7755_v11  ;;  %v7787_v51 = vsel %vm7782_vm15, %v7751_v25, %v7753_v4 }
 0x2d2   :  { %v5284_v50 = vpop.f32.mrf.mxu0  ;;  %8580 = vmatmul.mubr.msk.bf16.vlgmr.msra.gmra.mxu0 %vm198_vm1, %v11343_v28 }
 0x2d3   :  { %v11438_v15 = vadd.f32 %v5284_v50, %v11324_v45  ;;  %7840 = vmatpush1.bf16.msra.mxu0 %v7783_v22  ;;  %v5325_v0 = vpop.f32.mrf.mxu1  ;;  %8581 = vmatmul.mubr.msk.bf16.vlgmr.msra.gmra.mxu1 %vm198_vm1, %v11343_v28  ;;  %v7759_v26 = vpop.permute.xlu0 %7758 }
 0x2d4   :  { %v11443_v53 = vadd.f32 %v5325_v0, %v11329_v38  ;;  %7881 = vmatpush1.bf16.msra.mxu1 %v7785_v20  ;;  %v5286_v3 = vpop.f32.mrf.mxu0  ;;  %v7757_v8 = vpop.permute.xlu1 %7756  ;;  %7857 = vmatprep.mubr.bf16.mxu0 %v8700_v1 }
 0x2d5   :  { %v11447_v59 = vadd.f32 %v5286_v3, %v11333_v14  ;;  %v5327_v57 = vpop.f32.mrf.mxu1  ;;  %7921 = vmatprep.subr.bf16.mxu0 %v7788_v33  ;;  %7898 = vmatprep.mubr.bf16.mxu1 %v8700_v1  ;;  %v7790_v45 = vsel %vm7782_vm15, %v7757_v8, %v7759_v26  ;;  %v7789_v31 = vsel %vm7782_vm15, %v7755_v11, %v7757_v8 }
 0x2d6   :  { %v11452_v28 = vadd.f32 %v5327_v57, %v11338_v54  ;;  %v5288_v39 = vpop.f32.mrf.mxu0  ;;  %7962 = vmatprep.subr.bf16.mxu1 %v7790_v45 }
 0x2d7   :  { %v5329_v38 = vpop.f32.mrf.mxu1  ;;  %v7763_v41 = vpop.permute.xlu0 %7762 }
 0x2d8   :  { %v5289_v14 = vpop.f32.mrf.mxu0  ;;  %v7761_v52 = vpop.permute.xlu1 %7760 }
 0x2d9   :  { %v5330_v47 = vpop.f32.mrf.mxu1  ;;  %v7792_v54 = vsel %vm7782_vm15, %v7761_v52, %v7763_v41 }
 0x2da   :  { %v5366_v19 = vpop.f32.mrf.mxu0  ;;  %8583 = vmatmul.mubr.msk.bf16.vlgmr.msra.gmra.mxu0 %vm198_vm1, %v11457_v62 }
 0x2db   :  { %v11465_v34 = vadd.f32 %v5366_v19, %v11351_v23  ;;  %7922 = vmatpush1.bf16.msra.mxu0 %v7787_v51  ;;  %v5407_v21 = vpop.f32.mrf.mxu1  ;;  %8584 = vmatmul.mubr.msk.bf16.vlgmr.msra.gmra.mxu1 %vm198_vm1, %v11457_v62  ;;  %v7767_v49 = vpop.permute.xlu0 %7766 }
 0x2dc   :  { %v11470_v24 = vadd.f32 %v5407_v21, %v11356_v12  ;;  %7963 = vmatpush1.bf16.msra.mxu1 %v7789_v31  ;;  %v5368_v27 = vpop.f32.mrf.mxu0  ;;  %v7765_v43 = vpop.permute.xlu1 %7764  ;;  %7939 = vmatprep.mubr.bf16.mxu0 %v8700_v1 }
 0x2dd   :  { %v11474_v46 = vadd.f32 %v5368_v27, %v11360_v32  ;;  %v5409_v13 = vpop.f32.mrf.mxu1  ;;  %8003 = vmatprep.subr.bf16.mxu0 %v7792_v54  ;;  %7980 = vmatprep.mubr.bf16.mxu1 %v8700_v1  ;;  %v7794_v23 = vsel %vm7782_vm15, %v7765_v43, %v7767_v49  ;;  %v7793_v25 = vsel %vm7782_vm15, %v7763_v41, %v7765_v43 }
 0x2de   :  { %v11479_v56 = vadd.f32 %v5409_v13, %v11365_v6  ;;  %v5370_v30 = vpop.f32.mrf.mxu0  ;;  %8044 = vmatprep.subr.bf16.mxu1 %v7794_v23  ;;  %v7791_v32 = vsel %vm7782_vm15, %v7759_v26, %v7761_v52 }
 0x2df   :  { %v5411_v12 = vpop.f32.mrf.mxu1  ;;  %v7771_v60 = vpop.permute.xlu0 %7770 }
 0x2e0   :  { %v5371_v44 = vpop.f32.mrf.mxu0  ;;  %v7769_v29 = vpop.permute.xlu1 %7768 }
 0x2e1   :  { %v5412_v16 = vpop.f32.mrf.mxu1  ;;  %v7796_v18 = vsel %vm7782_vm15, %v7769_v29, %v7771_v60 }
 0x2e2   :  { %v5448_v17 = vpop.f32.mrf.mxu0  ;;  %8585 = vmatmul.mubr.msk.bf16.vlgmr.msra.gmra.mxu0 %vm198_vm1, %v11457_v62 }
 0x2e3   :  { %v11487_v6 = vadd.f32 %v5448_v17, %v11373_v37  ;;  %8004 = vmatpush1.bf16.msra.mxu0 %v7791_v32  ;;  %v5489_v58 = vpop.f32.mrf.mxu1  ;;  %8586 = vmatmul.mubr.msk.bf16.vlgmr.msra.gmra.mxu1 %vm198_vm1, %v11457_v62  ;;  %v7775_v11 = vpop.permute.xlu0 %7774 }
 0x2e4   :  { %v11492_v7 = vadd.f32 %v5489_v58, %v11378_v2  ;;  %8045 = vmatpush1.bf16.msra.mxu1 %v7793_v25  ;;  %v5450_v4 = vpop.f32.mrf.mxu0  ;;  %v7773_v20 = vpop.permute.xlu1 %7772  ;;  %8021 = vmatprep.mubr.bf16.mxu0 %v8700_v1 }
 0x2e5   :  { %v11496_v40 = vadd.f32 %v5450_v4, %v11382_v5  ;;  %v5491_v22 = vpop.f32.mrf.mxu1  ;;  %8085 = vmatprep.subr.bf16.mxu0 %v7796_v18  ;;  %8062 = vmatprep.mubr.bf16.mxu1 %v8700_v1  ;;  %v7798_v37 = vsel %vm7782_vm15, %v7773_v20, %v7775_v11  ;;  %v7797_v3 = vsel %vm7782_vm15, %v7771_v60, %v7773_v20 }
 0x2e6   :  { %v11501_v50 = vadd.f32 %v5491_v22, %v11387_v61  ;;  %v5452_v33 = vpop.f32.mrf.mxu0  ;;  %8126 = vmatprep.subr.bf16.mxu1 %v7798_v37  ;;  %v7795_v5 = vsel %vm7782_vm15, %v7767_v49, %v7769_v29 }
 0x2e7   :  { %v5493_v2 = vpop.f32.mrf.mxu1 }
 0x2e8   :  { %v5453_v0 = vpop.f32.mrf.mxu0  ;;  %v7777_v26 = vpop.permute.xlu1 %7776 }
 0x2e9   :  { %v5494_v8 = vpop.f32.mrf.mxu1  ;;  %v7779_v57 = vpop.permute.xlu0 %7778  ;;  %v7799_v49 = vsel %vm7782_vm15, %v7775_v11, %v7777_v26 }
 0x2ea   :  { %v5530_v45 = vpop.f32.mrf.mxu0  ;;  %8587 = vmatmul.mubr.msk.bf16.vlgmr.msra.gmra.mxu0 %vm198_vm1, %v11457_v62  ;;  %v7800_v39 = vsel %vm7782_vm15, %v7777_v26, %v7779_v57 }
 0x2eb   :  { %v11509_v61 = vadd.f32 %v5530_v45, %v11395_v55  ;;  %8086 = vmatpush1.bf16.msra.mxu0 %v7795_v5  ;;  %v5571_v38 = vpop.f32.mrf.mxu1  ;;  %8588 = vmatmul.mubr.msk.bf16.vlgmr.msra.gmra.mxu1 %vm198_vm1, %v11457_v62 }
 0x2ec   :  { %v11514_v41 = vadd.f32 %v5571_v38, %v11400_v42  ;;  %8127 = vmatpush1.bf16.msra.mxu1 %v7797_v3  ;;  %v5532_v14 = vpop.f32.mrf.mxu0  ;;  %8103 = vmatprep.mubr.bf16.mxu0 %v8700_v1  ;;  %v7781_v52 = vpop.permute.xlu1 %7780 }
 0x2ed   :  { %v11518_v31 = vadd.f32 %v5532_v14, %v11404_v36  ;;  %v5573_v47 = vpop.f32.mrf.mxu1  ;;  %8167 = vmatprep.subr.bf16.mxu0 %v7800_v39  ;;  %8144 = vmatprep.mubr.bf16.mxu1 %v8700_v1  ;;  %v7801_v21 = vsel %vm7782_vm15, %v7779_v57, %v7781_v52 }
 0x2ee   :  { %v11522_v55 = vadd.f32 %v5573_v47, %v11408_v63  ;;  %v5534_v51 = vpop.f32.mrf.mxu0  ;;  %8208 = vmatprep.subr.bf16.mxu1 %v7781_v52 }
 0x2ef   :  { %v5575_v19 = vpop.f32.mrf.mxu1 }
 0x2f0   :  { %v5535_v42 = vpop.f32.mrf.mxu0 }
 0x2f1   :  { %v5576_v54 = vpop.f32.mrf.mxu1 }
 0x2f2   :  { %v5612_v27 = vpop.f32.mrf.mxu0  ;;  %8589 = vmatmul.mubr.msk.bf16.vlgmr.msra.gmra.mxu0 %vm198_vm1, %v11457_v62 }
 0x2f3   :  { %v11529_v36 = vadd.f32 %v5612_v27, %v11416_v9  ;;  %8168 = vmatpush1.bf16.msra.mxu0 %v7799_v49  ;;  %v5653_v43 = vpop.f32.mrf.mxu1  ;;  %8590 = vmatmul.mubr.msk.bf16.vlgmr.msra.gmra.mxu1 %vm198_vm1, %v11457_v62 }
 0x2f4   :  { %v11534_v63 = vadd.f32 %v5653_v43, %v11421_v10  ;;  %v5614_v13 = vpop.f32.mrf.mxu0  ;;  %8209 = vmatpush1.bf16.msra.mxu1 %v7801_v21  ;;  %8185 = vmatprep.mubr.bf16.mxu0 %v8700_v1 }
 0x2f5   :  { %v11538_v23 = vadd.f32 %v5614_v13, %v11424_v35  ;;  %v5655_v30 = vpop.f32.mrf.mxu1  ;;  %8226 = vmatprep.mubr.bf16.mxu1 %v8700_v1 }
 0x2f6   :  { %v5679_v9 = vadd.f32 %v5655_v30, %v11430_v48  ;;  %v5616_v12 = vpop.f32.mrf.mxu0 }
 0x2f7   :  { %v5657_v60 = vpop.f32.mrf.mxu1 }
 0x2f8   :  { %v5617_v44 = vpop.f32.mrf.mxu0 }
 0x2f9   :  { %v5658_v29 = vpop.f32.mrf.mxu1 }
 0x2fa   :  { %v5799_v25 = vpop.f32.mrf.mxu0  ;;  %8591 = vmatmul.mubr.msk.bf16.vlgmr.msra.gmra.mxu0 %vm198_vm1, %v11457_v62 }
 0x2fb   :  { %v6175_v10 = vadd.f32 %v5799_v25, %v11438_v15  ;;  %v5840_v16 = vpop.f32.mrf.mxu1  ;;  %8592 = vmatmul.mubr.msk.bf16.vlgmr.msra.gmra.mxu1 %vm198_vm1, %v11457_v62  ;;  %vm8391_vm1 = vcmask 146436  }
 0x2fc   :  { %v6177_v35 = vadd.f32 %v5840_v16, %v11443_v53  ;;  %v5801_v32 = vpop.f32.mrf.mxu0  ;;  %vm8392_vm2 = vmor %vm8391_vm1, %vm8390_vm0 }
 0x2fd   :  { %v6176_v1 = vadd.f32 %v5801_v32, %v11447_v59  ;;  %v5842_v48 = vpop.f32.mrf.mxu1 }
 0x2fe   :  { %v6178_v17 = vadd.f32 %v5842_v48, %v11452_v28  ;;  %v5803_v18 = vpop.f32.mrf.mxu0 }
 0x2ff   :  { %v5844_v58 = vpop.f32.mrf.mxu1 }
 0x300   :  { %v5804_v11 = vpop.f32.mrf.mxu0 }
 0x301   :  { %v5845_v4 = vpop.f32.mrf.mxu1 }
 0x302   :  { %v5881_v20 = vpop.f32.mrf.mxu0 }
 0x303   :  { %v6179_v22 = vadd.f32 %v5881_v20, %v11465_v34  ;;  %v5922_v15 = vpop.f32.mrf.mxu1 }
 0x304   :  { %v6181_v37 = vadd.f32 %v5922_v15, %v11470_v24  ;;  %v5883_v33 = vpop.f32.mrf.mxu0 }
 0x305   :  { %v6180_v62 = vadd.f32 %v5883_v33, %v11474_v46  ;;  %v5924_v53 = vpop.f32.mrf.mxu1 }
 0x306   :  { %v6182_v2 = vadd.f32 %v5924_v53, %v11479_v56  ;;  %v5885_v59 = vpop.f32.mrf.mxu0 }
 0x307   :  { %v5926_v0 = vpop.f32.mrf.mxu1 }
 0x308   :  { %v5886_v26 = vpop.f32.mrf.mxu0 }
 0x309   :  { %v5927_v28 = vpop.f32.mrf.mxu1 }
 0x30a   :  { %v5963_v3 = vpop.f32.mrf.mxu0 }
 0x30b   :  { %v6183_v8 = vadd.f32 %v5963_v3, %v11487_v6  ;;  %v6004_v57 = vpop.f32.mrf.mxu1 }
 0x30c   :  { %v6185_v5 = vadd.f32 %v6004_v57, %v11492_v7  ;;  %v5965_v34 = vpop.f32.mrf.mxu0 }
 0x30d   :  { %v6184_v45 = vadd.f32 %v5965_v34, %v11496_v40  ;;  %v6006_v24 = vpop.f32.mrf.mxu1 }
 0x30e   :  { %v6186_v39 = vadd.f32 %v6006_v24, %v11501_v50  ;;  %v5967_v46 = vpop.f32.mrf.mxu0 }
 0x30f   :  { %v6008_v38 = vpop.f32.mrf.mxu1 }
 0x310   :  { %v5968_v14 = vpop.f32.mrf.mxu0 }
 0x311   :  { %v6009_v56 = vpop.f32.mrf.mxu1 }
 0x312   :  { %v6045_v52 = vpop.f32.mrf.mxu0 }
 0x313   :  { %v6187_v47 = vadd.f32 %v6045_v52, %v11509_v61  ;;  %v6086_v51 = vpop.f32.mrf.mxu1 }
 0x314   :  { %v6189_v19 = vadd.f32 %v6086_v51, %v11514_v41  ;;  %v6047_v6 = vpop.f32.mrf.mxu0 }
 0x315   :  { %v6188_v42 = vadd.f32 %v6047_v6, %v11518_v31  ;;  %v6088_v7 = vpop.f32.mrf.mxu1 }
 0x316   :  { %v6190_v54 = vadd.f32 %v6088_v7, %v11522_v55  ;;  %v6049_v40 = vpop.f32.mrf.mxu0 }
 0x317   :  { %v6090_v21 = vpop.f32.mrf.mxu1 }
 0x318   :  { %v6050_v49 = vpop.f32.mrf.mxu0 }
 0x319   :  { %v6091_v50 = vpop.f32.mrf.mxu1 }
 0x31a   :  { %v6127_v27 = vpop.f32.mrf.mxu0 }
 0x31b   :  { %v6191_v43 = vadd.f32 %v6127_v27, %v11529_v36  ;;  %v6168_v13 = vpop.f32.mrf.mxu1 }
 0x31c   :  { %v6193_v30 = vadd.f32 %v6168_v13, %v11534_v63  ;;  %v6129_v61 = vpop.f32.mrf.mxu0 }
 0x31d   :  { %v6192_v12 = vadd.f32 %v6129_v61, %v11538_v23  ;;  %v6170_v41 = vpop.f32.mrf.mxu1 }
 0x31e   :  { %v6194_v60 = vadd.f32 %v6170_v41, %v5679_v9  ;;  %v6131_v44 = vpop.f32.mrf.mxu0 }
 0x31f   :  { %v6172_v31 = vpop.f32.mrf.mxu1 }
 0x320   :  { %v6132_v29 = vpop.f32.mrf.mxu0 }
 0x321   :  { %v6173_v25 = vpop.f32.mrf.mxu1 }
 0x322   :  { %v6314_v55 = vpop.f32.mrf.mxu0 }
 0x323   :  { %v6690_v16 = vadd.f32 %v6314_v55, %v6175_v10  ;;  %v6355_v32 = vpop.f32.mrf.mxu1 }
 0x324   :  { %v6692_v48 = vadd.f32 %v6355_v32, %v6177_v35  ;;  %v6316_v18 = vpop.f32.mrf.mxu0 }
 0x325   :  { %v6691_v58 = vadd.f32 %v6316_v18, %v6176_v1  ;;  %v6357_v11 = vpop.f32.mrf.mxu1 }
 0x326   :  { %v6693_v36 = vadd.f32 %v6357_v11, %v6178_v17  ;;  %v6318_v4 = vpop.f32.mrf.mxu0 }
 0x327   :  { %v6359_v20 = vpop.f32.mrf.mxu1 }
 0x328   :  { %v6319_v63 = vpop.f32.mrf.mxu0 }
 0x329   :  { %v6360_v15 = vpop.f32.mrf.mxu1 }
 0x32a   :  { %v6396_v33 = vpop.f32.mrf.mxu0 }
 0x32b   :  { %v6694_v23 = vadd.f32 %v6396_v33, %v6179_v22  ;;  %v6437_v53 = vpop.f32.mrf.mxu1 }
 0x32c   :  { %v6696_v9 = vadd.f32 %v6437_v53, %v6181_v37  ;;  %v6398_v59 = vpop.f32.mrf.mxu0 }
 0x32d   :  { %v6695_v0 = vadd.f32 %v6398_v59, %v6180_v62  ;;  %v6439_v26 = vpop.f32.mrf.mxu1 }
 0x32e   :  { %v6697_v28 = vadd.f32 %v6439_v26, %v6182_v2  ;;  %v6400_v3 = vpop.f32.mrf.mxu0 }
 0x32f   :  { %v6441_v10 = vpop.f32.mrf.mxu1 }
 0x330   :  { %v6401_v57 = vpop.f32.mrf.mxu0 }
 0x331   :  { %v6442_v35 = vpop.f32.mrf.mxu1 }
 0x332   :  { %v6478_v34 = vpop.f32.mrf.mxu0 }
 0x333   :  { %v6698_v1 = vadd.f32 %v6478_v34, %v6183_v8  ;;  %v6519_v24 = vpop.f32.mrf.mxu1 }
 0x334   :  { %v6700_v17 = vadd.f32 %v6519_v24, %v6185_v5  ;;  %v6480_v46 = vpop.f32.mrf.mxu0 }
 0x335   :  { %v6699_v38 = vadd.f32 %v6480_v46, %v6184_v45  ;;  %v6521_v14 = vpop.f32.mrf.mxu1 }
 0x336   :  { %v6701_v56 = vadd.f32 %v6521_v14, %v6186_v39  ;;  %v6482_v52 = vpop.f32.mrf.mxu0 }
 0x337   :  { %v6523_v22 = vpop.f32.mrf.mxu1 }
 0x338   :  { %v6483_v51 = vpop.f32.mrf.mxu0 }
 0x339   :  { %v6524_v37 = vpop.f32.mrf.mxu1 }
 0x33a   :  { %v6560_v6 = vpop.f32.mrf.mxu0 }
 0x33b   :  { %v6702_v62 = vadd.f32 %v6560_v6, %v6187_v47  ;;  %v6601_v7 = vpop.f32.mrf.mxu1 }
 0x33c   :  { %v6704_v2 = vadd.f32 %v6601_v7, %v6189_v19  ;;  %v6562_v40 = vpop.f32.mrf.mxu0 }
 0x33d   :  { %v6703_v21 = vadd.f32 %v6562_v40, %v6188_v42  ;;  %v6603_v49 = vpop.f32.mrf.mxu1 }
 0x33e   :  { %v6705_v50 = vadd.f32 %v6603_v49, %v6190_v54  ;;  %v6564_v27 = vpop.f32.mrf.mxu0 }
 0x33f   :  { %v6605_v8 = vpop.f32.mrf.mxu1 }
 0x340   :  { %v6565_v13 = vpop.f32.mrf.mxu0 }
 0x341   :  { %v6606_v5 = vpop.f32.mrf.mxu1 }
 0x342   :  { %v6642_v61 = vpop.f32.mrf.mxu0 }
 0x343   :  { %v6706_v45 = vadd.f32 %v6642_v61, %v6191_v43  ;;  %v6683_v41 = vpop.f32.mrf.mxu1 }
 0x344   :  { %v6708_v39 = vadd.f32 %v6683_v41, %v6193_v30  ;;  %v6644_v44 = vpop.f32.mrf.mxu0 }
 0x345   :  { %v6707_v31 = vadd.f32 %v6644_v44, %v6192_v12  ;;  %v6685_v29 = vpop.f32.mrf.mxu1 }
 0x346   :  { %v6709_v25 = vadd.f32 %v6685_v29, %v6194_v60  ;;  %v6646_v55 = vpop.f32.mrf.mxu0 }
 0x347   :  { %v6687_v47 = vpop.f32.mrf.mxu1 }
 0x348   :  { %v6647_v32 = vpop.f32.mrf.mxu0 }
 0x349   :  { %v6688_v19 = vpop.f32.mrf.mxu1 }
 0x34a   :  { %v6829_v18 = vpop.f32.mrf.mxu0 }
 0x34b   :  { %v11565_v42 = vadd.f32 %v6829_v18, %v6690_v16  ;;  %v6870_v54 = vpop.f32.mrf.mxu1 }
 0x34c   :  { %v11567_v11 = vadd.f32 %v6870_v54, %v6692_v48  ;;  %v6831_v4 = vpop.f32.mrf.mxu0 }
 0x34d   :  { %v11569_v20 = vadd.f32 %v6831_v4, %v6691_v58  ;;  %v6872_v43 = vpop.f32.mrf.mxu1 }
 0x34e   :  { %v11571_v63 = vadd.f32 %v6872_v43, %v6693_v36  ;;  %v6833_v30 = vpop.f32.mrf.mxu0 }
 0x34f   :  { %v6874_v12 = vpop.f32.mrf.mxu1 }
 0x350   :  { %v6834_v15 = vpop.f32.mrf.mxu0 }
 0x351   :  { %v6875_v60 = vpop.f32.mrf.mxu1 }
 0x352   :  { %v6911_v33 = vpop.f32.mrf.mxu0 }
 0x353   :  { %v11573_v53 = vadd.f32 %v6911_v33, %v6694_v23  ;;  %v6952_v59 = vpop.f32.mrf.mxu1 }
 0x354   :  { %v11575_v26 = vadd.f32 %v6952_v59, %v6696_v9  ;;  %v6913_v16 = vpop.f32.mrf.mxu0 }
 0x355   :  { %v11577_v3 = vadd.f32 %v6913_v16, %v6695_v0  ;;  %v6954_v48 = vpop.f32.mrf.mxu1 }
 0x356   :  { %v11579_v10 = vadd.f32 %v6954_v48, %v6697_v28  ;;  %v6915_v58 = vpop.f32.mrf.mxu0 }
 0x357   :  { %v6956_v57 = vpop.f32.mrf.mxu1 }
 0x358   :  { %v6916_v36 = vpop.f32.mrf.mxu0 }
 0x359   :  { %v6957_v35 = vpop.f32.mrf.mxu1 }
 0x35a   :  { %v6993_v34 = vpop.f32.mrf.mxu0 }
 0x35b   :  { %v11581_v24 = vadd.f32 %v6993_v34, %v6698_v1  ;;  %v7034_v46 = vpop.f32.mrf.mxu1 }
 0x35c   :  { %v11583_v14 = vadd.f32 %v7034_v46, %v6700_v17  ;;  %v6995_v23 = vpop.f32.mrf.mxu0 }
 0x35d   :  { %v11585_v52 = vadd.f32 %v6995_v23, %v6699_v38  ;;  %v7036_v9 = vpop.f32.mrf.mxu1 }
 0x35e   :  { %v11587_v22 = vadd.f32 %v7036_v9, %v6701_v56  ;;  %v6997_v0 = vpop.f32.mrf.mxu0 }
 0x35f   :  { %v7038_v51 = vpop.f32.mrf.mxu1 }
 0x360   :  { %v6998_v28 = vpop.f32.mrf.mxu0 }
 0x361   :  { %v7039_v37 = vpop.f32.mrf.mxu1 }
 0x362   :  { %v7075_v6 = vpop.f32.mrf.mxu0 }
 0x363   :  { %v11589_v7 = vadd.f32 %v7075_v6, %v6702_v62  ;;  %v7116_v40 = vpop.f32.mrf.mxu1 }
 0x364   :  { %v11591_v49 = vadd.f32 %v7116_v40, %v6704_v2  ;;  %v7077_v1 = vpop.f32.mrf.mxu0 }
 0x365   :  { %v11593_v27 = vadd.f32 %v7077_v1, %v6703_v21  ;;  %v7118_v17 = vpop.f32.mrf.mxu1 }
 0x366   :  { %v11595_v8 = vadd.f32 %v7118_v17, %v6705_v50  ;;  %v7079_v38 = vpop.f32.mrf.mxu0 }
 0x367   :  { %v7120_v13 = vpop.f32.mrf.mxu1 }
 0x368   :  { %v7080_v56 = vpop.f32.mrf.mxu0 }
 0x369   :  { %v7121_v5 = vpop.f32.mrf.mxu1 }
 0x36a   :  { %v7157_v61 = vpop.f32.mrf.mxu0 }
 0x36b   :  { %v11597_v41 = vadd.f32 %v7157_v61, %v6706_v45  ;;  %v7198_v44 = vpop.f32.mrf.mxu1 }
 0x36c   :  { %v11599_v29 = vadd.f32 %v7198_v44, %v6708_v39  ;;  %v7159_v62 = vpop.f32.mrf.mxu0 }
 0x36d   :  { %v11601_v55 = vadd.f32 %v7159_v62, %v6707_v31  ;;  %v7200_v2 = vpop.f32.mrf.mxu1 }
 0x36e   :  { %v11603_v47 = vadd.f32 %v7200_v2, %v6709_v25  ;;  %v7161_v21 = vpop.f32.mrf.mxu0 }
 0x36f   :  { %v7202_v32 = vpop.f32.mrf.mxu1 }
 0x370   :  { %v7162_v50 = vpop.f32.mrf.mxu0 }
 0x371   :  { %v7203_v19 = vpop.f32.mrf.mxu1 }
 0x372   :  { %v7344_v18 = vpop.f32.mrf.mxu0  ;;  %v11631_v19 = vpop.permute.xlu0 %8258 }
 0x373   :  { %v7385_v54 = vpop.f32.mrf.mxu1  ;;  %v7720_v2 = vadd.f32 %v7344_v18, %v11565_v42 }
 0x374   :  { %v7346_v4 = vpop.f32.mrf.mxu0  ;;  %v7722_v32 = vadd.f32 %v7385_v54, %v11567_v11 }
 0x375   :  { %v7387_v43 = vpop.f32.mrf.mxu1 }
 0x376   :  { %v7348_v30 = vpop.f32.mrf.mxu0 }
 0x377   :  { %v7389_v45 = vpop.f32.mrf.mxu1  ;;  %v7721_v30 = vadd.f32 %v7346_v4, %v11569_v20 }
 0x378   :  { %v7349_v12 = vpop.f32.mrf.mxu0 }
 0x379   :  { %v7390_v15 = vpop.f32.mrf.mxu1 }
 0x37a   :  { %v7426_v39 = vpop.f32.mrf.mxu0  ;;  %v7723_v15 = vadd.f32 %v7387_v43, %v11571_v63 }
 0x37b   :  { %v7467_v60 = vpop.f32.mrf.mxu1  ;;  %v7724_v4 = vadd.f32 %v7426_v39, %v11573_v53 }
 0x37c   :  { %v7428_v33 = vpop.f32.mrf.mxu0 }
 0x37d   :  { %v7469_v31 = vpop.f32.mrf.mxu1 }
 0x37e   :  { %v7430_v59 = vpop.f32.mrf.mxu0 }
 0x37f   :  { %v7471_v16 = vpop.f32.mrf.mxu1 }
 0x380   :  { %v7431_v25 = vpop.f32.mrf.mxu0 }
 0x381   :  { %v7472_v48 = vpop.f32.mrf.mxu1 }
 0x382   :  { %v11605_v58 = vpop.f32.mrf.mxu0 }
 0x383   :  { %v11607_v57 = vpop.f32.mrf.mxu1 }
 0x384   :  { %v11609_v36 = vpop.f32.mrf.mxu0 }
 0x385   :  { %v11611_v35 = vpop.f32.mrf.mxu1 }
 0x386   :  { %v7512_v34 = vpop.f32.mrf.mxu0 }
 0x387   :  { %v7553_v46 = vpop.f32.mrf.mxu1 }
 0x388   :  { %v7513_v23 = vpop.f32.mrf.mxu0 }
 0x389   :  { %v7554_v9 = vpop.f32.mrf.mxu1 }
 0x38a   :  { %v11613_v0 = vpop.f32.mrf.mxu0 }
 0x38b   :  { %v11615_v51 = vpop.f32.mrf.mxu1 }
 0x38c   :  { %v11617_v28 = vpop.f32.mrf.mxu0 }
 0x38d   :  { %v11619_v37 = vpop.f32.mrf.mxu1 }
 0x38e   :  { %v7594_v6 = vpop.f32.mrf.mxu0 }
 0x38f   :  { %v7635_v40 = vpop.f32.mrf.mxu1  ;;  %v7726_v6 = vadd.f32 %v7467_v60, %v11575_v26 }
 0x390   :  { %v7595_v1 = vpop.f32.mrf.mxu0 }
 0x391   :  { %v7636_v17 = vpop.f32.mrf.mxu1 }
 0x392   :  { %v11621_v38 = vpop.f32.mrf.mxu0 }
 0x393   :  { %v11623_v13 = vpop.f32.mrf.mxu1 }
 0x394   :  { %v11625_v56 = vpop.f32.mrf.mxu0 }
 0x395   :  { %v11627_v5 = vpop.f32.mrf.mxu1 }
 0x396   :  { %v7676_v61 = vpop.f32.mrf.mxu0 }
 0x397   :  { %v7717_v44 = vpop.f32.mrf.mxu1  ;;  %v7725_v61 = vadd.f32 %v7428_v33, %v11577_v3 }
 0x398   :  { %v7677_v62 = vpop.f32.mrf.mxu0 }
 0x399   :  { %v7718_v21 = vpop.f32.mrf.mxu1 }
 0x39a   :  { %v7859_v50 = vpop.f32.mrf.mxu0  ;;  %v7727_v21 = vadd.f32 %v7469_v31, %v11579_v10 }
 0x39b   :  { %v8235_v45 = vadd.f32 %v7859_v50, %v7720_v2  ;;  %v7900_v12 = vpop.f32.mrf.mxu1 }
 0x39c   :  { %v8237_v59 = vadd.f32 %v7900_v12, %v7722_v32  ;;  %v7861_v16 = vpop.f32.mrf.mxu0 }
 0x39d   :  { %v8236_v25 = vadd.f32 %v7861_v16, %v7721_v30  ;;  %v7902_v48 = vpop.f32.mrf.mxu1  ;;  %v8261_v34 = vadd.f32 %v11631_v19, %v8235_v45 }
 0x39e   :  { %v8238_v46 = vadd.f32 %v7902_v48, %v7723_v15  ;;  %v8263_v42 = vadd.f32 %v11631_v19, %v8237_v59  ;;  %v7863_v18 = vpop.f32.mrf.mxu0  ;;  %v7728_v15 = vadd.f32 %v11605_v58, %v11581_v24  ;;  %v7730_v48 = vadd.f32 %v11607_v57, %v11583_v14 }
 0x39f   :  { %v8262_v11 = vadd.f32 %v11631_v19, %v8236_v25  ;;  %v7904_v54 = vpop.f32.mrf.mxu1  ;;  %v8281_v9 = vmax.f32 %v8261_v34, 0.0  ;;  %v7729_v18 = vadd.f32 %v11609_v36, %v11585_v52 }
 0x3a0   :  { %v8264_v23 = vadd.f32 %v11631_v19, %v8238_v46  ;;  %v7864_v20 = vpop.f32.mrf.mxu0  ;;  %v8283_v40 = vmax.f32 %v8263_v42, 0.0 }
 0x3a1   :  { %v8282_v63 = vmax.f32 %v8262_v11, 0.0  ;;  %v7905_v43 = vpop.f32.mrf.mxu1  ;;  %v7731_v20 = vadd.f32 %v11611_v35, %v11587_v22 }
 0x3a2   :  { %v8284_v1 = vmax.f32 %v8264_v23, 0.0  ;;  %v7941_v17 = vpop.f32.mrf.mxu0 }
 0x3a3   :  { %v8603_v44 = vpack.c.bf16 %v8282_v63, %v8281_v9  ;;  %v8239_v62 = vadd.f32 %v7941_v17, %v7724_v4  ;;  %v7982_v2 = vpop.f32.mrf.mxu1 }
 0x3a4   :  { %v8604_v32 = vpack.c.bf16 %v8284_v1, %v8283_v40  ;;  %v8241_v50 = vadd.f32 %v7982_v2, %v7726_v6  ;;  %v7943_v30 = vpop.f32.mrf.mxu0  ;;  %v7732_v40 = vadd.f32 %v11613_v0, %v11589_v7 }
 0x3a5   :  { %8381 = vst [vmem:[%s11716_s3] sm:$0xff] %v8603_v44  ;;  %v8265_v53 = vadd.f32 %v11631_v19, %v8239_v62  ;;  %v8240_v26 = vadd.f32 %v7943_v30, %v7725_v61  ;;  %v7984_v39 = vpop.f32.mrf.mxu1  ;;  %v7734_v44 = vadd.f32 %v11615_v51, %v11591_v49 }
 0x3a6   :  { %8382 = vst [vmem:[%s11716_s3 + $0x8] sm:$0xff] %v8604_v32  ;;  %v8267_v3 = vadd.f32 %v11631_v19, %v8241_v50  ;;  %v8242_v60 = vadd.f32 %v7984_v39, %v7727_v21  ;;  %v7945_v33 = vpop.f32.mrf.mxu0  ;;  %v7733_v32 = vadd.f32 %v11617_v28, %v11593_v27 }
 0x3a7   :  { %v8266_v10 = vadd.f32 %v11631_v19, %v8240_v26  ;;  %v7986_v31 = vpop.f32.mrf.mxu1  ;;  %v8285_v59 = vmax.f32 %v8265_v53, 0.0  ;;  %v7735_v26 = vadd.f32 %v11619_v37, %v11595_v8 }
 0x3a8   :  { %v8268_v45 = vadd.f32 %v11631_v19, %v8242_v60  ;;  %v7946_v12 = vpop.f32.mrf.mxu0  ;;  %v8287_v34 = vmax.f32 %v8267_v3, 0.0  ;;  %v7736_v31 = vadd.f32 %v11621_v38, %v11597_v41 }
 0x3a9   :  { %v8286_v16 = vmax.f32 %v8266_v10, 0.0  ;;  %v7987_v25 = vpop.f32.mrf.mxu1 }
 0x3aa   :  { %v8288_v46 = vmax.f32 %v8268_v45, 0.0  ;;  %v8023_v42 = vpop.f32.mrf.mxu0 }
 0x3ab   :  { %v8605_v11 = vpack.c.bf16 %v8286_v16, %v8285_v59  ;;  %v8243_v54 = vadd.f32 %v8023_v42, %v7728_v15  ;;  %v8064_v23 = vpop.f32.mrf.mxu1  ;;  %v7738_v59 = vadd.f32 %v11623_v13, %v11599_v29 }
 0x3ac   :  { %v8606_v4 = vpack.c.bf16 %v8288_v46, %v8287_v34  ;;  %v8245_v24 = vadd.f32 %v8064_v23, %v7730_v48  ;;  %v8025_v58 = vpop.f32.mrf.mxu0  ;;  %v7737_v34 = vadd.f32 %v11625_v56, %v11601_v55 }
 0x3ad   :  { %8383 = vst [vmem:[%s11716_s3 + $0x10] sm:$0xff] %v8605_v11  ;;  %v8269_v14 = vadd.f32 %v11631_v19, %v8243_v54  ;;  %v8244_v57 = vadd.f32 %v8025_v58, %v7729_v18  ;;  %v8066_v9 = vpop.f32.mrf.mxu1  ;;  %v7739_v11 = vadd.f32 %v11627_v5, %v11603_v47 }
 0x3ae   :  { %8384 = vst [vmem:[%s11716_s3 + $0x18] sm:$0xff] %v8606_v4  ;;  %v8271_v52 = vadd.f32 %v11631_v19, %v8245_v24  ;;  %v8246_v36 = vadd.f32 %v8066_v9, %v7731_v20  ;;  %v8027_v63 = vpop.f32.mrf.mxu0 }
 0x3af   :  { %v8270_v22 = vadd.f32 %v11631_v19, %v8244_v57  ;;  %v8068_v35 = vpop.f32.mrf.mxu1  ;;  %v8289_v1 = vmax.f32 %v8269_v14, 0.0 }
 0x3b0   :  { %v8272_v43 = vadd.f32 %v11631_v19, %v8246_v36  ;;  %v8028_v6 = vpop.f32.mrf.mxu0  ;;  %v8291_v62 = vmax.f32 %v8271_v52, 0.0 }
 0x3b1   :  { %v8290_v17 = vmax.f32 %v8270_v22, 0.0  ;;  %v8069_v61 = vpop.f32.mrf.mxu1 }
 0x3b2   :  { %v8292_v2 = vmax.f32 %v8272_v43, 0.0  ;;  %v8105_v21 = vpop.f32.mrf.mxu0 }
 0x3b3   :  { %v8607_v50 = vpack.c.bf16 %v8290_v17, %v8289_v1  ;;  %v8247_v30 = vadd.f32 %v8105_v21, %v7732_v40  ;;  %v8146_v53 = vpop.f32.mrf.mxu1 }
 0x3b4   :  { %v8608_v39 = vpack.c.bf16 %v8292_v2, %v8291_v62  ;;  %v8249_v7 = vadd.f32 %v8146_v53, %v7734_v44  ;;  %v8107_v0 = vpop.f32.mrf.mxu0 }
 0x3b5   :  { %8385 = vst [vmem:[%s11716_s3 + $0x20] sm:$0xff] %v8607_v50  ;;  %v8273_v49 = vadd.f32 %v11631_v19, %v8247_v30  ;;  %v8248_v51 = vadd.f32 %v8107_v0, %v7733_v32  ;;  %v8148_v3 = vpop.f32.mrf.mxu1 }
 0x3b6   :  { %8386 = vst [vmem:[%s11716_s3 + $0x28] sm:$0xff] %v8608_v39  ;;  %v8275_v27 = vadd.f32 %v11631_v19, %v8249_v7  ;;  %v8250_v28 = vadd.f32 %v8148_v3, %v7735_v26  ;;  %v8109_v60 = vpop.f32.mrf.mxu0 }
 0x3b7   :  { %v8274_v8 = vadd.f32 %v11631_v19, %v8248_v51  ;;  %v8150_v37 = vpop.f32.mrf.mxu1  ;;  %v8293_v45 = vmax.f32 %v8273_v49, 0.0 }
 0x3b8   :  { %v8276_v33 = vadd.f32 %v11631_v19, %v8250_v28  ;;  %v8110_v10 = vpop.f32.mrf.mxu0  ;;  %v8295_v16 = vmax.f32 %v8275_v27, 0.0 }
 0x3b9   :  { %v8294_v12 = vmax.f32 %v8274_v8, 0.0  ;;  %v8151_v15 = vpop.f32.mrf.mxu1 }
 0x3ba   :  { %v8296_v25 = vmax.f32 %v8276_v33, 0.0  ;;  %v8187_v48 = vpop.f32.mrf.mxu0 }
 0x3bb   :  { %v8609_v46 = vpack.c.bf16 %v8294_v12, %v8293_v45  ;;  %v8251_v42 = vadd.f32 %v8187_v48, %v7736_v31  ;;  %v8228_v18 = vpop.f32.mrf.mxu1 }
 0x3bc   :  { %v8610_v54 = vpack.c.bf16 %v8296_v25, %v8295_v16  ;;  %v8253_v41 = vadd.f32 %v8228_v18, %v7738_v59  ;;  %v8189_v38 = vpop.f32.mrf.mxu0 }
 0x3bd   :  { %8387 = vst [vmem:[%s11716_s3 + $0x30] sm:$0xff] %v8609_v46  ;;  %v8277_v29 = vadd.f32 %v11631_v19, %v8251_v42  ;;  %v8252_v13 = vadd.f32 %v8189_v38, %v7737_v34  ;;  %v8230_v23 = vpop.f32.mrf.mxu1 }
 0x3be   :  { %8388 = vst [vmem:[%s11716_s3 + $0x38] sm:$0xff] %v8610_v54  ;;  %v8279_v55 = vadd.f32 %v11631_v19, %v8253_v41  ;;  %v8254_v56 = vadd.f32 %v8230_v23, %v7739_v11  ;;  %v8191_v20 = vpop.f32.mrf.mxu0 }
 0x3bf   :  { %v8278_v47 = vadd.f32 %v11631_v19, %v8252_v13  ;;  %v8232_v5 = vpop.f32.mrf.mxu1  ;;  %v8297_v58 = vmax.f32 %v8277_v29, 0.0 }
 0x3c0   :  { %v8280_v4 = vadd.f32 %v11631_v19, %v8254_v56  ;;  %v8192_v24 = vpop.f32.mrf.mxu0  ;;  %v8299_v9 = vmax.f32 %v8279_v55, 0.0 }
 0x3c1   :  { %v8298_v14 = vmax.f32 %v8278_v47, 0.0  ;;  %v8233_v57 = vpop.f32.mrf.mxu1 }
 0x3c2   :  { %v8300_v52 = vmax.f32 %v8280_v4, 0.0 }
 0x3c3   :  { %v8611_v36 = vpack.c.bf16 %v8298_v14, %v8297_v58 }
 0x3c4   :  { %v8612_v63 = vpack.c.bf16 %v8300_v52, %v8299_v9 }
 0x3c5   :  { %8389 = vst [vmem:[%s11716_s3 + $0x40] sm:$0xff] %v8611_v36 }
 0x3c6   :  { %8393 = vst.msk [vmem:[%s11716_s3 + $0x48] sm:$0xff] %vm8392_vm2, %v8612_v63 }

// kernel: _lambda_.4
= control target key start
LH: loop header
LB: loop body
LE: loop exit
PB: predicated region body
PF: predicated region fallthrough
CT: control target
= control target key end

     0   :  { %s957_s16 = smov 127   ;;  %v958_v5 = vmov 0   ;;  %s959_s6 = smov 111   ;;  %vm99_vm0 = vcmask 1039360   ;;  %vm118_vm1 = vcmask 261120   ;;  %v961_v29 = vmov 0.0   ;;  %s1179_s0 = inlined_call_operand.vmem [shape: bf16[32,596], index: 0, kind: input, shape index: {}]   ;;  %s1180_s1 = inlined_call_operand.vmem [shape: bf16[4,16,32], index: 1, kind: input, shape index: {}]   ;;  %s1181_s2 = inlined_call_operand.vmem [shape: f32[16,1], index: 2, kind: input, shape index: {}]   ;;  %s1182_s3 = inlined_call_operand.vmem [shape: bf16[16,578], index: 3, kind: output, shape index: {}]  }
   0x1   :  { %v986_v0 = vld [vmem:[%s1179_s0 + $0x2c] ss:$20 sps:$4 sm:$0xff]   ;;  %v991_v1 = vld [vmem:[%s1179_s0 + $0x28] ss:$20 sps:$4 sm:$0xff]   ;;  %v997_v2 = vld [vmem:[%s1179_s0 + $0x30] ss:$20 sps:$4 sm:$0xff]   ;;  %154 = vmatprep.mubr.bf16.mxu0 %v958_v5  ;;  %197 = vmatprep.mubr.bf16.mxu1 %v958_v5 }
   0x2   :  { %91 = vrot.lane.b32.xlu0 %v986_v0, %s957_s16  ;;  %89 = vrot.lane.b32.xlu1 %v991_v1, %s957_s16  ;;  %v1003_v3 = vld [vmem:[%s1179_s0 + $0x34] ss:$20 sps:$4 sm:$0xff]   ;;  %v1009_v4 = vld [vmem:[%s1179_s0 + $0x38] ss:$20 sps:$4 sm:$0xff]   ;;  %vm962_vm2 = vmmov 0   ;;  %vm422_vm3 = vcmask 908288  }
   0x3   :  { %v1016_v6 = vld [vmem:[%s1179_s0 + $0x4] ss:$20 sps:$4 sm:$0xff]   ;;  %937 = vset.pattern.permute.xlu0 %v958_v5  ;;  %938 = vset.pattern.permute.xlu1 %v958_v5  ;;  %v1024_v7 = vld [vmem:[%s1179_s0 + $0x8] ss:$20 sps:$4 sm:$0xff]   ;;  %v1031_v8 = vld [vmem:[%s1179_s0] ss:$20 sps:$4 sm:$0xff]  }
   0x4   :  { %v1037_v9 = vld [vmem:[%s1179_s0 + $0xc] ss:$20 sps:$4 sm:$0xff]   ;;  %v1043_v10 = vld [vmem:[%s1179_s0 + $0x10] ss:$20 sps:$4 sm:$0xff]   ;;  %s960_s0 = smov 110   ;;  %vm609_vm4 = vcmask 900096  }
   0x5   :  { %v768_v11 = vld [vmem:[%s1181_s2] sm:$0xff]  ;;  %v769_v12 = vld [vmem:[%s1181_s2 + $0x8] sm:$0xff]  ;;  %v955_v49 = vld [vmem:[%s1180_s1 + $0x10] sm:$0xff]   ;;  %vm834_vm5 = vcmask 535552  }
   0x6   :  { %93 = vrot.lane.b32.xlu0 %v997_v2, %s957_s16  ;;  %95 = vrot.lane.b32.xlu1 %v1003_v3, %s957_s16  ;;  %v953_v27 = vld [vmem:[%s1180_s1 + $0x8] sm:$0xff]   ;;  %v954_v37 = vld [vmem:[%s1180_s1] sm:$0xff]  }
   0x7   :  { %v956_v63 = vld [vmem:[%s1180_s1 + $0x18] sm:$0xff]  }
   0xa   :  { %97 = vrot.lane.b32.xlu0 %v1009_v4, %s957_s16  ;;  %81 = vrot.lane.b32.xlu1 %v1016_v6, %s957_s16 }
   0xe   :  { %83 = vrot.lane.b32.xlu0 %v1024_v7, %s957_s16  ;;  %79 = vrot.lane.b32.xlu1 %v1031_v8, %s957_s16 }
  0x12   :  { %85 = vrot.lane.b32.xlu0 %v1037_v9, %s957_s16  ;;  %87 = vrot.lane.b32.xlu1 %v1043_v10, %s957_s16 }
  0x16   :  { %414 = vrot.lane.b32.xlu0 %v986_v0, %s959_s6  ;;  %416 = vrot.lane.b32.xlu1 %v997_v2, %s959_s6 }
  0x1a   :  { %412 = vrot.lane.b32.xlu0 %v991_v1, %s959_s6  ;;  %418 = vrot.lane.b32.xlu1 %v1003_v3, %s959_s6 }
  0x1e   :  { %420 = vrot.lane.b32.xlu0 %v1009_v4, %s959_s6  ;;  %404 = vrot.lane.b32.xlu1 %v1016_v6, %s959_s6 }
  0x22   :  { %406 = vrot.lane.b32.xlu0 %v1024_v7, %s959_s6  ;;  %402 = vrot.lane.b32.xlu1 %v1031_v8, %s959_s6 }
  0x26   :  { %408 = vrot.lane.b32.xlu0 %v1037_v9, %s959_s6  ;;  %410 = vrot.lane.b32.xlu1 %v1043_v10, %s959_s6 }
  0x2a   :  { %601 = vrot.lane.b32.xlu0 %v986_v0, %s960_s0  ;;  %603 = vrot.lane.b32.xlu1 %v997_v2, %s960_s0 }
  0x2e   :  { %599 = vrot.lane.b32.xlu0 %v991_v1, %s960_s0  ;;  %591 = vrot.lane.b32.xlu1 %v1016_v6, %s960_s0 }
  0x32   :  { %593 = vrot.lane.b32.xlu0 %v1024_v7, %s960_s0  ;;  %589 = vrot.lane.b32.xlu1 %v1031_v8, %s960_s0 }
  0x36   :  { %605 = vrot.lane.b32.xlu0 %v1003_v3, %s960_s0  ;;  %607 = vrot.lane.b32.xlu1 %v1009_v4, %s960_s0 }
  0x3a   :  { %595 = vrot.lane.b32.xlu0 %v1037_v9, %s960_s0  ;;  %597 = vrot.lane.b32.xlu1 %v1043_v10, %s960_s0 }
  0x3e   :  { %772 = vperm.xlu0 %937, %v768_v11   ;;  %777 = vperm.xlu1 %938, %v769_v12  }
  0x74   :  { %v92_v13 = vpop.permute.xlu0 %91  ;;  %v90_v14 = vpop.permute.xlu1 %89 }
  0x75   :  { %v104_v18 = vsel %vm99_vm0, %v90_v14, %v92_v13 }
  0x78   :  { %v94_v15 = vpop.permute.xlu0 %93  ;;  %v96_v16 = vpop.permute.xlu1 %95 }
  0x79   :  { %v105_v17 = vsel %vm99_vm0, %v92_v13, %v94_v15  ;;  %v106_v22 = vsel %vm99_vm0, %v94_v15, %v96_v16 }
  0x7a   :  { %134 = vmatprep.subr.bf16.mxu0 %v105_v17 }
  0x7b   :  { %135 = vmatpush1.bf16.msra.mxu0 %v104_v18 }
  0x7c   :  { %v98_v19 = vpop.permute.xlu0 %97  ;;  %v82_v20 = vpop.permute.xlu1 %81 }
  0x7d   :  { %v107_v21 = vsel %vm99_vm0, %v96_v16, %v98_v19 }
  0x7e   :  { %177 = vmatprep.subr.bf16.mxu1 %v107_v21 }
  0x7f   :  { %178 = vmatpush1.bf16.msra.mxu1 %v106_v22 }
  0x80   :  { %v84_v23 = vpop.permute.xlu0 %83  ;;  %v80_v24 = vpop.permute.xlu1 %79 }
  0x81   :  { %v101_v25 = vsel %vm99_vm0, %v82_v20, %v84_v23  ;;  %v100_v26 = vsel %vm99_vm0, %v80_v24, %v82_v20 }
  0x82   :  { %136 = vmatprep.subr.bf16.mxu0 %v101_v25 }
  0x83   :  { %137 = vmatpush1.bf16.msra.mxu0 %v100_v26 }
  0x84   :  { %v86_v28 = vpop.permute.xlu0 %85  ;;  %899 = vmatprep.subr.bf16.mxu0 %v961_v29  ;;  %v88_v30 = vpop.permute.xlu1 %87 }
  0x85   :  { %v102_v31 = vsel %vm99_vm0, %v84_v23, %v86_v28  ;;  %v103_v32 = vsel %vm99_vm0, %v86_v28, %v88_v30 }
  0x86   :  { %856 = vmatmul.mubr.msk.bf16.vlgmr.msra.gmra.mxu0 %vm118_vm1, %v953_v27  ;;  %179 = vmatprep.subr.bf16.mxu1 %v103_v32 }
  0x87   :  { %900 = vmatpush3.bf16.msra.mxu0 %v98_v19  ;;  %180 = vmatpush1.bf16.msra.mxu1 %v102_v31 }
  0x88   :  { %v415_v33 = vpop.permute.xlu0 %414  ;;  %901 = vmatprep.subr.bf16.mxu0 %v961_v29  ;;  %v417_v34 = vpop.permute.xlu1 %416  ;;  %279 = vmatprep.subr.bf16.mxu1 %v986_v0 }
  0x89   :  { %903 = vmatprep.mubr.msk.bf16.mxu0 %vm962_vm2, %v961_v29  ;;  %v428_v40 = vsel %vm422_vm3, %v415_v33, %v417_v34 }
  0x8a   :  { %857 = vmatmul.mubr.msk.bf16.vlgmr.msra.gmra.mxu1 %vm118_vm1, %v953_v27 }
  0x8b   :  { %902 = vmatpush3.bf16.msra.mxu0 %v88_v30  ;;  %280 = vmatpush1.bf16.msra.mxu1 %v991_v1 }
  0x8c   :  { %v413_v35 = vpop.permute.xlu0 %412  ;;  %322 = vmatprep.subr.bf16.mxu0 %v1003_v3  ;;  %v419_v36 = vpop.permute.xlu1 %418  ;;  %281 = vmatprep.subr.bf16.mxu1 %v1016_v6 }
  0x8d   :  { %299 = vmatprep.mubr.bf16.mxu1 %v958_v5  ;;  %v427_v43 = vsel %vm422_vm3, %v413_v35, %v415_v33  ;;  %v429_v50 = vsel %vm422_vm3, %v417_v34, %v419_v36 }
  0x8e   :  { %904 = vmatmul.mubr.msk.bf16.vlgmr.msra.gmra.mxu0 %vm118_vm1, %v953_v27 }
  0x8f   :  { %323 = vmatpush1.bf16.msra.mxu0 %v997_v2  ;;  %342 = vmatprep.mubr.bf16.mxu0 %v958_v5 }
  0x90   :  { %282 = vmatpush1.bf16.msra.mxu1 %v1031_v8  ;;  %v421_v38 = vpop.permute.xlu0 %420  ;;  %324 = vmatprep.subr.bf16.mxu0 %v1037_v9  ;;  %v405_v39 = vpop.permute.xlu1 %404 }
  0x91   :  { %907 = vmatprep.subr.bf16.mxu1 %v961_v29  ;;  %v430_v46 = vsel %vm422_vm3, %v419_v36, %v421_v38 }
  0x93   :  { %860 = vmatmul.mubr.msk.bf16.vlgmr.msra.gmra.mxu1 %vm118_vm1, %v954_v37  ;;  %325 = vmatpush1.bf16.msra.mxu0 %v1024_v7 }
  0x94   :  { %908 = vmatpush3.bf16.msra.mxu1 %v1009_v4  ;;  %v407_v41 = vpop.permute.xlu0 %406  ;;  %456 = vmatprep.subr.bf16.mxu0 %v428_v40  ;;  %v403_v42 = vpop.permute.xlu1 %402 }
  0x95   :  { %909 = vmatprep.subr.bf16.mxu1 %v961_v29  ;;  %911 = vmatprep.mubr.msk.bf16.mxu1 %vm962_vm2, %v961_v29  ;;  %v424_v44 = vsel %vm422_vm3, %v405_v39, %v407_v41  ;;  %v423_v48 = vsel %vm422_vm3, %v403_v42, %v405_v39 }
  0x96   :  { %861 = vmatmul.mubr.msk.bf16.vlgmr.msra.gmra.mxu0 %vm118_vm1, %v954_v37 }
  0x97   :  { %457 = vmatpush1.bf16.msra.mxu0 %v427_v43  ;;  %476 = vmatprep.mubr.bf16.mxu0 %v958_v5 }
  0x98   :  { %910 = vmatpush3.bf16.msra.mxu1 %v1043_v10  ;;  %v409_v45 = vpop.permute.xlu0 %408  ;;  %458 = vmatprep.subr.bf16.mxu0 %v424_v44  ;;  %v411_v47 = vpop.permute.xlu1 %410 }
  0x99   :  { %499 = vmatprep.subr.bf16.mxu1 %v430_v46  ;;  %v426_v52 = vsel %vm422_vm3, %v409_v45, %v411_v47  ;;  %v425_v54 = vsel %vm422_vm3, %v407_v41, %v409_v45 }
  0x9b   :  { %912 = vmatmul.mubr.msk.bf16.vlgmr.msra.gmra.mxu1 %vm118_vm1, %v954_v37  ;;  %459 = vmatpush1.bf16.msra.mxu0 %v423_v48 }
  0x9c   :  { %500 = vmatpush1.bf16.msra.mxu1 %v429_v50  ;;  %v602_v51 = vpop.permute.xlu0 %601  ;;  %915 = vmatprep.subr.bf16.mxu0 %v961_v29  ;;  %v604_v53 = vpop.permute.xlu1 %603 }
  0x9d   :  { %501 = vmatprep.subr.bf16.mxu1 %v426_v52  ;;  %519 = vmatprep.mubr.bf16.mxu1 %v958_v5  ;;  %v615_v56 = vsel %vm609_vm4, %v602_v51, %v604_v53 }
  0x9e   :  { %866 = vmatmul.mubr.msk.bf16.vlgmr.msra.gmra.mxu0 %vm118_vm1, %v955_v49 }
  0x9f   :  { %916 = vmatpush3.bf16.msra.mxu0 %v421_v38  ;;  %919 = vmatprep.mubr.msk.bf16.mxu0 %vm962_vm2, %v961_v29 }
  0xa0   :  { %502 = vmatpush1.bf16.msra.mxu1 %v425_v54  ;;  %v600_v55 = vpop.permute.xlu0 %599  ;;  %917 = vmatprep.subr.bf16.mxu0 %v961_v29  ;;  %v592_v58 = vpop.permute.xlu1 %591 }
  0xa1   :  { %v614_v57 = vsel %vm609_vm4, %v600_v55, %v602_v51  ;;  %643 = vmatprep.subr.bf16.mxu1 %v615_v56 }
  0xa3   :  { %867 = vmatmul.mubr.msk.bf16.vlgmr.msra.gmra.mxu1 %vm118_vm1, %v955_v49  ;;  %918 = vmatpush3.bf16.msra.mxu0 %v411_v47 }
  0xa4   :  { %644 = vmatpush1.bf16.msra.mxu1 %v614_v57  ;;  %v594_v59 = vpop.permute.xlu0 %593  ;;  %663 = vmatprep.mubr.bf16.mxu1 %v958_v5  ;;  %v590_v60 = vpop.permute.xlu1 %589 }
  0xa5   :  { %v611_v61 = vsel %vm609_vm4, %v592_v58, %v594_v59  ;;  %v610_v62 = vsel %vm609_vm4, %v590_v60, %v592_v58 }
  0xa6   :  { %920 = vmatmul.mubr.msk.bf16.vlgmr.msra.gmra.mxu0 %vm118_vm1, %v955_v49  ;;  %645 = vmatprep.subr.bf16.mxu1 %v611_v61 }
  0xa7   :  { %706 = vmatprep.mubr.bf16.mxu0 %v958_v5 }
  0xa8   :  { %646 = vmatpush1.bf16.msra.mxu1 %v610_v62  ;;  %v606_v0 = vpop.permute.xlu0 %605  ;;  %v608_v2 = vpop.permute.xlu1 %607 }
  0xa9   :  { %v616_v1 = vsel %vm609_vm4, %v604_v53, %v606_v0  ;;  %923 = vmatprep.subr.bf16.mxu1 %v961_v29  ;;  %v617_v3 = vsel %vm609_vm4, %v606_v0, %v608_v2 }
  0xaa   :  { %686 = vmatprep.subr.bf16.mxu0 %v617_v3 }
  0xab   :  { %872 = vmatmul.mubr.msk.bf16.vlgmr.msra.gmra.mxu1 %vm118_vm1, %v956_v63  ;;  %687 = vmatpush1.bf16.msra.mxu0 %v616_v1 }
  0xac   :  { %924 = vmatpush3.bf16.msra.mxu1 %v608_v2  ;;  %v596_v4 = vpop.permute.xlu0 %595  ;;  %v598_v7 = vpop.permute.xlu1 %597  ;;  %927 = vmatprep.mubr.msk.bf16.mxu1 %vm962_vm2, %v961_v29 }
  0xad   :  { %v612_v6 = vsel %vm609_vm4, %v594_v59, %v596_v4  ;;  %925 = vmatprep.subr.bf16.mxu1 %v961_v29  ;;  %v613_v5 = vsel %vm609_vm4, %v596_v4, %v598_v7 }
  0xae   :  { %688 = vmatprep.subr.bf16.mxu0 %v613_v5 }
  0xaf   :  { %689 = vmatpush1.bf16.msra.mxu0 %v612_v6 }
  0xb0   :  { %926 = vmatpush3.bf16.msra.mxu1 %v598_v7 }
  0xb2   :  { %873 = vmatmul.mubr.msk.bf16.vlgmr.msra.gmra.mxu0 %vm118_vm1, %v956_v63 }
  0xb3   :  { %928 = vmatmul.mubr.msk.bf16.vlgmr.msra.gmra.mxu1 %vm118_vm1, %v956_v63 }
  0xb9   :  { %v773_v47 = vpop.permute.xlu0 %772  ;;  %v778_v59 = vpop.permute.xlu1 %777 }
 0x146   :  { %v156_v8 = vpop.f32.mrf.mxu0 }
 0x148   :  { %v158_v9 = vpop.f32.mrf.mxu0 }
 0x14a   :  { %v160_v10 = vpop.f32.mrf.mxu0  ;;  %v199_v11 = vpop.f32.mrf.mxu1 }
 0x14c   :  { %v162_v12 = vpop.f32.mrf.mxu0  ;;  %v201_v13 = vpop.f32.mrf.mxu1 }
 0x14e   :  { %v242_v14 = vpop.f32.mrf.mxu0  ;;  %v203_v15 = vpop.f32.mrf.mxu1 }
 0x150   :  { %v905_v16 = vpop.f32.mrf.mxu0  ;;  %v1153_v17 = vpop.f32.mrf.mxu1 }
 0x152   :  { %v1155_v18 = vpop.f32.mrf.mxu0 }
 0x153   :  { %v301_v19 = vpop.f32.mrf.mxu1 }
 0x154   :  { %v906_v20 = vpop.f32.mrf.mxu0  ;;  %v302_v40 = vadd.f32 %v301_v19, %v156_v8 }
 0x155   :  { %v303_v21 = vpop.f32.mrf.mxu1 }
 0x156   :  { %v344_v22 = vpop.f32.mrf.mxu0  ;;  %v304_v43 = vadd.f32 %v303_v21, %v158_v9 }
 0x157   :  { %v305_v23 = vpop.f32.mrf.mxu1  ;;  %v345_v57 = vadd.f32 %v344_v22, %v199_v11 }
 0x158   :  { %v346_v24 = vpop.f32.mrf.mxu0  ;;  %v306_v48 = vadd.f32 %v305_v23, %v160_v10 }
 0x159   :  { %v307_v25 = vpop.f32.mrf.mxu1  ;;  %v347_v63 = vadd.f32 %v346_v24, %v201_v13 }
 0x15a   :  { %v348_v26 = vpop.f32.mrf.mxu0  ;;  %v308_v53 = vadd.f32 %v307_v25, %v162_v12 }
 0x15b   :  { %v387_v27 = vpop.f32.mrf.mxu1  ;;  %v349_v5 = vadd.f32 %v348_v26, %v203_v15 }
 0x15c   :  { %v350_v28 = vpop.f32.mrf.mxu0  ;;  %v388_v0 = vadd.f32 %v387_v27, %v242_v14 }
 0x15d   :  { %v913_v29 = vpop.f32.mrf.mxu1  ;;  %v351_v20 = vadd.f32 %v350_v28, %v1153_v17 }
 0x15e   :  { %v478_v30 = vpop.f32.mrf.mxu0 }
 0x15f   :  { %v390_v31 = vpop.f32.mrf.mxu1  ;;  %v571_v44 = vadd.f32 %v478_v30, %v302_v40 }
 0x160   :  { %v480_v32 = vpop.f32.mrf.mxu0  ;;  %v391_v21 = vadd.f32 %v390_v31, %v1155_v18 }
 0x161   :  { %v914_v33 = vpop.f32.mrf.mxu1  ;;  %v572_v49 = vadd.f32 %v480_v32, %v304_v43 }
 0x162   :  { %v482_v34 = vpop.f32.mrf.mxu0 }
 0x163   :  { %v521_v35 = vpop.f32.mrf.mxu1  ;;  %v576_v54 = vadd.f32 %v482_v34, %v306_v48 }
 0x164   :  { %v484_v36 = vpop.f32.mrf.mxu0  ;;  %v573_v1 = vadd.f32 %v521_v35, %v345_v57 }
 0x165   :  { %v523_v37 = vpop.f32.mrf.mxu1  ;;  %v577_v60 = vadd.f32 %v484_v36, %v308_v53 }
 0x166   :  { %v564_v38 = vpop.f32.mrf.mxu0  ;;  %v574_v12 = vadd.f32 %v523_v37, %v347_v63 }
 0x167   :  { %v525_v39 = vpop.f32.mrf.mxu1  ;;  %v575_v8 = vadd.f32 %v564_v38, %v388_v0 }
 0x168   :  { %v921_v41 = vpop.f32.mrf.mxu0  ;;  %v578_v13 = vadd.f32 %v525_v39, %v349_v5 }
 0x169   :  { %v527_v42 = vpop.f32.mrf.mxu1 }
 0x16a   :  { %v567_v45 = vpop.f32.mrf.mxu0  ;;  %v579_v33 = vadd.f32 %v527_v42, %v351_v20 }
 0x16b   :  { %v665_v46 = vpop.f32.mrf.mxu1  ;;  %v580_v27 = vadd.f32 %v567_v45, %v391_v21 }
 0x16c   :  { %v758_v50 = vadd.f32 %v665_v46, %v571_v44  ;;  %v922_v51 = vpop.f32.mrf.mxu0 }
 0x16d   :  { %v667_v52 = vpop.f32.mrf.mxu1 }
 0x16e   :  { %v780_v55 = vadd.f32 %v773_v47, %v758_v50  ;;  %v759_v56 = vadd.f32 %v667_v52, %v572_v49 }
 0x16f   :  { %v669_v58 = vpop.f32.mrf.mxu1 }
 0x170   :  { %v781_v61 = vadd.f32 %v773_v47, %v759_v56  ;;  %v763_v62 = vadd.f32 %v669_v58, %v576_v54  ;;  %v790_v3 = vmax.f32 %v780_v55, 0.0 }
 0x171   :  { %v671_v2 = vpop.f32.mrf.mxu1 }
 0x172   :  { %v791_v4 = vmax.f32 %v781_v61, 0.0  ;;  %v764_v6 = vadd.f32 %v671_v2, %v577_v60  ;;  %v785_v7 = vadd.f32 %v778_v59, %v763_v62  ;;  %v708_v9 = vpop.f32.mrf.mxu0 }
 0x173   :  { %v751_v10 = vpop.f32.mrf.mxu1  ;;  %v760_v19 = vadd.f32 %v708_v9, %v573_v1 }
 0x174   :  { %v881_v16 = vpack.c.bf16 %v791_v4, %v790_v3  ;;  %v786_v11 = vadd.f32 %v778_v59, %v764_v6  ;;  %v762_v14 = vadd.f32 %v751_v10, %v575_v8  ;;  %v710_v22 = vpop.f32.mrf.mxu0  ;;  %v795_v15 = vmax.f32 %v785_v7, 0.0 }
 0x175   :  { %v929_v23 = vpop.f32.mrf.mxu1  ;;  %v782_v25 = vadd.f32 %v773_v47, %v760_v19  ;;  %v761_v26 = vadd.f32 %v710_v22, %v574_v12 }
 0x176   :  { %832 = vst [vmem:[%s1182_s3] sm:$0xff] %v881_v16  ;;  %v796_v24 = vmax.f32 %v786_v11, 0.0  ;;  %v784_v29 = vadd.f32 %v773_v47, %v762_v14  ;;  %v712_v30 = vpop.f32.mrf.mxu0 }
 0x177   :  { %v754_v32 = vpop.f32.mrf.mxu1  ;;  %v783_v28 = vadd.f32 %v773_v47, %v761_v26  ;;  %v765_v18 = vadd.f32 %v712_v30, %v578_v13  ;;  %v792_v37 = vmax.f32 %v782_v25, 0.0 }
 0x178   :  { %v884_v17 = vpack.c.bf16 %v796_v24, %v795_v15  ;;  %v794_v31 = vmax.f32 %v784_v29, 0.0  ;;  %v767_v34 = vadd.f32 %v754_v32, %v580_v27  ;;  %v714_v35 = vpop.f32.mrf.mxu0 }
 0x179   :  { %v930_v36 = vpop.f32.mrf.mxu1  ;;  %v793_v38 = vmax.f32 %v783_v28, 0.0  ;;  %v787_v39 = vadd.f32 %v778_v59, %v765_v18  ;;  %v766_v40 = vadd.f32 %v714_v35, %v579_v33 }
 0x17a   :  { %836 = vst [vmem:[%s1182_s3 + $0x14] sm:$0xff] %v884_v17  ;;  %v883_v41 = vpack.c.bf16 %v794_v31, %v794_v31  ;;  %v789_v43 = vadd.f32 %v778_v59, %v767_v34 }
 0x17b   :  { %v882_v44 = vpack.c.bf16 %v793_v38, %v792_v37  ;;  %v788_v42 = vadd.f32 %v778_v59, %v766_v40  ;;  %v797_v46 = vmax.f32 %v787_v39, 0.0 }
 0x17c   :  { %835 = vst.msk [vmem:[%s1182_s3 + $0x10] sm:$0xf] %vm834_vm5, %v883_v41  ;;  %v799_v45 = vmax.f32 %v789_v43, 0.0 }
 0x17d   :  { %833 = vst [vmem:[%s1182_s3 + $0x8] sm:$0xff] %v882_v44  ;;  %v798_v47 = vmax.f32 %v788_v42, 0.0 }
 0x17e   :  { %v886_v48 = vpack.c.bf16 %v799_v45, %v799_v45 }
 0x17f   :  { %v885_v49 = vpack.c.bf16 %v798_v47, %v797_v46 }
 0x180   :  { %838 = vst.msk [vmem:[%s1182_s3 + $0x24] sm:$0xf] %vm834_vm5, %v886_v48 }
 0x181   :  { %837 = vst [vmem:[%s1182_s3 + $0x1c] sm:$0xff] %v885_v49 }

// kernel: _lambda_.5
= control target key start
LH: loop header
LB: loop body
LE: loop exit
PB: predicated region body
PF: predicated region fallthrough
CT: control target
= control target key end

     0   :  { %s818_s28 = smov 127   ;;  %v819_v6 = vmov 0   ;;  %s820_s18 = smov 119   ;;  %vm101_vm0 = vcmask 1039360   ;;  %vm282_vm1 = vcmask 973824   ;;  %vm114_vm2 = vcmask 523264   ;;  %s1116_s0 = inlined_call_operand.vmem [shape: bf16[64,172], index: 0, kind: input, shape index: {}]   ;;  %s1117_s1 = inlined_call_operand.vmem [shape: bf16[4,32,64], index: 1, kind: input, shape index: {}]   ;;  %s1118_s2 = inlined_call_operand.vmem [shape: f32[32,1], index: 2, kind: input, shape index: {}]   ;;  %s1119_s5 = inlined_call_operand.vmem [shape: f32[4,1], index: 5, kind: input, shape index: {}]   ;;  %s1120_s3 = inlined_call_operand.vmem [shape: f32[162,2], index: 3, kind: input, shape index: {}]   ;;  %s1121_s6 = inlined_call_operand.vmem [shape: f32[32,2], index: 6, kind: output, shape index: {0}]   ;;  %s1122_s4 = inlined_call_operand.vmem [shape: f32[4,32], index: 4, kind: input, shape index: {}]   ;;  %s1123_s7 = inlined_call_operand.vmem [shape: f32[4,2], index: 7, kind: output, shape index: {1}]  }
   0x1   :  { %v867_v0 = vld [vmem:[%s1116_s0 + $0x30] ss:$8 sps:$4 sm:$0xff]   ;;  %v872_v1 = vld [vmem:[%s1116_s0 + $0x20] ss:$8 sps:$4 sm:$0xff]   ;;  %v878_v2 = vld [vmem:[%s1116_s0 + $0x34] ss:$8 sps:$4 sm:$0xff]   ;;  %153 = vmatprep.mubr.bf16.mxu1 %v819_v6  ;;  %333 = vmatprep.mubr.bf16.mxu0 %v819_v6 }
   0x2   :  { %97 = vrot.lane.b32.xlu0 %v867_v0, %s818_s28  ;;  %93 = vrot.lane.b32.xlu1 %v872_v1, %s818_s28  ;;  %v884_v3 = vld [vmem:[%s1116_s0 + $0x24] ss:$8 sps:$4 sm:$0xff]   ;;  %v890_v4 = vld [vmem:[%s1116_s0 + $0x10] ss:$8 sps:$4 sm:$0xff]   ;;  %s821_s19 = smov 118   ;;  %vm393_vm3 = vcmask 965632  }
   0x3   :  { %v896_v5 = vld [vmem:[%s1116_s0 + $0x14] ss:$8 sps:$4 sm:$0xff]   ;;  %797 = vset.pattern.permute.xlu1 %v819_v6  ;;  %v904_v7 = vld [vmem:[%s1116_s0 + $0x4] ss:$8 sps:$4 sm:$0xff]   ;;  %v909_v8 = vld [vmem:[%s1116_s0] ss:$8 sps:$4 sm:$0xff]   ;;  %796 = vset.pattern.permute.xlu0 %v819_v6 }
   0x4   :  { %v474_v9 = vld [vmem:[%s1118_s2 + $0x8] sm:$0xff]  ;;  %v473_v10 = vld [vmem:[%s1118_s2] sm:$0xff]  ;;  %v475_v11 = vld [vmem:[%s1118_s2 + $0x10] sm:$0xff]  ;;  %v822_v58 = vmov 0.0   ;;  %vm547_vm4 = vcmask 1041408   ;;  %vm534_vm5 = vcmask 277504  }
   0x5   :  { %v476_v12 = vld [vmem:[%s1118_s2 + $0x18] sm:$0xff]  ;;  %v642_v13 = vld [vmem:[%s1119_s5] sm:$0xf]  ;;  %v810_v28 = vld [vmem:[%s1117_s1 + $0x10] sm:$0xff]   ;;  %vm823_vm6 = vmmov 0   ;;  %vm636_vm7 = vcmask 15360  }
   0x6   :  { %99 = vrot.lane.b32.xlu0 %v878_v2, %s818_s28  ;;  %95 = vrot.lane.b32.xlu1 %v884_v3, %s818_s28  ;;  %v811_v34 = vld [vmem:[%s1117_s1 + $0x18] sm:$0xff]   ;;  %v812_v40 = vld [vmem:[%s1117_s1] sm:$0xff]   ;;  %vm648_vm8 = vcmask 261120   ;;  %vm722_vm9 = vcmask 11264  }
   0x7   :  { %v813_v48 = vld [vmem:[%s1117_s1 + $0x8] sm:$0xff]   ;;  %v814_v50 = vld [vmem:[%s1117_s1 + $0x20] sm:$0xff]   ;;  %v816_v55 = vld [vmem:[%s1117_s1 + $0x30] sm:$0xff]  }
   0x8   :  { %v815_v56 = vld [vmem:[%s1117_s1 + $0x28] sm:$0xff]   ;;  %v817_v57 = vld [vmem:[%s1117_s1 + $0x38] sm:$0xff]   ;;  %v527_v60 = vld [vmem:[%s1120_s3 + $0x70] sm:$0xff] }
   0x9   :  { %v528_v59 = vld [vmem:[%s1120_s3 + $0x78] sm:$0xff]  ;;  %v526_v61 = vld [vmem:[%s1120_s3 + $0x68] sm:$0xff]  ;;  %v525_v62 = vld [vmem:[%s1120_s3 + $0x60] sm:$0xff] }
   0xa   :  { %89 = vrot.lane.b32.xlu0 %v890_v4, %s818_s28  ;;  %91 = vrot.lane.b32.xlu1 %v896_v5, %s818_s28  ;;  %v524_v63 = vld [vmem:[%s1120_s3 + $0x58] sm:$0xff] }
   0xe   :  { %85 = vrot.lane.b32.xlu0 %v909_v8, %s818_s28  ;;  %87 = vrot.lane.b32.xlu1 %v904_v7, %s818_s28 }
  0x12   :  { %278 = vrot.lane.b32.xlu0 %v867_v0, %s820_s18  ;;  %280 = vrot.lane.b32.xlu1 %v878_v2, %s820_s18 }
  0x16   :  { %389 = vrot.lane.b32.xlu0 %v867_v0, %s821_s19  ;;  %391 = vrot.lane.b32.xlu1 %v878_v2, %s821_s19 }
  0x1a   :  { %274 = vrot.lane.b32.xlu0 %v872_v1, %s820_s18  ;;  %276 = vrot.lane.b32.xlu1 %v884_v3, %s820_s18 }
  0x1e   :  { %385 = vrot.lane.b32.xlu0 %v872_v1, %s821_s19  ;;  %387 = vrot.lane.b32.xlu1 %v884_v3, %s821_s19 }
  0x22   :  { %270 = vrot.lane.b32.xlu0 %v890_v4, %s820_s18  ;;  %272 = vrot.lane.b32.xlu1 %v896_v5, %s820_s18 }
  0x26   :  { %381 = vrot.lane.b32.xlu0 %v890_v4, %s821_s19  ;;  %383 = vrot.lane.b32.xlu1 %v896_v5, %s821_s19 }
  0x2a   :  { %266 = vrot.lane.b32.xlu0 %v909_v8, %s820_s18  ;;  %268 = vrot.lane.b32.xlu1 %v904_v7, %s820_s18 }
  0x2e   :  { %377 = vrot.lane.b32.xlu0 %v909_v8, %s821_s19  ;;  %379 = vrot.lane.b32.xlu1 %v904_v7, %s821_s19 }
  0x32   :  { %484 = vperm.xlu1 %797, %v474_v9   ;;  %479 = vperm.xlu0 %796, %v473_v10   ;;  %v514_v9 = vld [vmem:[%s1120_s3 + $0x8] sm:$0xff]  ;;  %v513_v10 = vld [vmem:[%s1120_s3] sm:$0xff] }
  0x36   :  { %489 = vperm.xlu1 %797, %v475_v11   ;;  %494 = vperm.xlu0 %796, %v476_v12   ;;  %v533_v11 = vld [vmem:[%s1120_s3 + $0xa0] sm:$0x3]  ;;  %v532_v12 = vld [vmem:[%s1120_s3 + $0x98] sm:$0xff] }
  0x3a   :  { %645 = vperm.xlu1 %797, %v642_v13   ;;  %v531_v13 = vld [vmem:[%s1120_s3 + $0x90] sm:$0xff] }
  0x74   :  { %v98_v14 = vpop.permute.xlu0 %97  ;;  %v94_v15 = vpop.permute.xlu1 %93 }
  0x78   :  { %v100_v16 = vpop.permute.xlu0 %99  ;;  %v96_v17 = vpop.permute.xlu1 %95 }
  0x79   :  { %129 = vmatprep.subr.bf16.mxu1 %v100_v16  ;;  %v105_v18 = vsel %vm101_vm0, %v98_v14, %v100_v16  ;;  %v104_v21 = vsel %vm101_vm0, %v94_v15, %v96_v17  ;;  %v530_v14 = vld [vmem:[%s1120_s3 + $0x88] sm:$0xff]  ;;  %v529_v15 = vld [vmem:[%s1120_s3 + $0x80] sm:$0xff] }
  0x7a   :  { %130 = vmatpush1.bf16.msra.mxu1 %v105_v18 }
  0x7b   :  { %131 = vmatprep.subr.bf16.mxu1 %v96_v17 }
  0x7c   :  { %v90_v19 = vpop.permute.xlu0 %89  ;;  %v92_v20 = vpop.permute.xlu1 %91 }
  0x7d   :  { %v103_v22 = vsel %vm101_vm0, %v90_v19, %v92_v20 }
  0x7e   :  { %132 = vmatpush1.bf16.msra.mxu1 %v104_v21 }
  0x7f   :  { %133 = vmatprep.subr.bf16.mxu1 %v92_v20 }
  0x80   :  { %v86_v23 = vpop.permute.xlu0 %85  ;;  %v88_v24 = vpop.permute.xlu1 %87 }
  0x81   :  { %v102_v25 = vsel %vm101_vm0, %v86_v23, %v88_v24 }
  0x82   :  { %134 = vmatpush1.bf16.msra.mxu1 %v103_v22 }
  0x83   :  { %135 = vmatprep.subr.bf16.mxu1 %v88_v24 }
  0x84   :  { %v279_v26 = vpop.permute.xlu0 %278  ;;  %v281_v27 = vpop.permute.xlu1 %280 }
  0x85   :  { %309 = vmatprep.subr.bf16.mxu0 %v281_v27  ;;  %v286_v29 = vsel %vm282_vm1, %v279_v26, %v281_v27 }
  0x86   :  { %136 = vmatpush1.bf16.msra.mxu1 %v102_v25  ;;  %310 = vmatpush1.bf16.msra.mxu0 %v286_v29 }
  0x87   :  { %206 = vmatprep.subr.bf16.mxu1 %v878_v2  ;;  %v521_v2 = vld [vmem:[%s1120_s3 + $0x40] sm:$0xff] }
  0x88   :  { %v390_v30 = vpop.permute.xlu0 %389  ;;  %v392_v31 = vpop.permute.xlu1 %391 }
  0x89   :  { %746 = vmatmul.mubr.msk.bf16.vlgmr.msra.gmra.mxu1 %vm114_vm2, %v810_v28  ;;  %v397_v43 = vsel %vm393_vm3, %v390_v30, %v392_v31 }
  0x8a   :  { %207 = vmatpush1.bf16.msra.mxu1 %v867_v0  ;;  %163 = vmatprep.mubr.bf16.mxu1 %v819_v6  ;;  %v523_v0 = vld [vmem:[%s1120_s3 + $0x50] sm:$0xff] }
  0x8b   :  { %208 = vmatprep.subr.bf16.mxu1 %v884_v3  ;;  %v520_v3 = vld [vmem:[%s1120_s3 + $0x38] sm:$0xff] }
  0x8c   :  { %v275_v32 = vpop.permute.xlu0 %274  ;;  %v277_v33 = vpop.permute.xlu1 %276 }
  0x8d   :  { %311 = vmatprep.subr.bf16.mxu0 %v277_v33  ;;  %v285_v35 = vsel %vm282_vm1, %v275_v32, %v277_v33 }
  0x8e   :  { %209 = vmatpush1.bf16.msra.mxu1 %v872_v1  ;;  %312 = vmatpush1.bf16.msra.mxu0 %v285_v35  ;;  %v522_v1 = vld [vmem:[%s1120_s3 + $0x48] sm:$0xff] }
  0x8f   :  { %210 = vmatprep.subr.bf16.mxu1 %v896_v5  ;;  %v518_v5 = vld [vmem:[%s1120_s3 + $0x28] sm:$0xff] }
  0x90   :  { %v386_v36 = vpop.permute.xlu0 %385  ;;  %v388_v37 = vpop.permute.xlu1 %387 }
  0x91   :  { %747 = vmatmul.mubr.msk.bf16.gmra.mxu1 %vm114_vm2, %v811_v34  ;;  %v396_v46 = vsel %vm393_vm3, %v386_v36, %v388_v37 }
  0x92   :  { %211 = vmatpush1.bf16.msra.mxu1 %v890_v4  ;;  %230 = vmatprep.mubr.bf16.mxu1 %v819_v6  ;;  %v519_v4 = vld [vmem:[%s1120_s3 + $0x30] sm:$0xff] }
  0x93   :  { %212 = vmatprep.subr.bf16.mxu1 %v904_v7  ;;  %v516_v7 = vld [vmem:[%s1120_s3 + $0x18] sm:$0xff] }
  0x94   :  { %v271_v38 = vpop.permute.xlu0 %270  ;;  %v273_v39 = vpop.permute.xlu1 %272 }
  0x95   :  { %313 = vmatprep.subr.bf16.mxu0 %v273_v39  ;;  %v284_v41 = vsel %vm282_vm1, %v271_v38, %v273_v39 }
  0x96   :  { %213 = vmatpush1.bf16.msra.mxu1 %v909_v8  ;;  %314 = vmatpush1.bf16.msra.mxu0 %v284_v41  ;;  %v515_v8 = vld [vmem:[%s1120_s3 + $0x10] sm:$0xff] }
  0x97   :  { %420 = vmatprep.subr.bf16.mxu1 %v392_v31 }
  0x98   :  { %v382_v42 = vpop.permute.xlu0 %381  ;;  %v384_v44 = vpop.permute.xlu1 %383 }
  0x99   :  { %750 = vmatmul.mubr.msk.bf16.vlgmr.msra.gmra.mxu1 %vm114_vm2, %v812_v40  ;;  %v395_v52 = vsel %vm393_vm3, %v382_v42, %v384_v44 }
  0x9a   :  { %421 = vmatpush1.bf16.msra.mxu1 %v397_v43  ;;  %240 = vmatprep.mubr.bf16.mxu1 %v819_v6 }
  0x9b   :  { %422 = vmatprep.subr.bf16.mxu1 %v388_v37 }
  0x9c   :  { %v267_v45 = vpop.permute.xlu0 %266  ;;  %v269_v47 = vpop.permute.xlu1 %268 }
  0x9d   :  { %315 = vmatprep.subr.bf16.mxu0 %v269_v47  ;;  %v283_v49 = vsel %vm282_vm1, %v267_v45, %v269_v47 }
  0x9e   :  { %423 = vmatpush1.bf16.msra.mxu1 %v396_v46  ;;  %316 = vmatpush1.bf16.msra.mxu0 %v283_v49 }
  0x9f   :  { %424 = vmatprep.subr.bf16.mxu1 %v384_v44  ;;  %551 = vmatprep.subr.mxu0 %v822_v58 }
  0xa0   :  { %v378_v51 = vpop.permute.xlu0 %377  ;;  %v380_v53 = vpop.permute.xlu1 %379 }
  0xa1   :  { %751 = vmatmul.mubr.msk.bf16.gmra.mxu1 %vm114_vm2, %v813_v48  ;;  %758 = vmatmul.mubr.msk.bf16.vlgmr.msra.gmra.mxu0 %vm114_vm2, %v814_v50  ;;  %v394_v54 = vsel %vm393_vm3, %v378_v51, %v380_v53 }
  0xa2   :  { %425 = vmatpush1.bf16.msra.mxu1 %v395_v52  ;;  %343 = vmatprep.mubr.bf16.mxu0 %v819_v6 }
  0xa3   :  { %426 = vmatprep.subr.bf16.mxu1 %v380_v53  ;;  %444 = vmatprep.mubr.bf16.mxu1 %v819_v6 }
  0xa4   :  { %552 = vmatpush1.msra.mxu0 %v528_v59 }
  0xa5   :  { %553 = vmatprep.subr.mxu0 %v822_v58 }
  0xa6   :  { %427 = vmatpush1.bf16.msra.mxu1 %v394_v54  ;;  %554 = vmatpush1.msra.mxu0 %v527_v60 }
  0xa7   :  { %779 = vmatprep.subr.mxu1 %v822_v58  ;;  %555 = vmatprep.subr.mxu0 %v822_v58 }
  0xa8   :  { %556 = vmatpush1.msra.mxu0 %v526_v61 }
  0xa9   :  { %766 = vmatmul.mubr.msk.bf16.vlgmr.msra.gmra.mxu1 %vm114_vm2, %v816_v55  ;;  %759 = vmatmul.mubr.msk.bf16.gmra.mxu0 %vm114_vm2, %v815_v56 }
  0xaa   :  { %454 = vmatprep.mubr.bf16.mxu1 %v819_v6  ;;  %557 = vmatprep.subr.mxu0 %v822_v58  ;;  %v517_v6 = vld [vmem:[%s1120_s3 + $0x20] sm:$0xff] }
  0xab   :  { %558 = vmatpush1.msra.mxu0 %v525_v62 }
  0xac   :  { %559 = vmatprep.subr.mxu0 %v822_v58 }
  0xad   :  { %560 = vmatpush1.msra.mxu0 %v524_v63  ;;  %v480_v47 = vpop.permute.xlu0 %479  ;;  %v485_v54 = vpop.permute.xlu1 %484 }
  0xae   :  { %561 = vmatprep.subr.mxu0 %v822_v58 }
  0xaf   :  { %562 = vmatpush1.msra.mxu0 %v523_v0 }
  0xb0   :  { %563 = vmatprep.subr.mxu0 %v822_v58 }
  0xb1   :  { %767 = vmatmul.mubr.msk.bf16.gmra.mxu1 %vm114_vm2, %v817_v57  ;;  %564 = vmatpush1.msra.mxu0 %v522_v1 }
  0xb2   :  { %565 = vmatprep.subr.mxu0 %v822_v58  ;;  %787 = vmatprep.mubr.msk.f32.mxu1 %vm823_vm6, %v822_v58 }
  0xb3   :  { %566 = vmatpush1.msra.mxu0 %v521_v2 }
  0xb4   :  { %567 = vmatprep.subr.mxu0 %v822_v58 }
  0xb5   :  { %568 = vmatpush1.msra.mxu0 %v520_v3 }
  0xb6   :  { %569 = vmatprep.subr.mxu0 %v822_v58 }
  0xb7   :  { %570 = vmatpush1.msra.mxu0 %v519_v4 }
  0xb8   :  { %571 = vmatprep.subr.mxu0 %v822_v58 }
  0xb9   :  { %572 = vmatpush1.msra.mxu0 %v518_v5 }
  0xba   :  { %573 = vmatprep.subr.mxu0 %v822_v58 }
  0xbb   :  { %574 = vmatpush1.msra.mxu0 %v517_v6 }
  0xbc   :  { %575 = vmatprep.subr.mxu0 %v822_v58 }
  0xbd   :  { %576 = vmatpush1.msra.mxu0 %v516_v7 }
  0xbe   :  { %577 = vmatprep.subr.mxu0 %v822_v58 }
  0xbf   :  { %578 = vmatpush1.msra.mxu0 %v515_v8 }
  0xc0   :  { %579 = vmatprep.subr.mxu0 %v822_v58 }
  0xc1   :  { %580 = vmatpush1.msra.mxu0 %v514_v9 }
  0xc2   :  { %581 = vmatprep.subr.mxu0 %v822_v58 }
  0xc3   :  { %582 = vmatpush1.msra.mxu0 %v513_v10  ;;  %v490_v10 = vpop.permute.xlu1 %489 }
  0xc4   :  { %605 = vmatprep.subr.mxu0 %v822_v58 }
  0xc5   :  { %768 = vmatpush2.msk.msra.mxu0 %vm547_vm4, %v533_v11 }
  0xc6   :  { %607 = vmatprep.subr.mxu0 %v822_v58 }
  0xc7   :  { %608 = vmatpush2.msra.mxu0 %v532_v12 }
  0xc8   :  { %609 = vmatprep.subr.mxu0 %v822_v58 }
  0xc9   :  { %610 = vmatpush2.msra.mxu0 %v531_v13 }
  0xca   :  { %611 = vmatprep.subr.mxu0 %v822_v58 }
  0xcb   :  { %612 = vmatpush2.msra.mxu0 %v530_v14 }
  0xcc   :  { %613 = vmatprep.subr.mxu0 %v822_v58 }
  0xcd   :  { %614 = vmatpush2.msra.mxu0 %v529_v15 }
 0x149   :  { %v155_v16 = vpop.f32.mrf.mxu1 }
 0x14b   :  { %v157_v17 = vpop.f32.mrf.mxu1 }
 0x14d   :  { %v159_v18 = vpop.f32.mrf.mxu1 }
 0x14f   :  { %v161_v19 = vpop.f32.mrf.mxu1 }
 0x151   :  { %v165_v20 = vpop.f32.mrf.mxu1 }
 0x153   :  { %v167_v21 = vpop.f32.mrf.mxu1 }
 0x155   :  { %v169_v22 = vpop.f32.mrf.mxu1 }
 0x157   :  { %v171_v23 = vpop.f32.mrf.mxu1 }
 0x159   :  { %v232_v24 = vpop.f32.mrf.mxu1 }
 0x15a   :  { %v233_v33 = vadd.f32 %v232_v24, %v155_v16 }
 0x15b   :  { %v234_v25 = vpop.f32.mrf.mxu1 }
 0x15c   :  { %v235_v36 = vadd.f32 %v234_v25, %v157_v17 }
 0x15d   :  { %v236_v26 = vpop.f32.mrf.mxu1 }
 0x15e   :  { %v237_v40 = vadd.f32 %v236_v26, %v159_v18 }
 0x15f   :  { %v238_v27 = vpop.f32.mrf.mxu1 }
 0x160   :  { %v239_v45 = vadd.f32 %v238_v27, %v161_v19 }
 0x161   :  { %v242_v28 = vpop.f32.mrf.mxu1  ;;  %v335_v29 = vpop.f32.mrf.mxu0 }
 0x162   :  { %v354_v37 = vadd.f32 %v335_v29, %v233_v33  ;;  %v243_v52 = vadd.f32 %v242_v28, %v165_v20 }
 0x163   :  { %v244_v30 = vpop.f32.mrf.mxu1  ;;  %v337_v31 = vpop.f32.mrf.mxu0 }
 0x164   :  { %v355_v41 = vadd.f32 %v337_v31, %v235_v36  ;;  %v245_v60 = vadd.f32 %v244_v30, %v167_v21  ;;  %v495_v21 = vpop.permute.xlu0 %494 }
 0x165   :  { %v246_v32 = vpop.f32.mrf.mxu1  ;;  %v339_v34 = vpop.f32.mrf.mxu0 }
 0x166   :  { %v356_v46 = vadd.f32 %v339_v34, %v237_v40  ;;  %v247_v3 = vadd.f32 %v246_v32, %v169_v22 }
 0x167   :  { %v248_v35 = vpop.f32.mrf.mxu1  ;;  %v341_v38 = vpop.f32.mrf.mxu0 }
 0x168   :  { %v357_v53 = vadd.f32 %v341_v38, %v239_v45  ;;  %v249_v9 = vadd.f32 %v248_v35, %v171_v23  ;;  %v646_v38 = vpop.permute.xlu1 %645 }
 0x169   :  { %v446_v39 = vpop.f32.mrf.mxu1  ;;  %v345_v42 = vpop.f32.mrf.mxu0 }
 0x16a   :  { %v465_v43 = vadd.f32 %v446_v39, %v354_v37  ;;  %v358_v61 = vadd.f32 %v345_v42, %v243_v52  ;;  %v641_v37 = vld [vmem:[%s1122_s4] sm:$0xf] }
 0x16b   :  { %v448_v44 = vpop.f32.mrf.mxu1  ;;  %v347_v48 = vpop.f32.mrf.mxu0 }
 0x16c   :  { %v466_v49 = vadd.f32 %v448_v44, %v355_v41  ;;  %v497_v50 = vadd.f32 %v480_v47, %v465_v43  ;;  %v359_v4 = vadd.f32 %v347_v48, %v245_v60 }
 0x16d   :  { %v450_v51 = vpop.f32.mrf.mxu1  ;;  %v349_v57 = vpop.f32.mrf.mxu0 }
 0x16e   :  { %v498_v55 = vadd.f32 %v480_v47, %v466_v49  ;;  %v467_v56 = vadd.f32 %v450_v51, %v356_v46  ;;  %v505_v0 = vmax.f32 %v497_v50, 0.0  ;;  %v360_v11 = vadd.f32 %v349_v57, %v247_v3 }
 0x16f   :  { %v452_v59 = vpop.f32.mrf.mxu1  ;;  %v351_v7 = vpop.f32.mrf.mxu0 }
 0x170   :  { %v506_v62 = vmax.f32 %v498_v55, 0.0  ;;  %v468_v63 = vadd.f32 %v452_v59, %v357_v53  ;;  %v499_v1 = vadd.f32 %v485_v54, %v467_v56  ;;  %v361_v17 = vadd.f32 %v351_v7, %v249_v9 }
 0x171   :  { %v456_v2 = vpop.f32.mrf.mxu1 }
 0x172   :  { %v500_v5 = vadd.f32 %v485_v54, %v468_v63  ;;  %v469_v6 = vadd.f32 %v456_v2, %v358_v61  ;;  %769 = vmatprep.mubr.msk.f32.mxu0 %vm534_vm5, %v506_v62  ;;  %v507_v14 = vmax.f32 %v499_v1, 0.0 }
 0x173   :  { %v458_v8 = vpop.f32.mrf.mxu1  ;;  %616 = vmatmul.mubr.f32.vlgmr.msra.gmra.mxu0 %v505_v0 }
 0x174   :  { %v508_v12 = vmax.f32 %v500_v5, 0.0  ;;  %v470_v13 = vadd.f32 %v458_v8, %v359_v4  ;;  %v501_v15 = vadd.f32 %v490_v10, %v469_v6 }
 0x175   :  { %v460_v16 = vpop.f32.mrf.mxu1 }
 0x176   :  { %v502_v18 = vadd.f32 %v490_v10, %v470_v13  ;;  %v471_v19 = vadd.f32 %v460_v16, %v360_v11  ;;  %770 = vmatprep.mubr.msk.f32.mxu0 %vm534_vm5, %v508_v12  ;;  %v509_v25 = vmax.f32 %v501_v15, 0.0 }
 0x177   :  { %v462_v20 = vpop.f32.mrf.mxu1  ;;  %621 = vmatmul.mubr.f32.gmra.mxu0 %v507_v14 }
 0x178   :  { %v510_v22 = vmax.f32 %v502_v18, 0.0  ;;  %v472_v24 = vadd.f32 %v462_v20, %v361_v17  ;;  %v503_v26 = vadd.f32 %v495_v21, %v471_v19 }
 0x17a   :  { %v504_v23 = vadd.f32 %v495_v21, %v472_v24  ;;  %771 = vmatprep.mubr.msk.f32.mxu0 %vm534_vm5, %v510_v22  ;;  %v511_v28 = vmax.f32 %v503_v26, 0.0 }
 0x17b   :  { %626 = vmatmul.mubr.f32.gmra.mxu0 %v509_v25 }
 0x17c   :  { %v512_v27 = vmax.f32 %v504_v23, 0.0 }
 0x17e   :  { %772 = vmatprep.mubr.msk.f32.mxu0 %vm534_vm5, %v512_v27 }
 0x17f   :  { %631 = vmatmul.mubr.f32.gmra.mxu0 %v511_v28 }
 0x233   :  { %v617_v29 = vpop.f32.mrf.mxu0 }
 0x234   :  { %637 = vst.msk [vmem:[%s1121_s6] sm:$0xff] %vm636_vm7, %v617_v29 }
 0x235   :  { %v619_v30 = vpop.f32.mrf.mxu0 }
 0x237   :  { %v622_v31 = vpop.f32.mrf.mxu0 }
 0x238   :  { %638 = vst.msk [vmem:[%s1121_s6 + $0x8] sm:$0xff] %vm636_vm7, %v622_v31 }
 0x239   :  { %v624_v32 = vpop.f32.mrf.mxu0 }
 0x23b   :  { %v627_v33 = vpop.f32.mrf.mxu0 }
 0x23c   :  { %639 = vst.msk [vmem:[%s1121_s6 + $0x10] sm:$0xff] %vm636_vm7, %v627_v33 }
 0x23d   :  { %v629_v34 = vpop.f32.mrf.mxu0 }
 0x23f   :  { %v632_v35 = vpop.f32.mrf.mxu0 }
 0x240   :  { %640 = vst.msk [vmem:[%s1121_s6 + $0x18] sm:$0xff] %vm636_vm7, %v632_v35  ;;  %780 = vmatpush3.msra.mxu1 %v632_v35 }
 0x241   :  { %v634_v36 = vpop.f32.mrf.mxu0  ;;  %781 = vmatprep.subr.mxu1 %v822_v58 }
 0x242   :  { %782 = vmatpush3.msra.mxu1 %v627_v33 }
 0x243   :  { %783 = vmatprep.subr.mxu1 %v822_v58 }
 0x244   :  { %784 = vmatpush3.msra.mxu1 %v622_v31 }
 0x245   :  { %785 = vmatprep.subr.mxu1 %v822_v58 }
 0x246   :  { %786 = vmatpush3.msra.mxu1 %v617_v29 }
 0x247   :  { %788 = vmatmul.mubr.msk.f32.vlgmr.msra.gmra.mxu1 %vm648_vm8, %v641_v37 }
 0x307   :  { %v718_v39 = vpop.f32.mrf.mxu1 }
 0x308   :  { %v719_v40 = vadd.f32 %v718_v39, %v646_v38 }
 0x309   :  { %v789_v41 = vpop.f32.mrf.mxu1 }
 0x30a   :  { %723 = vst.msk [vmem:[%s1123_s7] sm:$0xf] %vm722_vm9, %v719_v40 }

</bundles_post_ra>
